<compile_context>
chip_gen: v5e
topology: v5e:2x2
jax: 0.10.0
libtpu: 0.0.40
codegen_flags: <defaults>
</compile_context>

<pallas_src>
import math
from functools import partial

import jax
import jax.numpy as jnp
from jax import lax
from jax.experimental import pallas as pl
from jax.experimental.pallas import tpu as pltpu

D_MODEL = 32
N_HEADS = 4
D_FF = 64
N_LAYERS = 2
EPS = 1e-6
NEG_INF = -1e9
# Set True to move the reciprocals onto the EUP (per perf review); kept exact by
# default so the rtol/atol=1e-3 check below is guaranteed to hold.
APPROX_RECIP = False


# ---------------- fused Pallas kernel (entire decoder) ----------------

def _decoder_kernel(x_ref, enc_ref, tbias_ref, sbias_ref,
                    ln_a_ref, ln_b_ref,
                    wqkv_ref, bqkv_ref, wo_ref, bo_ref,
                    w1_ref, b1_ref, w2_ref, b2_ref,
                    out_ref, *, n_layers, n_heads, eps):
    D = x_ref.shape[-1]
    dk = D // n_heads
    f32 = jnp.float32

    x = x_ref[...].astype(f32)          # (B*Sq, D)
    enc = enc_ref[...].astype(f32)      # (B*Sk, D)
    tbias = tbias_ref[...]              # (B*Sq, B*Sq) additive, block-diagonal
    sbias = sbias_ref[...]              # (B*Sq, B*Sk) additive, block-diagonal

    # small parameter tables, loaded once and kept 2-D
    ln_a = ln_a_ref[...]                # (3L+1, D)
    ln_b = ln_b_ref[...]                # (3L+1, D)
    bqkv_all = bqkv_ref[...]            # (2L, 3D)
    bo_all = bo_ref[...]                # (2L, D)
    b1_all = b1_ref[...]                # (L, D_FF)
    b2_all = b2_ref[...]                # (L, D)

    def layer_norm(v, row):
        a = ln_a[row:row + 1, :]
        b = ln_b[row:row + 1, :]
        mean = jnp.mean(v, axis=-1, keepdims=True)
        diff = v - mean
        # torch.std() unbiased estimator (divide by N-1); module does /(std+eps)
        std = jnp.sqrt(jnp.sum(diff * diff, axis=-1, keepdims=True) / (D - 1))
        inv = pl.reciprocal(std + eps, approx=APPROX_RECIP)
        return a * (diff * inv) + b

    def attention(q, k, v, bias, attn_idx):
        # q: (Rq, D), k/v: (Rk, D), bias: (Rq, Rk) block-diagonal additive mask.
        # One tall matmul per head over the whole batch; off-batch scores carry
        # a -1e9 bias so their probabilities underflow to 0 (== per-batch attn).
        # Wo is distributed over heads -> no lane concatenate of dk-wide pieces.
        wo = wo_ref[attn_idx]                                 # (D, D) (in, out)
        acc = None
        for h in range(n_heads):
            sl = slice(h * dk, (h + 1) * dk)
            s = lax.dot_general(q[:, sl], k[:, sl], (((1,), (1,)), ((), ())),
                                preferred_element_type=f32)   # (Rq, Rk)
            s = s + bias                                      # additive mask (1 vadd)
            m = jnp.max(s, axis=-1, keepdims=True)
            p = jnp.exp(s - m)
            p = p * pl.reciprocal(jnp.sum(p, axis=-1, keepdims=True),
                                  approx=APPROX_RECIP)
            o_h = jnp.dot(p, v[:, sl], preferred_element_type=f32)       # (Rq, dk)
            contrib = jnp.dot(o_h, wo[sl, :], preferred_element_type=f32)  # (Rq, D)
            acc = contrib if acc is None else acc + contrib
        return acc + bo_all[attn_idx:attn_idx + 1, :]

    for l in range(n_layers):
        # ---- self-attention sublayer (pre-norm residual) ----
        xn = layer_norm(x, 3 * l + 0)
        idx = 2 * l + 0
        qkv = (jnp.dot(xn, wqkv_ref[idx], preferred_element_type=f32)
               + bqkv_all[idx:idx + 1, :])                    # fused QKV, scale pre-folded
        x = x + attention(qkv[:, 0:D], qkv[:, D:2 * D], qkv[:, 2 * D:3 * D],
                          tbias, idx)

        # ---- cross-attention sublayer ----
        xn = layer_norm(x, 3 * l + 1)
        idx = 2 * l + 1
        wqkv = wqkv_ref[idx]
        bqkv = bqkv_all[idx:idx + 1, :]
        q = jnp.dot(xn, wqkv[:, 0:D], preferred_element_type=f32) + bqkv[:, 0:D]
        kv = jnp.dot(enc, wqkv[:, D:3 * D], preferred_element_type=f32) + bqkv[:, D:3 * D]
        x = x + attention(q, kv[:, 0:D], kv[:, D:2 * D], sbias, idx)

        # ---- feed-forward sublayer ----
        xn = layer_norm(x, 3 * l + 2)
        h = jnp.maximum(jnp.dot(xn, w1_ref[l], preferred_element_type=f32)
                        + b1_all[l:l + 1, :], 0.0)
        x = x + jnp.dot(h, w2_ref[l], preferred_element_type=f32) + b2_all[l:l + 1, :]

    # final LayerNorm (Decoder.norm)
    # TODO(synk): nn.Dropout inside ResidualConnection/attention is identity in eval mode; omitted.
    out_ref[...] = layer_norm(x, 3 * n_layers).astype(out_ref.dtype)


# ---------------- parameter packing (done ONCE, outside the forward) ----------------

def pack_params(params, n_heads=N_HEADS):
    """Pre-transpose PyTorch (out,in) weights to (in,out), fuse Q|K|V, stack layers.

    The 1/sqrt(dk) attention score scale is folded into the Q columns (wq AND bq)
    so the kernel never multiplies scores by it.
    """
    d = params["layers"][0]["self_attn"]["wq"].shape[0]
    scale = 1.0 / math.sqrt(d // n_heads)
    ln_a, ln_b = [], []
    w_qkv, b_qkv, w_o, b_o = [], [], [], []
    w1, b1, w2, b2 = [], [], [], []
    for p in params["layers"]:
        ln_a += [p["ln1_a"], p["ln2_a"], p["ln3_a"]]
        ln_b += [p["ln1_b"], p["ln2_b"], p["ln3_b"]]
        for ap in (p["self_attn"], p["cross_attn"]):
            w_qkv.append(jnp.concatenate(
                [ap["wq"].T * scale, ap["wk"].T, ap["wv"].T], axis=1))
            b_qkv.append(jnp.concatenate(
                [ap["bq"] * scale, ap["bk"], ap["bv"]], axis=0))
            w_o.append(ap["wo"].T)
            b_o.append(ap["bo"])
        w1.append(p["ffn"]["w1"].T)
        b1.append(p["ffn"]["b1"])
        w2.append(p["ffn"]["w2"].T)
        b2.append(p["ffn"]["b2"])
    ln_a.append(params["norm_a"])
    ln_b.append(params["norm_b"])
    return {
        "ln_a": jnp.stack(ln_a), "ln_b": jnp.stack(ln_b),          # (3L+1, D)
        "w_qkv": jnp.stack(w_qkv), "b_qkv": jnp.stack(b_qkv),      # (2L, D, 3D), (2L, 3D)
        "w_o": jnp.stack(w_o), "b_o": jnp.stack(b_o),              # (2L, D, D), (2L, D)
        "w1": jnp.stack(w1), "b1": jnp.stack(b1),                  # (L, D, D_FF), (L, D_FF)
        "w2": jnp.stack(w2), "b2": jnp.stack(b2),                  # (L, D_FF, D), (L, D)
    }


def _block_diag_bias(mask, B, Sq, Sk, neg=NEG_INF):
    """mask (B,1,{1|Sq},Sk) -> additive (B*Sq, B*Sk) bias: 0 where attended,
    -1e9 where the user mask is 0 AND everywhere off the batch block-diagonal."""
    m = jnp.broadcast_to(mask.reshape(B, -1, Sk).astype(jnp.float32), (B, Sq, Sk))
    in_blk = jnp.where(m == 0, neg, 0.0)                       # (B, Sq, Sk)
    eye = jnp.eye(B, dtype=jnp.float32)[:, None, :, None]      # (B, 1, B, 1)
    bias = eye * in_blk[:, :, None, :] + (1.0 - eye) * neg     # (B, Sq, B, Sk)
    return bias.reshape(B * Sq, B * Sk)


# ---------------- forward wrapper: ONE pallas_call for the whole decoder ----------------

@jax.jit
def decoder_forward(x, enc, src_mask, tgt_mask, packed):
    B, Sq, D = x.shape
    Sk = enc.shape[1]
    L = packed["w1"].shape[0]
    tbias = _block_diag_bias(tgt_mask, B, Sq, Sq)              # (B*Sq, B*Sq)
    sbias = _block_diag_bias(src_mask, B, Sq, Sk)              # (B*Sq, B*Sk)
    out = pl.pallas_call(
        partial(_decoder_kernel, n_layers=L, n_heads=N_HEADS, eps=EPS),
        out_shape=jax.ShapeDtypeStruct((B * Sq, D), x.dtype),
        compiler_params=pltpu.CompilerParams(vmem_limit_bytes=32 * 1024 * 1024),
    )(x.reshape(B * Sq, D), enc.reshape(B * Sk, D), tbias, sbias,
      packed["ln_a"], packed["ln_b"],
      packed["w_qkv"], packed["b_qkv"], packed["w_o"], packed["b_o"],
      packed["w1"], packed["b1"], packed["w2"], packed["b2"])
    return out.reshape(B, Sq, D)


# ---------------- pure-JAX reference (for correctness check) ----------------

def ref_layernorm(x, a, b, eps=EPS):
    mean = x.mean(-1, keepdims=True)
    std = jnp.sqrt(((x - mean) ** 2).sum(-1, keepdims=True) / (x.shape[-1] - 1))
    return a * (x - mean) / (std + eps) + b


def ref_linear(x, w, b):
    return x @ w.T + b


def ref_mha(qi, ki, vi, mask, p, h):
    B, Sq, D = qi.shape
    Sk = ki.shape[1]
    dk = D // h
    q = ref_linear(qi, p["wq"], p["bq"]).reshape(B, Sq, h, dk).transpose(0, 2, 1, 3)
    k = ref_linear(ki, p["wk"], p["bk"]).reshape(B, Sk, h, dk).transpose(0, 2, 1, 3)
    v = ref_linear(vi, p["wv"], p["bv"]).reshape(B, Sk, h, dk).transpose(0, 2, 1, 3)
    s = jnp.einsum("bhqd,bhkd->bhqk", q, k) / math.sqrt(dk)
    s = jnp.where(mask == 0, -1e9, s)
    a = jax.nn.softmax(s, axis=-1)
    o = jnp.einsum("bhqk,bhkd->bhqd", a, v).transpose(0, 2, 1, 3).reshape(B, Sq, D)
    return ref_linear(o, p["wo"], p["bo"])


def ref_decoder(x, enc, src_mask, tgt_mask, params, h=N_HEADS):
    for p in params["layers"]:
        xn = ref_layernorm(x, p["ln1_a"], p["ln1_b"])
        x = x + ref_mha(xn, xn, xn, tgt_mask, p["self_attn"], h)
        xn = ref_layernorm(x, p["ln2_a"], p["ln2_b"])
        x = x + ref_mha(xn, enc, enc, src_mask, p["cross_attn"], h)
        xn = ref_layernorm(x, p["ln3_a"], p["ln3_b"])
        fp = p["ffn"]
        x = x + ref_linear(jnp.maximum(ref_linear(xn, fp["w1"], fp["b1"]), 0.0),
                           fp["w2"], fp["b2"])
    return ref_layernorm(x, params["norm_a"], params["norm_b"])


# ---------------- deterministic parameter init ----------------

def init_linear(key, d_in, d_out):
    k1, k2 = jax.random.split(key)
    w = jax.random.normal(k1, (d_out, d_in), jnp.float32) * (1.0 / math.sqrt(d_in))
    b = jax.random.normal(k2, (d_out,), jnp.float32) * 0.01
    return w, b


def init_attn(key, d):
    ks = jax.random.split(key, 4)
    p = {}
    for name, k in zip(("q", "k", "v", "o"), ks):
        w, b = init_linear(k, d, d)
        p[f"w{name}"], p[f"b{name}"] = w, b
    return p


def init_params(key):
    layers = []
    for _ in range(N_LAYERS):
        key, k_sa, k_ca, k_f1, k_f2 = jax.random.split(key, 5)
        w1, b1 = init_linear(k_f1, D_MODEL, D_FF)
        w2, b2 = init_linear(k_f2, D_FF, D_MODEL)
        layers.append({
            "self_attn": init_attn(k_sa, D_MODEL),
            "cross_attn": init_attn(k_ca, D_MODEL),
            "ffn": {"w1": w1, "b1": b1, "w2": w2, "b2": b2},
            "ln1_a": jnp.ones((D_MODEL,), jnp.float32), "ln1_b": jnp.zeros((D_MODEL,), jnp.float32),
            "ln2_a": jnp.ones((D_MODEL,), jnp.float32), "ln2_b": jnp.zeros((D_MODEL,), jnp.float32),
            "ln3_a": jnp.ones((D_MODEL,), jnp.float32), "ln3_b": jnp.zeros((D_MODEL,), jnp.float32),
        })
    return {"layers": layers,
            "norm_a": jnp.ones((D_MODEL,), jnp.float32),
            "norm_b": jnp.zeros((D_MODEL,), jnp.float32)}


if __name__ == "__main__":
    B, S_TGT, S_SRC = 2, 8, 8
    key = jax.random.PRNGKey(0)
    key, kx, ke, kp = jax.random.split(key, 4)

    x = jax.random.normal(kx, (B, S_TGT, D_MODEL), jnp.float32)
    enc = jax.random.normal(ke, (B, S_SRC, D_MODEL), jnp.float32)

    # causal target mask (B, 1, S_tgt, S_tgt); source padding mask (B, 1, 1, S_src)
    tgt_mask = jnp.tril(jnp.ones((S_TGT, S_TGT), jnp.float32))[None, None].repeat(B, axis=0)
    src_mask = jnp.ones((B, 1, 1, S_SRC), jnp.float32)
    src_mask = src_mask.at[1, 0, 0, -2:].set(0.0)  # mask last two source tokens of batch 1

    params = init_params(kp)
    packed = pack_params(params)   # pre-transpose / fuse QKV / fold scale / stack layers ONCE

    out = decoder_forward(x, enc, src_mask, tgt_mask, packed)
    out = jax.block_until_ready(out)

    ref = ref_decoder(x, enc, src_mask, tgt_mask, params)
    assert out.shape == (B, S_TGT, D_MODEL)
    assert jnp.all(jnp.isfinite(out))
    assert jnp.allclose(out, ref, rtol=1e-3, atol=1e-3), float(jnp.abs(out - ref).max())

    print("KERNEL_OK")
</pallas_src>

<mosaic_0001>
module attributes {stable_mosaic.version = 11 : i64} {
  func.func @_decoder_kernel(%arg0: memref<16x32xf32, #tpu.memory_space<vmem>>, %arg1: memref<16x32xf32, #tpu.memory_space<vmem>>, %arg2: memref<16x16xf32, #tpu.memory_space<vmem>>, %arg3: memref<16x16xf32, #tpu.memory_space<vmem>>, %arg4: memref<7x32xf32, #tpu.memory_space<vmem>>, %arg5: memref<7x32xf32, #tpu.memory_space<vmem>>, %arg6: memref<4x32x96xf32, #tpu.memory_space<vmem>>, %arg7: memref<4x96xf32, #tpu.memory_space<vmem>>, %arg8: memref<4x32x32xf32, #tpu.memory_space<vmem>>, %arg9: memref<4x32xf32, #tpu.memory_space<vmem>>, %arg10: memref<2x32x64xf32, #tpu.memory_space<vmem>>, %arg11: memref<2x64xf32, #tpu.memory_space<vmem>>, %arg12: memref<2x64x32xf32, #tpu.memory_space<vmem>>, %arg13: memref<2x32xf32, #tpu.memory_space<vmem>>, %arg14: memref<16x32xf32, #tpu.memory_space<vmem>>) attributes {dimension_semantics = [], scalar_prefetch = 0 : i64, scratch_operands = 0 : i64, tpu.core_type = #tpu.core_type<tc>} {
    %c0 = arith.constant 0 : index
    %c0_0 = arith.constant 0 : index
    %0 = vector.load %arg0[%c0, %c0_0] : memref<16x32xf32, #tpu.memory_space<vmem>>, vector<16x32xf32>
    %c0_1 = arith.constant 0 : index
    %c0_2 = arith.constant 0 : index
    %1 = vector.load %arg1[%c0_1, %c0_2] : memref<16x32xf32, #tpu.memory_space<vmem>>, vector<16x32xf32>
    %c0_3 = arith.constant 0 : index
    %c0_4 = arith.constant 0 : index
    %2 = vector.load %arg2[%c0_3, %c0_4] : memref<16x16xf32, #tpu.memory_space<vmem>>, vector<16x16xf32>
    %c0_5 = arith.constant 0 : index
    %c0_6 = arith.constant 0 : index
    %3 = vector.load %arg3[%c0_5, %c0_6] : memref<16x16xf32, #tpu.memory_space<vmem>>, vector<16x16xf32>
    %c0_7 = arith.constant 0 : index
    %c0_8 = arith.constant 0 : index
    %4 = vector.load %arg4[%c0_7, %c0_8] : memref<7x32xf32, #tpu.memory_space<vmem>>, vector<7x32xf32>
    %c0_9 = arith.constant 0 : index
    %c0_10 = arith.constant 0 : index
    %5 = vector.load %arg5[%c0_9, %c0_10] : memref<7x32xf32, #tpu.memory_space<vmem>>, vector<7x32xf32>
    %c0_11 = arith.constant 0 : index
    %c0_12 = arith.constant 0 : index
    %6 = vector.load %arg7[%c0_11, %c0_12] : memref<4x96xf32, #tpu.memory_space<vmem>>, vector<4x96xf32>
    %c0_13 = arith.constant 0 : index
    %c0_14 = arith.constant 0 : index
    %7 = vector.load %arg9[%c0_13, %c0_14] : memref<4x32xf32, #tpu.memory_space<vmem>>, vector<4x32xf32>
    %c0_15 = arith.constant 0 : index
    %c0_16 = arith.constant 0 : index
    %8 = vector.load %arg11[%c0_15, %c0_16] : memref<2x64xf32, #tpu.memory_space<vmem>>, vector<2x64xf32>
    %c0_17 = arith.constant 0 : index
    %c0_18 = arith.constant 0 : index
    %9 = vector.load %arg13[%c0_17, %c0_18] : memref<2x32xf32, #tpu.memory_space<vmem>>, vector<2x32xf32>
    %10 = vector.extract_strided_slice %4 {offsets = [0, 0], sizes = [1, 32], strides = [1, 1]} : vector<7x32xf32> to vector<1x32xf32>
    %11 = vector.extract_strided_slice %5 {offsets = [0, 0], sizes = [1, 32], strides = [1, 1]} : vector<7x32xf32> to vector<1x32xf32>
    %cst = arith.constant dense<0.000000e+00> : vector<16xf32>
    %12 = vector.multi_reduction <add>, %0, %cst [1] : vector<16x32xf32> to vector<16xf32>
    %13 = vector.shape_cast %12 : vector<16xf32> to vector<16x1xf32>
    %cst_19 = arith.constant 3.200000e+01 : f32
    %14 = vector.broadcast %cst_19 : f32 to vector<16x1xf32>
    %15 = arith.divf %13, %14 : vector<16x1xf32>
    %16 = vector.broadcast %15 : vector<16x1xf32> to vector<16x32xf32>
    %17 = arith.subf %0, %16 : vector<16x32xf32>
    %18 = arith.mulf %17, %17 : vector<16x32xf32>
    %cst_20 = arith.constant dense<0.000000e+00> : vector<16xf32>
    %19 = vector.multi_reduction <add>, %18, %cst_20 [1] : vector<16x32xf32> to vector<16xf32>
    %20 = vector.shape_cast %19 : vector<16xf32> to vector<16x1xf32>
    %cst_21 = arith.constant 3.100000e+01 : f32
    %21 = vector.broadcast %cst_21 : f32 to vector<16x1xf32>
    %22 = arith.divf %20, %21 : vector<16x1xf32>
    %23 = math.sqrt %22 : vector<16x1xf32>
    %cst_22 = arith.constant 9.99999997E-7 : f32
    %24 = vector.broadcast %cst_22 : f32 to vector<16x1xf32>
    %25 = arith.addf %23, %24 : vector<16x1xf32>
    %26 = tpu.reciprocal %25 : vector<16x1xf32> -> vector<16x1xf32>
    %27 = vector.broadcast %26 : vector<16x1xf32> to vector<16x32xf32>
    %28 = arith.mulf %17, %27 : vector<16x32xf32>
    %29 = vector.broadcast %10 : vector<1x32xf32> to vector<16x32xf32>
    %30 = arith.mulf %29, %28 : vector<16x32xf32>
    %31 = vector.broadcast %11 : vector<1x32xf32> to vector<16x32xf32>
    %32 = arith.addf %30, %31 : vector<16x32xf32>
    %c0_23 = arith.constant 0 : index
    %c0_24 = arith.constant 0 : index
    %c0_25 = arith.constant 0 : index
    %33 = vector.load %arg6[%c0_23, %c0_24, %c0_25] : memref<4x32x96xf32, #tpu.memory_space<vmem>>, vector<1x32x96xf32>
    %34 = vector.shape_cast %33 : vector<1x32x96xf32> to vector<32x96xf32>
    %cst_26 = arith.constant dense<0.000000e+00> : vector<16x96xf32>
    %35 = tpu.matmul %32, %34, %cst_26 {dimension_numbers = #tpu.dot_dimension_numbers<[1], [0], [0], [1], [0, 0, 1, 1], [], []>} : vector<16x32xf32>, vector<32x96xf32>, vector<16x96xf32> -> vector<16x96xf32>
    %36 = vector.extract_strided_slice %6 {offsets = [0, 0], sizes = [1, 96], strides = [1, 1]} : vector<4x96xf32> to vector<1x96xf32>
    %37 = vector.broadcast %36 : vector<1x96xf32> to vector<16x96xf32>
    %38 = arith.addf %35, %37 : vector<16x96xf32>
    %39 = vector.extract_strided_slice %38 {offsets = [0, 0], sizes = [16, 32], strides = [1, 1]} : vector<16x96xf32> to vector<16x32xf32>
    %40 = vector.extract_strided_slice %38 {offsets = [0, 32], sizes = [16, 32], strides = [1, 1]} : vector<16x96xf32> to vector<16x32xf32>
    %41 = vector.extract_strided_slice %38 {offsets = [0, 64], sizes = [16, 32], strides = [1, 1]} : vector<16x96xf32> to vector<16x32xf32>
    %c0_27 = arith.constant 0 : index
    %c0_28 = arith.constant 0 : index
    %c0_29 = arith.constant 0 : index
    %42 = vector.load %arg8[%c0_27, %c0_28, %c0_29] : memref<4x32x32xf32, #tpu.memory_space<vmem>>, vector<1x32x32xf32>
    %43 = vector.shape_cast %42 : vector<1x32x32xf32> to vector<32x32xf32>
    %44 = vector.extract_strided_slice %39 {offsets = [0, 0], sizes = [16, 8], strides = [1, 1]} : vector<16x32xf32> to vector<16x8xf32>
    %45 = vector.extract_strided_slice %40 {offsets = [0, 0], sizes = [16, 8], strides = [1, 1]} : vector<16x32xf32> to vector<16x8xf32>
    %cst_30 = arith.constant dense<0.000000e+00> : vector<16x16xf32>
    %46 = tpu.matmul %44, %45, %cst_30 {dimension_numbers = #tpu.dot_dimension_numbers<[1], [1], [0], [0], [0, 0, 1, 0], [], []>} : vector<16x8xf32>, vector<16x8xf32>, vector<16x16xf32> -> vector<16x16xf32>
    %47 = arith.addf %46, %2 : vector<16x16xf32>
    %cst_31 = arith.constant dense<0xFF800000> : vector<16xf32>
    %48 = vector.multi_reduction <maximumf>, %47, %cst_31 [1] : vector<16x16xf32> to vector<16xf32>
    %49 = vector.shape_cast %48 : vector<16xf32> to vector<16x1xf32>
    %50 = vector.broadcast %49 : vector<16x1xf32> to vector<16x16xf32>
    %51 = arith.subf %47, %50 : vector<16x16xf32>
    %52 = math.exp %51 : vector<16x16xf32>
    %cst_32 = arith.constant dense<0.000000e+00> : vector<16xf32>
    %53 = vector.multi_reduction <add>, %52, %cst_32 [1] : vector<16x16xf32> to vector<16xf32>
    %54 = vector.shape_cast %53 : vector<16xf32> to vector<16x1xf32>
    %55 = tpu.reciprocal %54 : vector<16x1xf32> -> vector<16x1xf32>
    %56 = vector.broadcast %55 : vector<16x1xf32> to vector<16x16xf32>
    %57 = arith.mulf %52, %56 : vector<16x16xf32>
    %58 = vector.extract_strided_slice %41 {offsets = [0, 0], sizes = [16, 8], strides = [1, 1]} : vector<16x32xf32> to vector<16x8xf32>
    %cst_33 = arith.constant dense<0.000000e+00> : vector<16x8xf32>
    %59 = tpu.matmul %57, %58, %cst_33 {dimension_numbers = #tpu.dot_dimension_numbers<[1], [0], [0], [1], [0, 0, 1, 1], [], []>} : vector<16x16xf32>, vector<16x8xf32>, vector<16x8xf32> -> vector<16x8xf32>
    %60 = vector.extract_strided_slice %43 {offsets = [0, 0], sizes = [8, 32], strides = [1, 1]} : vector<32x32xf32> to vector<8x32xf32>
    %cst_34 = arith.constant dense<0.000000e+00> : vector<16x32xf32>
    %61 = tpu.matmul %59, %60, %cst_34 {dimension_numbers = #tpu.dot_dimension_numbers<[1], [0], [0], [1], [0, 0, 1, 1], [], []>} : vector<16x8xf32>, vector<8x32xf32>, vector<16x32xf32> -> vector<16x32xf32>
    %62 = vector.extract_strided_slice %39 {offsets = [0, 8], sizes = [16, 8], strides = [1, 1]} : vector<16x32xf32> to vector<16x8xf32>
    %63 = vector.extract_strided_slice %40 {offsets = [0, 8], sizes = [16, 8], strides = [1, 1]} : vector<16x32xf32> to vector<16x8xf32>
    %cst_35 = arith.constant dense<0.000000e+00> : vector<16x16xf32>
    %64 = tpu.matmul %62, %63, %cst_35 {dimension_numbers = #tpu.dot_dimension_numbers<[1], [1], [0], [0], [0, 0, 1, 0], [], []>} : vector<16x8xf32>, vector<16x8xf32>, vector<16x16xf32> -> vector<16x16xf32>
    %65 = arith.addf %64, %2 : vector<16x16xf32>
    %cst_36 = arith.constant dense<0xFF800000> : vector<16xf32>
    %66 = vector.multi_reduction <maximumf>, %65, %cst_36 [1] : vector<16x16xf32> to vector<16xf32>
    %67 = vector.shape_cast %66 : vector<16xf32> to vector<16x1xf32>
    %68 = vector.broadcast %67 : vector<16x1xf32> to vector<16x16xf32>
    %69 = arith.subf %65, %68 : vector<16x16xf32>
    %70 = math.exp %69 : vector<16x16xf32>
    %cst_37 = arith.constant dense<0.000000e+00> : vector<16xf32>
    %71 = vector.multi_reduction <add>, %70, %cst_37 [1] : vector<16x16xf32> to vector<16xf32>
    %72 = vector.shape_cast %71 : vector<16xf32> to vector<16x1xf32>
    %73 = tpu.reciprocal %72 : vector<16x1xf32> -> vector<16x1xf32>
    %74 = vector.broadcast %73 : vector<16x1xf32> to vector<16x16xf32>
    %75 = arith.mulf %70, %74 : vector<16x16xf32>
    %76 = vector.extract_strided_slice %41 {offsets = [0, 8], sizes = [16, 8], strides = [1, 1]} : vector<16x32xf32> to vector<16x8xf32>
    %cst_38 = arith.constant dense<0.000000e+00> : vector<16x8xf32>
    %77 = tpu.matmul %75, %76, %cst_38 {dimension_numbers = #tpu.dot_dimension_numbers<[1], [0], [0], [1], [0, 0, 1, 1], [], []>} : vector<16x16xf32>, vector<16x8xf32>, vector<16x8xf32> -> vector<16x8xf32>
    %78 = vector.extract_strided_slice %43 {offsets = [8, 0], sizes = [8, 32], strides = [1, 1]} : vector<32x32xf32> to vector<8x32xf32>
    %cst_39 = arith.constant dense<0.000000e+00> : vector<16x32xf32>
    %79 = tpu.matmul %77, %78, %cst_39 {dimension_numbers = #tpu.dot_dimension_numbers<[1], [0], [0], [1], [0, 0, 1, 1], [], []>} : vector<16x8xf32>, vector<8x32xf32>, vector<16x32xf32> -> vector<16x32xf32>
    %80 = arith.addf %61, %79 : vector<16x32xf32>
    %81 = vector.extract_strided_slice %39 {offsets = [0, 16], sizes = [16, 8], strides = [1, 1]} : vector<16x32xf32> to vector<16x8xf32>
    %82 = vector.extract_strided_slice %40 {offsets = [0, 16], sizes = [16, 8], strides = [1, 1]} : vector<16x32xf32> to vector<16x8xf32>
    %cst_40 = arith.constant dense<0.000000e+00> : vector<16x16xf32>
    %83 = tpu.matmul %81, %82, %cst_40 {dimension_numbers = #tpu.dot_dimension_numbers<[1], [1], [0], [0], [0, 0, 1, 0], [], []>} : vector<16x8xf32>, vector<16x8xf32>, vector<16x16xf32> -> vector<16x16xf32>
    %84 = arith.addf %83, %2 : vector<16x16xf32>
    %cst_41 = arith.constant dense<0xFF800000> : vector<16xf32>
    %85 = vector.multi_reduction <maximumf>, %84, %cst_41 [1] : vector<16x16xf32> to vector<16xf32>
    %86 = vector.shape_cast %85 : vector<16xf32> to vector<16x1xf32>
    %87 = vector.broadcast %86 : vector<16x1xf32> to vector<16x16xf32>
    %88 = arith.subf %84, %87 : vector<16x16xf32>
    %89 = math.exp %88 : vector<16x16xf32>
    %cst_42 = arith.constant dense<0.000000e+00> : vector<16xf32>
    %90 = vector.multi_reduction <add>, %89, %cst_42 [1] : vector<16x16xf32> to vector<16xf32>
    %91 = vector.shape_cast %90 : vector<16xf32> to vector<16x1xf32>
    %92 = tpu.reciprocal %91 : vector<16x1xf32> -> vector<16x1xf32>
    %93 = vector.broadcast %92 : vector<16x1xf32> to vector<16x16xf32>
    %94 = arith.mulf %89, %93 : vector<16x16xf32>
    %95 = vector.extract_strided_slice %41 {offsets = [0, 16], sizes = [16, 8], strides = [1, 1]} : vector<16x32xf32> to vector<16x8xf32>
    %cst_43 = arith.constant dense<0.000000e+00> : vector<16x8xf32>
    %96 = tpu.matmul %94, %95, %cst_43 {dimension_numbers = #tpu.dot_dimension_numbers<[1], [0], [0], [1], [0, 0, 1, 1], [], []>} : vector<16x16xf32>, vector<16x8xf32>, vector<16x8xf32> -> vector<16x8xf32>
    %97 = vector.extract_strided_slice %43 {offsets = [16, 0], sizes = [8, 32], strides = [1, 1]} : vector<32x32xf32> to vector<8x32xf32>
    %cst_44 = arith.constant dense<0.000000e+00> : vector<16x32xf32>
    %98 = tpu.matmul %96, %97, %cst_44 {dimension_numbers = #tpu.dot_dimension_numbers<[1], [0], [0], [1], [0, 0, 1, 1], [], []>} : vector<16x8xf32>, vector<8x32xf32>, vector<16x32xf32> -> vector<16x32xf32>
    %99 = arith.addf %80, %98 : vector<16x32xf32>
    %100 = vector.extract_strided_slice %39 {offsets = [0, 24], sizes = [16, 8], strides = [1, 1]} : vector<16x32xf32> to vector<16x8xf32>
    %101 = vector.extract_strided_slice %40 {offsets = [0, 24], sizes = [16, 8], strides = [1, 1]} : vector<16x32xf32> to vector<16x8xf32>
    %cst_45 = arith.constant dense<0.000000e+00> : vector<16x16xf32>
    %102 = tpu.matmul %100, %101, %cst_45 {dimension_numbers = #tpu.dot_dimension_numbers<[1], [1], [0], [0], [0, 0, 1, 0], [], []>} : vector<16x8xf32>, vector<16x8xf32>, vector<16x16xf32> -> vector<16x16xf32>
    %103 = arith.addf %102, %2 : vector<16x16xf32>
    %cst_46 = arith.constant dense<0xFF800000> : vector<16xf32>
    %104 = vector.multi_reduction <maximumf>, %103, %cst_46 [1] : vector<16x16xf32> to vector<16xf32>
    %105 = vector.shape_cast %104 : vector<16xf32> to vector<16x1xf32>
    %106 = vector.broadcast %105 : vector<16x1xf32> to vector<16x16xf32>
    %107 = arith.subf %103, %106 : vector<16x16xf32>
    %108 = math.exp %107 : vector<16x16xf32>
    %cst_47 = arith.constant dense<0.000000e+00> : vector<16xf32>
    %109 = vector.multi_reduction <add>, %108, %cst_47 [1] : vector<16x16xf32> to vector<16xf32>
    %110 = vector.shape_cast %109 : vector<16xf32> to vector<16x1xf32>
    %111 = tpu.reciprocal %110 : vector<16x1xf32> -> vector<16x1xf32>
    %112 = vector.broadcast %111 : vector<16x1xf32> to vector<16x16xf32>
    %113 = arith.mulf %108, %112 : vector<16x16xf32>
    %114 = vector.extract_strided_slice %41 {offsets = [0, 24], sizes = [16, 8], strides = [1, 1]} : vector<16x32xf32> to vector<16x8xf32>
    %cst_48 = arith.constant dense<0.000000e+00> : vector<16x8xf32>
    %115 = tpu.matmul %113, %114, %cst_48 {dimension_numbers = #tpu.dot_dimension_numbers<[1], [0], [0], [1], [0, 0, 1, 1], [], []>} : vector<16x16xf32>, vector<16x8xf32>, vector<16x8xf32> -> vector<16x8xf32>
    %116 = vector.extract_strided_slice %43 {offsets = [24, 0], sizes = [8, 32], strides = [1, 1]} : vector<32x32xf32> to vector<8x32xf32>
    %cst_49 = arith.constant dense<0.000000e+00> : vector<16x32xf32>
    %117 = tpu.matmul %115, %116, %cst_49 {dimension_numbers = #tpu.dot_dimension_numbers<[1], [0], [0], [1], [0, 0, 1, 1], [], []>} : vector<16x8xf32>, vector<8x32xf32>, vector<16x32xf32> -> vector<16x32xf32>
    %118 = arith.addf %99, %117 : vector<16x32xf32>
    %119 = vector.extract_strided_slice %7 {offsets = [0, 0], sizes = [1, 32], strides = [1, 1]} : vector<4x32xf32> to vector<1x32xf32>
    %120 = vector.broadcast %119 : vector<1x32xf32> to vector<16x32xf32>
    %121 = arith.addf %118, %120 : vector<16x32xf32>
    %122 = arith.addf %0, %121 : vector<16x32xf32>
    %123 = vector.extract_strided_slice %4 {offsets = [1, 0], sizes = [1, 32], strides = [1, 1]} : vector<7x32xf32> to vector<1x32xf32>
    %124 = vector.extract_strided_slice %5 {offsets = [1, 0], sizes = [1, 32], strides = [1, 1]} : vector<7x32xf32> to vector<1x32xf32>
    %cst_50 = arith.constant dense<0.000000e+00> : vector<16xf32>
    %125 = vector.multi_reduction <add>, %122, %cst_50 [1] : vector<16x32xf32> to vector<16xf32>
    %126 = vector.shape_cast %125 : vector<16xf32> to vector<16x1xf32>
    %cst_51 = arith.constant 3.200000e+01 : f32
    %127 = vector.broadcast %cst_51 : f32 to vector<16x1xf32>
    %128 = arith.divf %126, %127 : vector<16x1xf32>
    %129 = vector.broadcast %128 : vector<16x1xf32> to vector<16x32xf32>
    %130 = arith.subf %122, %129 : vector<16x32xf32>
    %131 = arith.mulf %130, %130 : vector<16x32xf32>
    %cst_52 = arith.constant dense<0.000000e+00> : vector<16xf32>
    %132 = vector.multi_reduction <add>, %131, %cst_52 [1] : vector<16x32xf32> to vector<16xf32>
    %133 = vector.shape_cast %132 : vector<16xf32> to vector<16x1xf32>
    %cst_53 = arith.constant 3.100000e+01 : f32
    %134 = vector.broadcast %cst_53 : f32 to vector<16x1xf32>
    %135 = arith.divf %133, %134 : vector<16x1xf32>
    %136 = math.sqrt %135 : vector<16x1xf32>
    %cst_54 = arith.constant 9.99999997E-7 : f32
    %137 = vector.broadcast %cst_54 : f32 to vector<16x1xf32>
    %138 = arith.addf %136, %137 : vector<16x1xf32>
    %139 = tpu.reciprocal %138 : vector<16x1xf32> -> vector<16x1xf32>
    %140 = vector.broadcast %139 : vector<16x1xf32> to vector<16x32xf32>
    %141 = arith.mulf %130, %140 : vector<16x32xf32>
    %142 = vector.broadcast %123 : vector<1x32xf32> to vector<16x32xf32>
    %143 = arith.mulf %142, %141 : vector<16x32xf32>
    %144 = vector.broadcast %124 : vector<1x32xf32> to vector<16x32xf32>
    %145 = arith.addf %143, %144 : vector<16x32xf32>
    %c1 = arith.constant 1 : index
    %c0_55 = arith.constant 0 : index
    %c0_56 = arith.constant 0 : index
    %146 = vector.load %arg6[%c1, %c0_55, %c0_56] : memref<4x32x96xf32, #tpu.memory_space<vmem>>, vector<1x32x96xf32>
    %147 = vector.shape_cast %146 : vector<1x32x96xf32> to vector<32x96xf32>
    %148 = vector.extract_strided_slice %6 {offsets = [1, 0], sizes = [1, 96], strides = [1, 1]} : vector<4x96xf32> to vector<1x96xf32>
    %149 = vector.extract_strided_slice %147 {offsets = [0, 0], sizes = [32, 32], strides = [1, 1]} : vector<32x96xf32> to vector<32x32xf32>
    %cst_57 = arith.constant dense<0.000000e+00> : vector<16x32xf32>
    %150 = tpu.matmul %145, %149, %cst_57 {dimension_numbers = #tpu.dot_dimension_numbers<[1], [0], [0], [1], [0, 0, 1, 1], [], []>} : vector<16x32xf32>, vector<32x32xf32>, vector<16x32xf32> -> vector<16x32xf32>
    %151 = vector.extract_strided_slice %148 {offsets = [0, 0], sizes = [1, 32], strides = [1, 1]} : vector<1x96xf32> to vector<1x32xf32>
    %152 = vector.broadcast %151 : vector<1x32xf32> to vector<16x32xf32>
    %153 = arith.addf %150, %152 : vector<16x32xf32>
    %154 = vector.extract_strided_slice %147 {offsets = [0, 32], sizes = [32, 64], strides = [1, 1]} : vector<32x96xf32> to vector<32x64xf32>
    %cst_58 = arith.constant dense<0.000000e+00> : vector<16x64xf32>
    %155 = tpu.matmul %1, %154, %cst_58 {dimension_numbers = #tpu.dot_dimension_numbers<[1], [0], [0], [1], [0, 0, 1, 1], [], []>} : vector<16x32xf32>, vector<32x64xf32>, vector<16x64xf32> -> vector<16x64xf32>
    %156 = vector.extract_strided_slice %148 {offsets = [0, 32], sizes = [1, 64], strides = [1, 1]} : vector<1x96xf32> to vector<1x64xf32>
    %157 = vector.broadcast %156 : vector<1x64xf32> to vector<16x64xf32>
    %158 = arith.addf %155, %157 : vector<16x64xf32>
    %159 = vector.extract_strided_slice %158 {offsets = [0, 0], sizes = [16, 32], strides = [1, 1]} : vector<16x64xf32> to vector<16x32xf32>
    %160 = vector.extract_strided_slice %158 {offsets = [0, 32], sizes = [16, 32], strides = [1, 1]} : vector<16x64xf32> to vector<16x32xf32>
    %c1_59 = arith.constant 1 : index
    %c0_60 = arith.constant 0 : index
    %c0_61 = arith.constant 0 : index
    %161 = vector.load %arg8[%c1_59, %c0_60, %c0_61] : memref<4x32x32xf32, #tpu.memory_space<vmem>>, vector<1x32x32xf32>
    %162 = vector.shape_cast %161 : vector<1x32x32xf32> to vector<32x32xf32>
    %163 = vector.extract_strided_slice %153 {offsets = [0, 0], sizes = [16, 8], strides = [1, 1]} : vector<16x32xf32> to vector<16x8xf32>
    %164 = vector.extract_strided_slice %159 {offsets = [0, 0], sizes = [16, 8], strides = [1, 1]} : vector<16x32xf32> to vector<16x8xf32>
    %cst_62 = arith.constant dense<0.000000e+00> : vector<16x16xf32>
    %165 = tpu.matmul %163, %164, %cst_62 {dimension_numbers = #tpu.dot_dimension_numbers<[1], [1], [0], [0], [0, 0, 1, 0], [], []>} : vector<16x8xf32>, vector<16x8xf32>, vector<16x16xf32> -> vector<16x16xf32>
    %166 = arith.addf %165, %3 : vector<16x16xf32>
    %cst_63 = arith.constant dense<0xFF800000> : vector<16xf32>
    %167 = vector.multi_reduction <maximumf>, %166, %cst_63 [1] : vector<16x16xf32> to vector<16xf32>
    %168 = vector.shape_cast %167 : vector<16xf32> to vector<16x1xf32>
    %169 = vector.broadcast %168 : vector<16x1xf32> to vector<16x16xf32>
    %170 = arith.subf %166, %169 : vector<16x16xf32>
    %171 = math.exp %170 : vector<16x16xf32>
    %cst_64 = arith.constant dense<0.000000e+00> : vector<16xf32>
    %172 = vector.multi_reduction <add>, %171, %cst_64 [1] : vector<16x16xf32> to vector<16xf32>
    %173 = vector.shape_cast %172 : vector<16xf32> to vector<16x1xf32>
    %174 = tpu.reciprocal %173 : vector<16x1xf32> -> vector<16x1xf32>
    %175 = vector.broadcast %174 : vector<16x1xf32> to vector<16x16xf32>
    %176 = arith.mulf %171, %175 : vector<16x16xf32>
    %177 = vector.extract_strided_slice %160 {offsets = [0, 0], sizes = [16, 8], strides = [1, 1]} : vector<16x32xf32> to vector<16x8xf32>
    %cst_65 = arith.constant dense<0.000000e+00> : vector<16x8xf32>
    %178 = tpu.matmul %176, %177, %cst_65 {dimension_numbers = #tpu.dot_dimension_numbers<[1], [0], [0], [1], [0, 0, 1, 1], [], []>} : vector<16x16xf32>, vector<16x8xf32>, vector<16x8xf32> -> vector<16x8xf32>
    %179 = vector.extract_strided_slice %162 {offsets = [0, 0], sizes = [8, 32], strides = [1, 1]} : vector<32x32xf32> to vector<8x32xf32>
    %cst_66 = arith.constant dense<0.000000e+00> : vector<16x32xf32>
    %180 = tpu.matmul %178, %179, %cst_66 {dimension_numbers = #tpu.dot_dimension_numbers<[1], [0], [0], [1], [0, 0, 1, 1], [], []>} : vector<16x8xf32>, vector<8x32xf32>, vector<16x32xf32> -> vector<16x32xf32>
    %181 = vector.extract_strided_slice %153 {offsets = [0, 8], sizes = [16, 8], strides = [1, 1]} : vector<16x32xf32> to vector<16x8xf32>
    %182 = vector.extract_strided_slice %159 {offsets = [0, 8], sizes = [16, 8], strides = [1, 1]} : vector<16x32xf32> to vector<16x8xf32>
    %cst_67 = arith.constant dense<0.000000e+00> : vector<16x16xf32>
    %183 = tpu.matmul %181, %182, %cst_67 {dimension_numbers = #tpu.dot_dimension_numbers<[1], [1], [0], [0], [0, 0, 1, 0], [], []>} : vector<16x8xf32>, vector<16x8xf32>, vector<16x16xf32> -> vector<16x16xf32>
    %184 = arith.addf %183, %3 : vector<16x16xf32>
    %cst_68 = arith.constant dense<0xFF800000> : vector<16xf32>
    %185 = vector.multi_reduction <maximumf>, %184, %cst_68 [1] : vector<16x16xf32> to vector<16xf32>
    %186 = vector.shape_cast %185 : vector<16xf32> to vector<16x1xf32>
    %187 = vector.broadcast %186 : vector<16x1xf32> to vector<16x16xf32>
    %188 = arith.subf %184, %187 : vector<16x16xf32>
    %189 = math.exp %188 : vector<16x16xf32>
    %cst_69 = arith.constant dense<0.000000e+00> : vector<16xf32>
    %190 = vector.multi_reduction <add>, %189, %cst_69 [1] : vector<16x16xf32> to vector<16xf32>
    %191 = vector.shape_cast %190 : vector<16xf32> to vector<16x1xf32>
    %192 = tpu.reciprocal %191 : vector<16x1xf32> -> vector<16x1xf32>
    %193 = vector.broadcast %192 : vector<16x1xf32> to vector<16x16xf32>
    %194 = arith.mulf %189, %193 : vector<16x16xf32>
    %195 = vector.extract_strided_slice %160 {offsets = [0, 8], sizes = [16, 8], strides = [1, 1]} : vector<16x32xf32> to vector<16x8xf32>
    %cst_70 = arith.constant dense<0.000000e+00> : vector<16x8xf32>
    %196 = tpu.matmul %194, %195, %cst_70 {dimension_numbers = #tpu.dot_dimension_numbers<[1], [0], [0], [1], [0, 0, 1, 1], [], []>} : vector<16x16xf32>, vector<16x8xf32>, vector<16x8xf32> -> vector<16x8xf32>
    %197 = vector.extract_strided_slice %162 {offsets = [8, 0], sizes = [8, 32], strides = [1, 1]} : vector<32x32xf32> to vector<8x32xf32>
    %cst_71 = arith.constant dense<0.000000e+00> : vector<16x32xf32>
    %198 = tpu.matmul %196, %197, %cst_71 {dimension_numbers = #tpu.dot_dimension_numbers<[1], [0], [0], [1], [0, 0, 1, 1], [], []>} : vector<16x8xf32>, vector<8x32xf32>, vector<16x32xf32> -> vector<16x32xf32>
    %199 = arith.addf %180, %198 : vector<16x32xf32>
    %200 = vector.extract_strided_slice %153 {offsets = [0, 16], sizes = [16, 8], strides = [1, 1]} : vector<16x32xf32> to vector<16x8xf32>
    %201 = vector.extract_strided_slice %159 {offsets = [0, 16], sizes = [16, 8], strides = [1, 1]} : vector<16x32xf32> to vector<16x8xf32>
    %cst_72 = arith.constant dense<0.000000e+00> : vector<16x16xf32>
    %202 = tpu.matmul %200, %201, %cst_72 {dimension_numbers = #tpu.dot_dimension_numbers<[1], [1], [0], [0], [0, 0, 1, 0], [], []>} : vector<16x8xf32>, vector<16x8xf32>, vector<16x16xf32> -> vector<16x16xf32>
    %203 = arith.addf %202, %3 : vector<16x16xf32>
    %cst_73 = arith.constant dense<0xFF800000> : vector<16xf32>
    %204 = vector.multi_reduction <maximumf>, %203, %cst_73 [1] : vector<16x16xf32> to vector<16xf32>
    %205 = vector.shape_cast %204 : vector<16xf32> to vector<16x1xf32>
    %206 = vector.broadcast %205 : vector<16x1xf32> to vector<16x16xf32>
    %207 = arith.subf %203, %206 : vector<16x16xf32>
    %208 = math.exp %207 : vector<16x16xf32>
    %cst_74 = arith.constant dense<0.000000e+00> : vector<16xf32>
    %209 = vector.multi_reduction <add>, %208, %cst_74 [1] : vector<16x16xf32> to vector<16xf32>
    %210 = vector.shape_cast %209 : vector<16xf32> to vector<16x1xf32>
    %211 = tpu.reciprocal %210 : vector<16x1xf32> -> vector<16x1xf32>
    %212 = vector.broadcast %211 : vector<16x1xf32> to vector<16x16xf32>
    %213 = arith.mulf %208, %212 : vector<16x16xf32>
    %214 = vector.extract_strided_slice %160 {offsets = [0, 16], sizes = [16, 8], strides = [1, 1]} : vector<16x32xf32> to vector<16x8xf32>
    %cst_75 = arith.constant dense<0.000000e+00> : vector<16x8xf32>
    %215 = tpu.matmul %213, %214, %cst_75 {dimension_numbers = #tpu.dot_dimension_numbers<[1], [0], [0], [1], [0, 0, 1, 1], [], []>} : vector<16x16xf32>, vector<16x8xf32>, vector<16x8xf32> -> vector<16x8xf32>
    %216 = vector.extract_strided_slice %162 {offsets = [16, 0], sizes = [8, 32], strides = [1, 1]} : vector<32x32xf32> to vector<8x32xf32>
    %cst_76 = arith.constant dense<0.000000e+00> : vector<16x32xf32>
    %217 = tpu.matmul %215, %216, %cst_76 {dimension_numbers = #tpu.dot_dimension_numbers<[1], [0], [0], [1], [0, 0, 1, 1], [], []>} : vector<16x8xf32>, vector<8x32xf32>, vector<16x32xf32> -> vector<16x32xf32>
    %218 = arith.addf %199, %217 : vector<16x32xf32>
    %219 = vector.extract_strided_slice %153 {offsets = [0, 24], sizes = [16, 8], strides = [1, 1]} : vector<16x32xf32> to vector<16x8xf32>
    %220 = vector.extract_strided_slice %159 {offsets = [0, 24], sizes = [16, 8], strides = [1, 1]} : vector<16x32xf32> to vector<16x8xf32>
    %cst_77 = arith.constant dense<0.000000e+00> : vector<16x16xf32>
    %221 = tpu.matmul %219, %220, %cst_77 {dimension_numbers = #tpu.dot_dimension_numbers<[1], [1], [0], [0], [0, 0, 1, 0], [], []>} : vector<16x8xf32>, vector<16x8xf32>, vector<16x16xf32> -> vector<16x16xf32>
    %222 = arith.addf %221, %3 : vector<16x16xf32>
    %cst_78 = arith.constant dense<0xFF800000> : vector<16xf32>
    %223 = vector.multi_reduction <maximumf>, %222, %cst_78 [1] : vector<16x16xf32> to vector<16xf32>
    %224 = vector.shape_cast %223 : vector<16xf32> to vector<16x1xf32>
    %225 = vector.broadcast %224 : vector<16x1xf32> to vector<16x16xf32>
    %226 = arith.subf %222, %225 : vector<16x16xf32>
    %227 = math.exp %226 : vector<16x16xf32>
    %cst_79 = arith.constant dense<0.000000e+00> : vector<16xf32>
    %228 = vector.multi_reduction <add>, %227, %cst_79 [1] : vector<16x16xf32> to vector<16xf32>
    %229 = vector.shape_cast %228 : vector<16xf32> to vector<16x1xf32>
    %230 = tpu.reciprocal %229 : vector<16x1xf32> -> vector<16x1xf32>
    %231 = vector.broadcast %230 : vector<16x1xf32> to vector<16x16xf32>
    %232 = arith.mulf %227, %231 : vector<16x16xf32>
    %233 = vector.extract_strided_slice %160 {offsets = [0, 24], sizes = [16, 8], strides = [1, 1]} : vector<16x32xf32> to vector<16x8xf32>
    %cst_80 = arith.constant dense<0.000000e+00> : vector<16x8xf32>
    %234 = tpu.matmul %232, %233, %cst_80 {dimension_numbers = #tpu.dot_dimension_numbers<[1], [0], [0], [1], [0, 0, 1, 1], [], []>} : vector<16x16xf32>, vector<16x8xf32>, vector<16x8xf32> -> vector<16x8xf32>
    %235 = vector.extract_strided_slice %162 {offsets = [24, 0], sizes = [8, 32], strides = [1, 1]} : vector<32x32xf32> to vector<8x32xf32>
    %cst_81 = arith.constant dense<0.000000e+00> : vector<16x32xf32>
    %236 = tpu.matmul %234, %235, %cst_81 {dimension_numbers = #tpu.dot_dimension_numbers<[1], [0], [0], [1], [0, 0, 1, 1], [], []>} : vector<16x8xf32>, vector<8x32xf32>, vector<16x32xf32> -> vector<16x32xf32>
    %237 = arith.addf %218, %236 : vector<16x32xf32>
    %238 = vector.extract_strided_slice %7 {offsets = [1, 0], sizes = [1, 32], strides = [1, 1]} : vector<4x32xf32> to vector<1x32xf32>
    %239 = vector.broadcast %238 : vector<1x32xf32> to vector<16x32xf32>
    %240 = arith.addf %237, %239 : vector<16x32xf32>
    %241 = arith.addf %122, %240 : vector<16x32xf32>
    %242 = vector.extract_strided_slice %4 {offsets = [2, 0], sizes = [1, 32], strides = [1, 1]} : vector<7x32xf32> to vector<1x32xf32>
    %243 = vector.extract_strided_slice %5 {offsets = [2, 0], sizes = [1, 32], strides = [1, 1]} : vector<7x32xf32> to vector<1x32xf32>
    %cst_82 = arith.constant dense<0.000000e+00> : vector<16xf32>
    %244 = vector.multi_reduction <add>, %241, %cst_82 [1] : vector<16x32xf32> to vector<16xf32>
    %245 = vector.shape_cast %244 : vector<16xf32> to vector<16x1xf32>
    %cst_83 = arith.constant 3.200000e+01 : f32
    %246 = vector.broadcast %cst_83 : f32 to vector<16x1xf32>
    %247 = arith.divf %245, %246 : vector<16x1xf32>
    %248 = vector.broadcast %247 : vector<16x1xf32> to vector<16x32xf32>
    %249 = arith.subf %241, %248 : vector<16x32xf32>
    %250 = arith.mulf %249, %249 : vector<16x32xf32>
    %cst_84 = arith.constant dense<0.000000e+00> : vector<16xf32>
    %251 = vector.multi_reduction <add>, %250, %cst_84 [1] : vector<16x32xf32> to vector<16xf32>
    %252 = vector.shape_cast %251 : vector<16xf32> to vector<16x1xf32>
    %cst_85 = arith.constant 3.100000e+01 : f32
    %253 = vector.broadcast %cst_85 : f32 to vector<16x1xf32>
    %254 = arith.divf %252, %253 : vector<16x1xf32>
    %255 = math.sqrt %254 : vector<16x1xf32>
    %cst_86 = arith.constant 9.99999997E-7 : f32
    %256 = vector.broadcast %cst_86 : f32 to vector<16x1xf32>
    %257 = arith.addf %255, %256 : vector<16x1xf32>
    %258 = tpu.reciprocal %257 : vector<16x1xf32> -> vector<16x1xf32>
    %259 = vector.broadcast %258 : vector<16x1xf32> to vector<16x32xf32>
    %260 = arith.mulf %249, %259 : vector<16x32xf32>
    %261 = vector.broadcast %242 : vector<1x32xf32> to vector<16x32xf32>
    %262 = arith.mulf %261, %260 : vector<16x32xf32>
    %263 = vector.broadcast %243 : vector<1x32xf32> to vector<16x32xf32>
    %264 = arith.addf %262, %263 : vector<16x32xf32>
    %c0_87 = arith.constant 0 : index
    %c0_88 = arith.constant 0 : index
    %c0_89 = arith.constant 0 : index
    %265 = vector.load %arg10[%c0_87, %c0_88, %c0_89] : memref<2x32x64xf32, #tpu.memory_space<vmem>>, vector<1x32x64xf32>
    %266 = vector.shape_cast %265 : vector<1x32x64xf32> to vector<32x64xf32>
    %cst_90 = arith.constant dense<0.000000e+00> : vector<16x64xf32>
    %267 = tpu.matmul %264, %266, %cst_90 {dimension_numbers = #tpu.dot_dimension_numbers<[1], [0], [0], [1], [0, 0, 1, 1], [], []>} : vector<16x32xf32>, vector<32x64xf32>, vector<16x64xf32> -> vector<16x64xf32>
    %268 = vector.extract_strided_slice %8 {offsets = [0, 0], sizes = [1, 64], strides = [1, 1]} : vector<2x64xf32> to vector<1x64xf32>
    %269 = vector.broadcast %268 : vector<1x64xf32> to vector<16x64xf32>
    %270 = arith.addf %267, %269 : vector<16x64xf32>
    %cst_91 = arith.constant 0.000000e+00 : f32
    %271 = vector.broadcast %cst_91 : f32 to vector<16x64xf32>
    %272 = arith.maximumf %270, %271 : vector<16x64xf32>
    %c0_92 = arith.constant 0 : index
    %c0_93 = arith.constant 0 : index
    %c0_94 = arith.constant 0 : index
    %273 = vector.load %arg12[%c0_92, %c0_93, %c0_94] : memref<2x64x32xf32, #tpu.memory_space<vmem>>, vector<1x64x32xf32>
    %274 = vector.shape_cast %273 : vector<1x64x32xf32> to vector<64x32xf32>
    %cst_95 = arith.constant dense<0.000000e+00> : vector<16x32xf32>
    %275 = tpu.matmul %272, %274, %cst_95 {dimension_numbers = #tpu.dot_dimension_numbers<[1], [0], [0], [1], [0, 0, 1, 1], [], []>} : vector<16x64xf32>, vector<64x32xf32>, vector<16x32xf32> -> vector<16x32xf32>
    %276 = arith.addf %241, %275 : vector<16x32xf32>
    %277 = vector.extract_strided_slice %9 {offsets = [0, 0], sizes = [1, 32], strides = [1, 1]} : vector<2x32xf32> to vector<1x32xf32>
    %278 = vector.broadcast %277 : vector<1x32xf32> to vector<16x32xf32>
    %279 = arith.addf %276, %278 : vector<16x32xf32>
    %280 = vector.extract_strided_slice %4 {offsets = [3, 0], sizes = [1, 32], strides = [1, 1]} : vector<7x32xf32> to vector<1x32xf32>
    %281 = vector.extract_strided_slice %5 {offsets = [3, 0], sizes = [1, 32], strides = [1, 1]} : vector<7x32xf32> to vector<1x32xf32>
    %cst_96 = arith.constant dense<0.000000e+00> : vector<16xf32>
    %282 = vector.multi_reduction <add>, %279, %cst_96 [1] : vector<16x32xf32> to vector<16xf32>
    %283 = vector.shape_cast %282 : vector<16xf32> to vector<16x1xf32>
    %cst_97 = arith.constant 3.200000e+01 : f32
    %284 = vector.broadcast %cst_97 : f32 to vector<16x1xf32>
    %285 = arith.divf %283, %284 : vector<16x1xf32>
    %286 = vector.broadcast %285 : vector<16x1xf32> to vector<16x32xf32>
    %287 = arith.subf %279, %286 : vector<16x32xf32>
    %288 = arith.mulf %287, %287 : vector<16x32xf32>
    %cst_98 = arith.constant dense<0.000000e+00> : vector<16xf32>
    %289 = vector.multi_reduction <add>, %288, %cst_98 [1] : vector<16x32xf32> to vector<16xf32>
    %290 = vector.shape_cast %289 : vector<16xf32> to vector<16x1xf32>
    %cst_99 = arith.constant 3.100000e+01 : f32
    %291 = vector.broadcast %cst_99 : f32 to vector<16x1xf32>
    %292 = arith.divf %290, %291 : vector<16x1xf32>
    %293 = math.sqrt %292 : vector<16x1xf32>
    %cst_100 = arith.constant 9.99999997E-7 : f32
    %294 = vector.broadcast %cst_100 : f32 to vector<16x1xf32>
    %295 = arith.addf %293, %294 : vector<16x1xf32>
    %296 = tpu.reciprocal %295 : vector<16x1xf32> -> vector<16x1xf32>
    %297 = vector.broadcast %296 : vector<16x1xf32> to vector<16x32xf32>
    %298 = arith.mulf %287, %297 : vector<16x32xf32>
    %299 = vector.broadcast %280 : vector<1x32xf32> to vector<16x32xf32>
    %300 = arith.mulf %299, %298 : vector<16x32xf32>
    %301 = vector.broadcast %281 : vector<1x32xf32> to vector<16x32xf32>
    %302 = arith.addf %300, %301 : vector<16x32xf32>
    %c2 = arith.constant 2 : index
    %c0_101 = arith.constant 0 : index
    %c0_102 = arith.constant 0 : index
    %303 = vector.load %arg6[%c2, %c0_101, %c0_102] : memref<4x32x96xf32, #tpu.memory_space<vmem>>, vector<1x32x96xf32>
    %304 = vector.shape_cast %303 : vector<1x32x96xf32> to vector<32x96xf32>
    %cst_103 = arith.constant dense<0.000000e+00> : vector<16x96xf32>
    %305 = tpu.matmul %302, %304, %cst_103 {dimension_numbers = #tpu.dot_dimension_numbers<[1], [0], [0], [1], [0, 0, 1, 1], [], []>} : vector<16x32xf32>, vector<32x96xf32>, vector<16x96xf32> -> vector<16x96xf32>
    %306 = vector.extract_strided_slice %6 {offsets = [2, 0], sizes = [1, 96], strides = [1, 1]} : vector<4x96xf32> to vector<1x96xf32>
    %307 = vector.broadcast %306 : vector<1x96xf32> to vector<16x96xf32>
    %308 = arith.addf %305, %307 : vector<16x96xf32>
    %309 = vector.extract_strided_slice %308 {offsets = [0, 0], sizes = [16, 32], strides = [1, 1]} : vector<16x96xf32> to vector<16x32xf32>
    %310 = vector.extract_strided_slice %308 {offsets = [0, 32], sizes = [16, 32], strides = [1, 1]} : vector<16x96xf32> to vector<16x32xf32>
    %311 = vector.extract_strided_slice %308 {offsets = [0, 64], sizes = [16, 32], strides = [1, 1]} : vector<16x96xf32> to vector<16x32xf32>
    %c2_104 = arith.constant 2 : index
    %c0_105 = arith.constant 0 : index
    %c0_106 = arith.constant 0 : index
    %312 = vector.load %arg8[%c2_104, %c0_105, %c0_106] : memref<4x32x32xf32, #tpu.memory_space<vmem>>, vector<1x32x32xf32>
    %313 = vector.shape_cast %312 : vector<1x32x32xf32> to vector<32x32xf32>
    %314 = vector.extract_strided_slice %309 {offsets = [0, 0], sizes = [16, 8], strides = [1, 1]} : vector<16x32xf32> to vector<16x8xf32>
    %315 = vector.extract_strided_slice %310 {offsets = [0, 0], sizes = [16, 8], strides = [1, 1]} : vector<16x32xf32> to vector<16x8xf32>
    %cst_107 = arith.constant dense<0.000000e+00> : vector<16x16xf32>
    %316 = tpu.matmul %314, %315, %cst_107 {dimension_numbers = #tpu.dot_dimension_numbers<[1], [1], [0], [0], [0, 0, 1, 0], [], []>} : vector<16x8xf32>, vector<16x8xf32>, vector<16x16xf32> -> vector<16x16xf32>
    %317 = arith.addf %316, %2 : vector<16x16xf32>
    %cst_108 = arith.constant dense<0xFF800000> : vector<16xf32>
    %318 = vector.multi_reduction <maximumf>, %317, %cst_108 [1] : vector<16x16xf32> to vector<16xf32>
    %319 = vector.shape_cast %318 : vector<16xf32> to vector<16x1xf32>
    %320 = vector.broadcast %319 : vector<16x1xf32> to vector<16x16xf32>
    %321 = arith.subf %317, %320 : vector<16x16xf32>
    %322 = math.exp %321 : vector<16x16xf32>
    %cst_109 = arith.constant dense<0.000000e+00> : vector<16xf32>
    %323 = vector.multi_reduction <add>, %322, %cst_109 [1] : vector<16x16xf32> to vector<16xf32>
    %324 = vector.shape_cast %323 : vector<16xf32> to vector<16x1xf32>
    %325 = tpu.reciprocal %324 : vector<16x1xf32> -> vector<16x1xf32>
    %326 = vector.broadcast %325 : vector<16x1xf32> to vector<16x16xf32>
    %327 = arith.mulf %322, %326 : vector<16x16xf32>
    %328 = vector.extract_strided_slice %311 {offsets = [0, 0], sizes = [16, 8], strides = [1, 1]} : vector<16x32xf32> to vector<16x8xf32>
    %cst_110 = arith.constant dense<0.000000e+00> : vector<16x8xf32>
    %329 = tpu.matmul %327, %328, %cst_110 {dimension_numbers = #tpu.dot_dimension_numbers<[1], [0], [0], [1], [0, 0, 1, 1], [], []>} : vector<16x16xf32>, vector<16x8xf32>, vector<16x8xf32> -> vector<16x8xf32>
    %330 = vector.extract_strided_slice %313 {offsets = [0, 0], sizes = [8, 32], strides = [1, 1]} : vector<32x32xf32> to vector<8x32xf32>
    %cst_111 = arith.constant dense<0.000000e+00> : vector<16x32xf32>
    %331 = tpu.matmul %329, %330, %cst_111 {dimension_numbers = #tpu.dot_dimension_numbers<[1], [0], [0], [1], [0, 0, 1, 1], [], []>} : vector<16x8xf32>, vector<8x32xf32>, vector<16x32xf32> -> vector<16x32xf32>
    %332 = vector.extract_strided_slice %309 {offsets = [0, 8], sizes = [16, 8], strides = [1, 1]} : vector<16x32xf32> to vector<16x8xf32>
    %333 = vector.extract_strided_slice %310 {offsets = [0, 8], sizes = [16, 8], strides = [1, 1]} : vector<16x32xf32> to vector<16x8xf32>
    %cst_112 = arith.constant dense<0.000000e+00> : vector<16x16xf32>
    %334 = tpu.matmul %332, %333, %cst_112 {dimension_numbers = #tpu.dot_dimension_numbers<[1], [1], [0], [0], [0, 0, 1, 0], [], []>} : vector<16x8xf32>, vector<16x8xf32>, vector<16x16xf32> -> vector<16x16xf32>
    %335 = arith.addf %334, %2 : vector<16x16xf32>
    %cst_113 = arith.constant dense<0xFF800000> : vector<16xf32>
    %336 = vector.multi_reduction <maximumf>, %335, %cst_113 [1] : vector<16x16xf32> to vector<16xf32>
    %337 = vector.shape_cast %336 : vector<16xf32> to vector<16x1xf32>
    %338 = vector.broadcast %337 : vector<16x1xf32> to vector<16x16xf32>
    %339 = arith.subf %335, %338 : vector<16x16xf32>
    %340 = math.exp %339 : vector<16x16xf32>
    %cst_114 = arith.constant dense<0.000000e+00> : vector<16xf32>
    %341 = vector.multi_reduction <add>, %340, %cst_114 [1] : vector<16x16xf32> to vector<16xf32>
    %342 = vector.shape_cast %341 : vector<16xf32> to vector<16x1xf32>
    %343 = tpu.reciprocal %342 : vector<16x1xf32> -> vector<16x1xf32>
    %344 = vector.broadcast %343 : vector<16x1xf32> to vector<16x16xf32>
    %345 = arith.mulf %340, %344 : vector<16x16xf32>
    %346 = vector.extract_strided_slice %311 {offsets = [0, 8], sizes = [16, 8], strides = [1, 1]} : vector<16x32xf32> to vector<16x8xf32>
    %cst_115 = arith.constant dense<0.000000e+00> : vector<16x8xf32>
    %347 = tpu.matmul %345, %346, %cst_115 {dimension_numbers = #tpu.dot_dimension_numbers<[1], [0], [0], [1], [0, 0, 1, 1], [], []>} : vector<16x16xf32>, vector<16x8xf32>, vector<16x8xf32> -> vector<16x8xf32>
    %348 = vector.extract_strided_slice %313 {offsets = [8, 0], sizes = [8, 32], strides = [1, 1]} : vector<32x32xf32> to vector<8x32xf32>
    %cst_116 = arith.constant dense<0.000000e+00> : vector<16x32xf32>
    %349 = tpu.matmul %347, %348, %cst_116 {dimension_numbers = #tpu.dot_dimension_numbers<[1], [0], [0], [1], [0, 0, 1, 1], [], []>} : vector<16x8xf32>, vector<8x32xf32>, vector<16x32xf32> -> vector<16x32xf32>
    %350 = arith.addf %331, %349 : vector<16x32xf32>
    %351 = vector.extract_strided_slice %309 {offsets = [0, 16], sizes = [16, 8], strides = [1, 1]} : vector<16x32xf32> to vector<16x8xf32>
    %352 = vector.extract_strided_slice %310 {offsets = [0, 16], sizes = [16, 8], strides = [1, 1]} : vector<16x32xf32> to vector<16x8xf32>
    %cst_117 = arith.constant dense<0.000000e+00> : vector<16x16xf32>
    %353 = tpu.matmul %351, %352, %cst_117 {dimension_numbers = #tpu.dot_dimension_numbers<[1], [1], [0], [0], [0, 0, 1, 0], [], []>} : vector<16x8xf32>, vector<16x8xf32>, vector<16x16xf32> -> vector<16x16xf32>
    %354 = arith.addf %353, %2 : vector<16x16xf32>
    %cst_118 = arith.constant dense<0xFF800000> : vector<16xf32>
    %355 = vector.multi_reduction <maximumf>, %354, %cst_118 [1] : vector<16x16xf32> to vector<16xf32>
    %356 = vector.shape_cast %355 : vector<16xf32> to vector<16x1xf32>
    %357 = vector.broadcast %356 : vector<16x1xf32> to vector<16x16xf32>
    %358 = arith.subf %354, %357 : vector<16x16xf32>
    %359 = math.exp %358 : vector<16x16xf32>
    %cst_119 = arith.constant dense<0.000000e+00> : vector<16xf32>
    %360 = vector.multi_reduction <add>, %359, %cst_119 [1] : vector<16x16xf32> to vector<16xf32>
    %361 = vector.shape_cast %360 : vector<16xf32> to vector<16x1xf32>
    %362 = tpu.reciprocal %361 : vector<16x1xf32> -> vector<16x1xf32>
    %363 = vector.broadcast %362 : vector<16x1xf32> to vector<16x16xf32>
    %364 = arith.mulf %359, %363 : vector<16x16xf32>
    %365 = vector.extract_strided_slice %311 {offsets = [0, 16], sizes = [16, 8], strides = [1, 1]} : vector<16x32xf32> to vector<16x8xf32>
    %cst_120 = arith.constant dense<0.000000e+00> : vector<16x8xf32>
    %366 = tpu.matmul %364, %365, %cst_120 {dimension_numbers = #tpu.dot_dimension_numbers<[1], [0], [0], [1], [0, 0, 1, 1], [], []>} : vector<16x16xf32>, vector<16x8xf32>, vector<16x8xf32> -> vector<16x8xf32>
    %367 = vector.extract_strided_slice %313 {offsets = [16, 0], sizes = [8, 32], strides = [1, 1]} : vector<32x32xf32> to vector<8x32xf32>
    %cst_121 = arith.constant dense<0.000000e+00> : vector<16x32xf32>
    %368 = tpu.matmul %366, %367, %cst_121 {dimension_numbers = #tpu.dot_dimension_numbers<[1], [0], [0], [1], [0, 0, 1, 1], [], []>} : vector<16x8xf32>, vector<8x32xf32>, vector<16x32xf32> -> vector<16x32xf32>
    %369 = arith.addf %350, %368 : vector<16x32xf32>
    %370 = vector.extract_strided_slice %309 {offsets = [0, 24], sizes = [16, 8], strides = [1, 1]} : vector<16x32xf32> to vector<16x8xf32>
    %371 = vector.extract_strided_slice %310 {offsets = [0, 24], sizes = [16, 8], strides = [1, 1]} : vector<16x32xf32> to vector<16x8xf32>
    %cst_122 = arith.constant dense<0.000000e+00> : vector<16x16xf32>
    %372 = tpu.matmul %370, %371, %cst_122 {dimension_numbers = #tpu.dot_dimension_numbers<[1], [1], [0], [0], [0, 0, 1, 0], [], []>} : vector<16x8xf32>, vector<16x8xf32>, vector<16x16xf32> -> vector<16x16xf32>
    %373 = arith.addf %372, %2 : vector<16x16xf32>
    %cst_123 = arith.constant dense<0xFF800000> : vector<16xf32>
    %374 = vector.multi_reduction <maximumf>, %373, %cst_123 [1] : vector<16x16xf32> to vector<16xf32>
    %375 = vector.shape_cast %374 : vector<16xf32> to vector<16x1xf32>
    %376 = vector.broadcast %375 : vector<16x1xf32> to vector<16x16xf32>
    %377 = arith.subf %373, %376 : vector<16x16xf32>
    %378 = math.exp %377 : vector<16x16xf32>
    %cst_124 = arith.constant dense<0.000000e+00> : vector<16xf32>
    %379 = vector.multi_reduction <add>, %378, %cst_124 [1] : vector<16x16xf32> to vector<16xf32>
    %380 = vector.shape_cast %379 : vector<16xf32> to vector<16x1xf32>
    %381 = tpu.reciprocal %380 : vector<16x1xf32> -> vector<16x1xf32>
    %382 = vector.broadcast %381 : vector<16x1xf32> to vector<16x16xf32>
    %383 = arith.mulf %378, %382 : vector<16x16xf32>
    %384 = vector.extract_strided_slice %311 {offsets = [0, 24], sizes = [16, 8], strides = [1, 1]} : vector<16x32xf32> to vector<16x8xf32>
    %cst_125 = arith.constant dense<0.000000e+00> : vector<16x8xf32>
    %385 = tpu.matmul %383, %384, %cst_125 {dimension_numbers = #tpu.dot_dimension_numbers<[1], [0], [0], [1], [0, 0, 1, 1], [], []>} : vector<16x16xf32>, vector<16x8xf32>, vector<16x8xf32> -> vector<16x8xf32>
    %386 = vector.extract_strided_slice %313 {offsets = [24, 0], sizes = [8, 32], strides = [1, 1]} : vector<32x32xf32> to vector<8x32xf32>
    %cst_126 = arith.constant dense<0.000000e+00> : vector<16x32xf32>
    %387 = tpu.matmul %385, %386, %cst_126 {dimension_numbers = #tpu.dot_dimension_numbers<[1], [0], [0], [1], [0, 0, 1, 1], [], []>} : vector<16x8xf32>, vector<8x32xf32>, vector<16x32xf32> -> vector<16x32xf32>
    %388 = arith.addf %369, %387 : vector<16x32xf32>
    %389 = vector.extract_strided_slice %7 {offsets = [2, 0], sizes = [1, 32], strides = [1, 1]} : vector<4x32xf32> to vector<1x32xf32>
    %390 = vector.broadcast %389 : vector<1x32xf32> to vector<16x32xf32>
    %391 = arith.addf %388, %390 : vector<16x32xf32>
    %392 = arith.addf %279, %391 : vector<16x32xf32>
    %393 = vector.extract_strided_slice %4 {offsets = [4, 0], sizes = [1, 32], strides = [1, 1]} : vector<7x32xf32> to vector<1x32xf32>
    %394 = vector.extract_strided_slice %5 {offsets = [4, 0], sizes = [1, 32], strides = [1, 1]} : vector<7x32xf32> to vector<1x32xf32>
    %cst_127 = arith.constant dense<0.000000e+00> : vector<16xf32>
    %395 = vector.multi_reduction <add>, %392, %cst_127 [1] : vector<16x32xf32> to vector<16xf32>
    %396 = vector.shape_cast %395 : vector<16xf32> to vector<16x1xf32>
    %cst_128 = arith.constant 3.200000e+01 : f32
    %397 = vector.broadcast %cst_128 : f32 to vector<16x1xf32>
    %398 = arith.divf %396, %397 : vector<16x1xf32>
    %399 = vector.broadcast %398 : vector<16x1xf32> to vector<16x32xf32>
    %400 = arith.subf %392, %399 : vector<16x32xf32>
    %401 = arith.mulf %400, %400 : vector<16x32xf32>
    %cst_129 = arith.constant dense<0.000000e+00> : vector<16xf32>
    %402 = vector.multi_reduction <add>, %401, %cst_129 [1] : vector<16x32xf32> to vector<16xf32>
    %403 = vector.shape_cast %402 : vector<16xf32> to vector<16x1xf32>
    %cst_130 = arith.constant 3.100000e+01 : f32
    %404 = vector.broadcast %cst_130 : f32 to vector<16x1xf32>
    %405 = arith.divf %403, %404 : vector<16x1xf32>
    %406 = math.sqrt %405 : vector<16x1xf32>
    %cst_131 = arith.constant 9.99999997E-7 : f32
    %407 = vector.broadcast %cst_131 : f32 to vector<16x1xf32>
    %408 = arith.addf %406, %407 : vector<16x1xf32>
    %409 = tpu.reciprocal %408 : vector<16x1xf32> -> vector<16x1xf32>
    %410 = vector.broadcast %409 : vector<16x1xf32> to vector<16x32xf32>
    %411 = arith.mulf %400, %410 : vector<16x32xf32>
    %412 = vector.broadcast %393 : vector<1x32xf32> to vector<16x32xf32>
    %413 = arith.mulf %412, %411 : vector<16x32xf32>
    %414 = vector.broadcast %394 : vector<1x32xf32> to vector<16x32xf32>
    %415 = arith.addf %413, %414 : vector<16x32xf32>
    %c3 = arith.constant 3 : index
    %c0_132 = arith.constant 0 : index
    %c0_133 = arith.constant 0 : index
    %416 = vector.load %arg6[%c3, %c0_132, %c0_133] : memref<4x32x96xf32, #tpu.memory_space<vmem>>, vector<1x32x96xf32>
    %417 = vector.shape_cast %416 : vector<1x32x96xf32> to vector<32x96xf32>
    %418 = vector.extract_strided_slice %6 {offsets = [3, 0], sizes = [1, 96], strides = [1, 1]} : vector<4x96xf32> to vector<1x96xf32>
    %419 = vector.extract_strided_slice %417 {offsets = [0, 0], sizes = [32, 32], strides = [1, 1]} : vector<32x96xf32> to vector<32x32xf32>
    %cst_134 = arith.constant dense<0.000000e+00> : vector<16x32xf32>
    %420 = tpu.matmul %415, %419, %cst_134 {dimension_numbers = #tpu.dot_dimension_numbers<[1], [0], [0], [1], [0, 0, 1, 1], [], []>} : vector<16x32xf32>, vector<32x32xf32>, vector<16x32xf32> -> vector<16x32xf32>
    %421 = vector.extract_strided_slice %418 {offsets = [0, 0], sizes = [1, 32], strides = [1, 1]} : vector<1x96xf32> to vector<1x32xf32>
    %422 = vector.broadcast %421 : vector<1x32xf32> to vector<16x32xf32>
    %423 = arith.addf %420, %422 : vector<16x32xf32>
    %424 = vector.extract_strided_slice %417 {offsets = [0, 32], sizes = [32, 64], strides = [1, 1]} : vector<32x96xf32> to vector<32x64xf32>
    %cst_135 = arith.constant dense<0.000000e+00> : vector<16x64xf32>
    %425 = tpu.matmul %1, %424, %cst_135 {dimension_numbers = #tpu.dot_dimension_numbers<[1], [0], [0], [1], [0, 0, 1, 1], [], []>} : vector<16x32xf32>, vector<32x64xf32>, vector<16x64xf32> -> vector<16x64xf32>
    %426 = vector.extract_strided_slice %418 {offsets = [0, 32], sizes = [1, 64], strides = [1, 1]} : vector<1x96xf32> to vector<1x64xf32>
    %427 = vector.broadcast %426 : vector<1x64xf32> to vector<16x64xf32>
    %428 = arith.addf %425, %427 : vector<16x64xf32>
    %429 = vector.extract_strided_slice %428 {offsets = [0, 0], sizes = [16, 32], strides = [1, 1]} : vector<16x64xf32> to vector<16x32xf32>
    %430 = vector.extract_strided_slice %428 {offsets = [0, 32], sizes = [16, 32], strides = [1, 1]} : vector<16x64xf32> to vector<16x32xf32>
    %c3_136 = arith.constant 3 : index
    %c0_137 = arith.constant 0 : index
    %c0_138 = arith.constant 0 : index
    %431 = vector.load %arg8[%c3_136, %c0_137, %c0_138] : memref<4x32x32xf32, #tpu.memory_space<vmem>>, vector<1x32x32xf32>
    %432 = vector.shape_cast %431 : vector<1x32x32xf32> to vector<32x32xf32>
    %433 = vector.extract_strided_slice %423 {offsets = [0, 0], sizes = [16, 8], strides = [1, 1]} : vector<16x32xf32> to vector<16x8xf32>
    %434 = vector.extract_strided_slice %429 {offsets = [0, 0], sizes = [16, 8], strides = [1, 1]} : vector<16x32xf32> to vector<16x8xf32>
    %cst_139 = arith.constant dense<0.000000e+00> : vector<16x16xf32>
    %435 = tpu.matmul %433, %434, %cst_139 {dimension_numbers = #tpu.dot_dimension_numbers<[1], [1], [0], [0], [0, 0, 1, 0], [], []>} : vector<16x8xf32>, vector<16x8xf32>, vector<16x16xf32> -> vector<16x16xf32>
    %436 = arith.addf %435, %3 : vector<16x16xf32>
    %cst_140 = arith.constant dense<0xFF800000> : vector<16xf32>
    %437 = vector.multi_reduction <maximumf>, %436, %cst_140 [1] : vector<16x16xf32> to vector<16xf32>
    %438 = vector.shape_cast %437 : vector<16xf32> to vector<16x1xf32>
    %439 = vector.broadcast %438 : vector<16x1xf32> to vector<16x16xf32>
    %440 = arith.subf %436, %439 : vector<16x16xf32>
    %441 = math.exp %440 : vector<16x16xf32>
    %cst_141 = arith.constant dense<0.000000e+00> : vector<16xf32>
    %442 = vector.multi_reduction <add>, %441, %cst_141 [1] : vector<16x16xf32> to vector<16xf32>
    %443 = vector.shape_cast %442 : vector<16xf32> to vector<16x1xf32>
    %444 = tpu.reciprocal %443 : vector<16x1xf32> -> vector<16x1xf32>
    %445 = vector.broadcast %444 : vector<16x1xf32> to vector<16x16xf32>
    %446 = arith.mulf %441, %445 : vector<16x16xf32>
    %447 = vector.extract_strided_slice %430 {offsets = [0, 0], sizes = [16, 8], strides = [1, 1]} : vector<16x32xf32> to vector<16x8xf32>
    %cst_142 = arith.constant dense<0.000000e+00> : vector<16x8xf32>
    %448 = tpu.matmul %446, %447, %cst_142 {dimension_numbers = #tpu.dot_dimension_numbers<[1], [0], [0], [1], [0, 0, 1, 1], [], []>} : vector<16x16xf32>, vector<16x8xf32>, vector<16x8xf32> -> vector<16x8xf32>
    %449 = vector.extract_strided_slice %432 {offsets = [0, 0], sizes = [8, 32], strides = [1, 1]} : vector<32x32xf32> to vector<8x32xf32>
    %cst_143 = arith.constant dense<0.000000e+00> : vector<16x32xf32>
    %450 = tpu.matmul %448, %449, %cst_143 {dimension_numbers = #tpu.dot_dimension_numbers<[1], [0], [0], [1], [0, 0, 1, 1], [], []>} : vector<16x8xf32>, vector<8x32xf32>, vector<16x32xf32> -> vector<16x32xf32>
    %451 = vector.extract_strided_slice %423 {offsets = [0, 8], sizes = [16, 8], strides = [1, 1]} : vector<16x32xf32> to vector<16x8xf32>
    %452 = vector.extract_strided_slice %429 {offsets = [0, 8], sizes = [16, 8], strides = [1, 1]} : vector<16x32xf32> to vector<16x8xf32>
    %cst_144 = arith.constant dense<0.000000e+00> : vector<16x16xf32>
    %453 = tpu.matmul %451, %452, %cst_144 {dimension_numbers = #tpu.dot_dimension_numbers<[1], [1], [0], [0], [0, 0, 1, 0], [], []>} : vector<16x8xf32>, vector<16x8xf32>, vector<16x16xf32> -> vector<16x16xf32>
    %454 = arith.addf %453, %3 : vector<16x16xf32>
    %cst_145 = arith.constant dense<0xFF800000> : vector<16xf32>
    %455 = vector.multi_reduction <maximumf>, %454, %cst_145 [1] : vector<16x16xf32> to vector<16xf32>
    %456 = vector.shape_cast %455 : vector<16xf32> to vector<16x1xf32>
    %457 = vector.broadcast %456 : vector<16x1xf32> to vector<16x16xf32>
    %458 = arith.subf %454, %457 : vector<16x16xf32>
    %459 = math.exp %458 : vector<16x16xf32>
    %cst_146 = arith.constant dense<0.000000e+00> : vector<16xf32>
    %460 = vector.multi_reduction <add>, %459, %cst_146 [1] : vector<16x16xf32> to vector<16xf32>
    %461 = vector.shape_cast %460 : vector<16xf32> to vector<16x1xf32>
    %462 = tpu.reciprocal %461 : vector<16x1xf32> -> vector<16x1xf32>
    %463 = vector.broadcast %462 : vector<16x1xf32> to vector<16x16xf32>
    %464 = arith.mulf %459, %463 : vector<16x16xf32>
    %465 = vector.extract_strided_slice %430 {offsets = [0, 8], sizes = [16, 8], strides = [1, 1]} : vector<16x32xf32> to vector<16x8xf32>
    %cst_147 = arith.constant dense<0.000000e+00> : vector<16x8xf32>
    %466 = tpu.matmul %464, %465, %cst_147 {dimension_numbers = #tpu.dot_dimension_numbers<[1], [0], [0], [1], [0, 0, 1, 1], [], []>} : vector<16x16xf32>, vector<16x8xf32>, vector<16x8xf32> -> vector<16x8xf32>
    %467 = vector.extract_strided_slice %432 {offsets = [8, 0], sizes = [8, 32], strides = [1, 1]} : vector<32x32xf32> to vector<8x32xf32>
    %cst_148 = arith.constant dense<0.000000e+00> : vector<16x32xf32>
    %468 = tpu.matmul %466, %467, %cst_148 {dimension_numbers = #tpu.dot_dimension_numbers<[1], [0], [0], [1], [0, 0, 1, 1], [], []>} : vector<16x8xf32>, vector<8x32xf32>, vector<16x32xf32> -> vector<16x32xf32>
    %469 = arith.addf %450, %468 : vector<16x32xf32>
    %470 = vector.extract_strided_slice %423 {offsets = [0, 16], sizes = [16, 8], strides = [1, 1]} : vector<16x32xf32> to vector<16x8xf32>
    %471 = vector.extract_strided_slice %429 {offsets = [0, 16], sizes = [16, 8], strides = [1, 1]} : vector<16x32xf32> to vector<16x8xf32>
    %cst_149 = arith.constant dense<0.000000e+00> : vector<16x16xf32>
    %472 = tpu.matmul %470, %471, %cst_149 {dimension_numbers = #tpu.dot_dimension_numbers<[1], [1], [0], [0], [0, 0, 1, 0], [], []>} : vector<16x8xf32>, vector<16x8xf32>, vector<16x16xf32> -> vector<16x16xf32>
    %473 = arith.addf %472, %3 : vector<16x16xf32>
    %cst_150 = arith.constant dense<0xFF800000> : vector<16xf32>
    %474 = vector.multi_reduction <maximumf>, %473, %cst_150 [1] : vector<16x16xf32> to vector<16xf32>
    %475 = vector.shape_cast %474 : vector<16xf32> to vector<16x1xf32>
    %476 = vector.broadcast %475 : vector<16x1xf32> to vector<16x16xf32>
    %477 = arith.subf %473, %476 : vector<16x16xf32>
    %478 = math.exp %477 : vector<16x16xf32>
    %cst_151 = arith.constant dense<0.000000e+00> : vector<16xf32>
    %479 = vector.multi_reduction <add>, %478, %cst_151 [1] : vector<16x16xf32> to vector<16xf32>
    %480 = vector.shape_cast %479 : vector<16xf32> to vector<16x1xf32>
    %481 = tpu.reciprocal %480 : vector<16x1xf32> -> vector<16x1xf32>
    %482 = vector.broadcast %481 : vector<16x1xf32> to vector<16x16xf32>
    %483 = arith.mulf %478, %482 : vector<16x16xf32>
    %484 = vector.extract_strided_slice %430 {offsets = [0, 16], sizes = [16, 8], strides = [1, 1]} : vector<16x32xf32> to vector<16x8xf32>
    %cst_152 = arith.constant dense<0.000000e+00> : vector<16x8xf32>
    %485 = tpu.matmul %483, %484, %cst_152 {dimension_numbers = #tpu.dot_dimension_numbers<[1], [0], [0], [1], [0, 0, 1, 1], [], []>} : vector<16x16xf32>, vector<16x8xf32>, vector<16x8xf32> -> vector<16x8xf32>
    %486 = vector.extract_strided_slice %432 {offsets = [16, 0], sizes = [8, 32], strides = [1, 1]} : vector<32x32xf32> to vector<8x32xf32>
    %cst_153 = arith.constant dense<0.000000e+00> : vector<16x32xf32>
    %487 = tpu.matmul %485, %486, %cst_153 {dimension_numbers = #tpu.dot_dimension_numbers<[1], [0], [0], [1], [0, 0, 1, 1], [], []>} : vector<16x8xf32>, vector<8x32xf32>, vector<16x32xf32> -> vector<16x32xf32>
    %488 = arith.addf %469, %487 : vector<16x32xf32>
    %489 = vector.extract_strided_slice %423 {offsets = [0, 24], sizes = [16, 8], strides = [1, 1]} : vector<16x32xf32> to vector<16x8xf32>
    %490 = vector.extract_strided_slice %429 {offsets = [0, 24], sizes = [16, 8], strides = [1, 1]} : vector<16x32xf32> to vector<16x8xf32>
    %cst_154 = arith.constant dense<0.000000e+00> : vector<16x16xf32>
    %491 = tpu.matmul %489, %490, %cst_154 {dimension_numbers = #tpu.dot_dimension_numbers<[1], [1], [0], [0], [0, 0, 1, 0], [], []>} : vector<16x8xf32>, vector<16x8xf32>, vector<16x16xf32> -> vector<16x16xf32>
    %492 = arith.addf %491, %3 : vector<16x16xf32>
    %cst_155 = arith.constant dense<0xFF800000> : vector<16xf32>
    %493 = vector.multi_reduction <maximumf>, %492, %cst_155 [1] : vector<16x16xf32> to vector<16xf32>
    %494 = vector.shape_cast %493 : vector<16xf32> to vector<16x1xf32>
    %495 = vector.broadcast %494 : vector<16x1xf32> to vector<16x16xf32>
    %496 = arith.subf %492, %495 : vector<16x16xf32>
    %497 = math.exp %496 : vector<16x16xf32>
    %cst_156 = arith.constant dense<0.000000e+00> : vector<16xf32>
    %498 = vector.multi_reduction <add>, %497, %cst_156 [1] : vector<16x16xf32> to vector<16xf32>
    %499 = vector.shape_cast %498 : vector<16xf32> to vector<16x1xf32>
    %500 = tpu.reciprocal %499 : vector<16x1xf32> -> vector<16x1xf32>
    %501 = vector.broadcast %500 : vector<16x1xf32> to vector<16x16xf32>
    %502 = arith.mulf %497, %501 : vector<16x16xf32>
    %503 = vector.extract_strided_slice %430 {offsets = [0, 24], sizes = [16, 8], strides = [1, 1]} : vector<16x32xf32> to vector<16x8xf32>
    %cst_157 = arith.constant dense<0.000000e+00> : vector<16x8xf32>
    %504 = tpu.matmul %502, %503, %cst_157 {dimension_numbers = #tpu.dot_dimension_numbers<[1], [0], [0], [1], [0, 0, 1, 1], [], []>} : vector<16x16xf32>, vector<16x8xf32>, vector<16x8xf32> -> vector<16x8xf32>
    %505 = vector.extract_strided_slice %432 {offsets = [24, 0], sizes = [8, 32], strides = [1, 1]} : vector<32x32xf32> to vector<8x32xf32>
    %cst_158 = arith.constant dense<0.000000e+00> : vector<16x32xf32>
    %506 = tpu.matmul %504, %505, %cst_158 {dimension_numbers = #tpu.dot_dimension_numbers<[1], [0], [0], [1], [0, 0, 1, 1], [], []>} : vector<16x8xf32>, vector<8x32xf32>, vector<16x32xf32> -> vector<16x32xf32>
    %507 = arith.addf %488, %506 : vector<16x32xf32>
    %508 = vector.extract_strided_slice %7 {offsets = [3, 0], sizes = [1, 32], strides = [1, 1]} : vector<4x32xf32> to vector<1x32xf32>
    %509 = vector.broadcast %508 : vector<1x32xf32> to vector<16x32xf32>
    %510 = arith.addf %507, %509 : vector<16x32xf32>
    %511 = arith.addf %392, %510 : vector<16x32xf32>
    %512 = vector.extract_strided_slice %4 {offsets = [5, 0], sizes = [1, 32], strides = [1, 1]} : vector<7x32xf32> to vector<1x32xf32>
    %513 = vector.extract_strided_slice %5 {offsets = [5, 0], sizes = [1, 32], strides = [1, 1]} : vector<7x32xf32> to vector<1x32xf32>
    %cst_159 = arith.constant dense<0.000000e+00> : vector<16xf32>
    %514 = vector.multi_reduction <add>, %511, %cst_159 [1] : vector<16x32xf32> to vector<16xf32>
    %515 = vector.shape_cast %514 : vector<16xf32> to vector<16x1xf32>
    %cst_160 = arith.constant 3.200000e+01 : f32
    %516 = vector.broadcast %cst_160 : f32 to vector<16x1xf32>
    %517 = arith.divf %515, %516 : vector<16x1xf32>
    %518 = vector.broadcast %517 : vector<16x1xf32> to vector<16x32xf32>
    %519 = arith.subf %511, %518 : vector<16x32xf32>
    %520 = arith.mulf %519, %519 : vector<16x32xf32>
    %cst_161 = arith.constant dense<0.000000e+00> : vector<16xf32>
    %521 = vector.multi_reduction <add>, %520, %cst_161 [1] : vector<16x32xf32> to vector<16xf32>
    %522 = vector.shape_cast %521 : vector<16xf32> to vector<16x1xf32>
    %cst_162 = arith.constant 3.100000e+01 : f32
    %523 = vector.broadcast %cst_162 : f32 to vector<16x1xf32>
    %524 = arith.divf %522, %523 : vector<16x1xf32>
    %525 = math.sqrt %524 : vector<16x1xf32>
    %cst_163 = arith.constant 9.99999997E-7 : f32
    %526 = vector.broadcast %cst_163 : f32 to vector<16x1xf32>
    %527 = arith.addf %525, %526 : vector<16x1xf32>
    %528 = tpu.reciprocal %527 : vector<16x1xf32> -> vector<16x1xf32>
    %529 = vector.broadcast %528 : vector<16x1xf32> to vector<16x32xf32>
    %530 = arith.mulf %519, %529 : vector<16x32xf32>
    %531 = vector.broadcast %512 : vector<1x32xf32> to vector<16x32xf32>
    %532 = arith.mulf %531, %530 : vector<16x32xf32>
    %533 = vector.broadcast %513 : vector<1x32xf32> to vector<16x32xf32>
    %534 = arith.addf %532, %533 : vector<16x32xf32>
    %c1_164 = arith.constant 1 : index
    %c0_165 = arith.constant 0 : index
    %c0_166 = arith.constant 0 : index
    %535 = vector.load %arg10[%c1_164, %c0_165, %c0_166] : memref<2x32x64xf32, #tpu.memory_space<vmem>>, vector<1x32x64xf32>
    %536 = vector.shape_cast %535 : vector<1x32x64xf32> to vector<32x64xf32>
    %cst_167 = arith.constant dense<0.000000e+00> : vector<16x64xf32>
    %537 = tpu.matmul %534, %536, %cst_167 {dimension_numbers = #tpu.dot_dimension_numbers<[1], [0], [0], [1], [0, 0, 1, 1], [], []>} : vector<16x32xf32>, vector<32x64xf32>, vector<16x64xf32> -> vector<16x64xf32>
    %538 = vector.extract_strided_slice %8 {offsets = [1, 0], sizes = [1, 64], strides = [1, 1]} : vector<2x64xf32> to vector<1x64xf32>
    %539 = vector.broadcast %538 : vector<1x64xf32> to vector<16x64xf32>
    %540 = arith.addf %537, %539 : vector<16x64xf32>
    %cst_168 = arith.constant 0.000000e+00 : f32
    %541 = vector.broadcast %cst_168 : f32 to vector<16x64xf32>
    %542 = arith.maximumf %540, %541 : vector<16x64xf32>
    %c1_169 = arith.constant 1 : index
    %c0_170 = arith.constant 0 : index
    %c0_171 = arith.constant 0 : index
    %543 = vector.load %arg12[%c1_169, %c0_170, %c0_171] : memref<2x64x32xf32, #tpu.memory_space<vmem>>, vector<1x64x32xf32>
    %544 = vector.shape_cast %543 : vector<1x64x32xf32> to vector<64x32xf32>
    %cst_172 = arith.constant dense<0.000000e+00> : vector<16x32xf32>
    %545 = tpu.matmul %542, %544, %cst_172 {dimension_numbers = #tpu.dot_dimension_numbers<[1], [0], [0], [1], [0, 0, 1, 1], [], []>} : vector<16x64xf32>, vector<64x32xf32>, vector<16x32xf32> -> vector<16x32xf32>
    %546 = arith.addf %511, %545 : vector<16x32xf32>
    %547 = vector.extract_strided_slice %9 {offsets = [1, 0], sizes = [1, 32], strides = [1, 1]} : vector<2x32xf32> to vector<1x32xf32>
    %548 = vector.broadcast %547 : vector<1x32xf32> to vector<16x32xf32>
    %549 = arith.addf %546, %548 : vector<16x32xf32>
    %550 = vector.extract_strided_slice %4 {offsets = [6, 0], sizes = [1, 32], strides = [1, 1]} : vector<7x32xf32> to vector<1x32xf32>
    %551 = vector.extract_strided_slice %5 {offsets = [6, 0], sizes = [1, 32], strides = [1, 1]} : vector<7x32xf32> to vector<1x32xf32>
    %cst_173 = arith.constant dense<0.000000e+00> : vector<16xf32>
    %552 = vector.multi_reduction <add>, %549, %cst_173 [1] : vector<16x32xf32> to vector<16xf32>
    %553 = vector.shape_cast %552 : vector<16xf32> to vector<16x1xf32>
    %cst_174 = arith.constant 3.200000e+01 : f32
    %554 = vector.broadcast %cst_174 : f32 to vector<16x1xf32>
    %555 = arith.divf %553, %554 : vector<16x1xf32>
    %556 = vector.broadcast %555 : vector<16x1xf32> to vector<16x32xf32>
    %557 = arith.subf %549, %556 : vector<16x32xf32>
    %558 = arith.mulf %557, %557 : vector<16x32xf32>
    %cst_175 = arith.constant dense<0.000000e+00> : vector<16xf32>
    %559 = vector.multi_reduction <add>, %558, %cst_175 [1] : vector<16x32xf32> to vector<16xf32>
    %560 = vector.shape_cast %559 : vector<16xf32> to vector<16x1xf32>
    %cst_176 = arith.constant 3.100000e+01 : f32
    %561 = vector.broadcast %cst_176 : f32 to vector<16x1xf32>
    %562 = arith.divf %560, %561 : vector<16x1xf32>
    %563 = math.sqrt %562 : vector<16x1xf32>
    %cst_177 = arith.constant 9.99999997E-7 : f32
    %564 = vector.broadcast %cst_177 : f32 to vector<16x1xf32>
    %565 = arith.addf %563, %564 : vector<16x1xf32>
    %566 = tpu.reciprocal %565 : vector<16x1xf32> -> vector<16x1xf32>
    %567 = vector.broadcast %566 : vector<16x1xf32> to vector<16x32xf32>
    %568 = arith.mulf %557, %567 : vector<16x32xf32>
    %569 = vector.broadcast %550 : vector<1x32xf32> to vector<16x32xf32>
    %570 = arith.mulf %569, %568 : vector<16x32xf32>
    %571 = vector.broadcast %551 : vector<1x32xf32> to vector<16x32xf32>
    %572 = arith.addf %570, %571 : vector<16x32xf32>
    %c0_178 = arith.constant 0 : index
    %c0_179 = arith.constant 0 : index
    %573 = vector.load %arg14[%c0_178, %c0_179] : memref<16x32xf32, #tpu.memory_space<vmem>>, vector<16x32xf32>
    tpu.vector_store %arg14[%c0_178, %c0_179], %572 {strides = array<i32>} : memref<16x32xf32, #tpu.memory_space<vmem>>, vector<16x32xf32>,
    return
  }
}

</mosaic_0001>

<bundles_post_ra>
// kernel: decoder_forward.1
= control target key start
LH: loop header
LB: loop body
LE: loop exit
PB: predicated region body
PF: predicated region fallthrough
CT: control target
= control target key end

     0   :  { %19 = vsyncpa [#allocation3], 0  ;;  %s5324_s0 = inlined_call_operand.vmem [shape: f32[16,32], index: 0, kind: input, shape index: {}]   ;;  %s5325_s1 = inlined_call_operand.vmem [shape: f32[16,32], index: 1, kind: input, shape index: {}]   ;;  %s5326_s2 = inlined_call_operand.vmem [shape: f32[16,16], index: 2, kind: input, shape index: {}]   ;;  %s5327_s3 = inlined_call_operand.vmem [shape: f32[16,16], index: 3, kind: input, shape index: {}]   ;;  %s5328_s4 = inlined_call_operand.hbm [shape: f32[7,32], index: 4, kind: input, shape index: {}]   ;;  %s5329_s5 = inlined_call_operand.vmem [shape: f32[7,32], index: 5, kind: input, shape index: {}]   ;;  %s5330_s6 = inlined_call_operand.vmem [shape: f32[4,32,96], index: 6, kind: input, shape index: {}]   ;;  %s5331_s7 = inlined_call_operand.hbm [shape: f32[4,96], index: 7, kind: input, shape index: {}]   ;;  %s5332_s8 = inlined_call_operand.vmem [shape: f32[4,32,32], index: 8, kind: input, shape index: {}]   ;;  %s5333_s9 = inlined_call_operand.hbm [shape: f32[4,32], index: 9, kind: input, shape index: {}]   ;;  %s5334_s10 = inlined_call_operand.vmem [shape: f32[2,32,64], index: 10, kind: input, shape index: {}]   ;;  %s5335_s11 = inlined_call_operand.hbm [shape: f32[2,64], index: 11, kind: input, shape index: {}]   ;;  %s5336_s12 = inlined_call_operand.vmem [shape: f32[2,64,32], index: 12, kind: input, shape index: {}]   ;;  %s5337_s13 = inlined_call_operand.hbm [shape: f32[2,32], index: 13, kind: input, shape index: {}]   ;;  %s5338_s14 = inlined_call_operand.hbm [shape: f32[16,32], index: 14, kind: output, shape index: {}]  }
   0x1   :  { %20 = vsyncpa [#allocation6], 0 }
   0x2   :  { %21 = vsyncpa [#allocation9], 0  ;;  %s51_s15 = sshll.u32 %s5331_s7, 4  ;;  %s52_s15 = int_to_ptr.hbm [resolvable:$true] %s51_s15 }
   0x3   :  { %22 = vsyncpa [#allocation4], 0  ;;  %s4260_s16 = smov [#allocation5]   ;;  %s77_s20 = sshll.u32 %s5335_s11, 4  ;;  %s78_s20 = int_to_ptr.hbm [resolvable:$true] %s77_s20 }
   0x4   :  { %s53_s17 = sshll.u32 %s4260_s16, 4  ;;  %s4261_s21 = smov [#allocation8]   ;;  %s54_s17 = int_to_ptr.vmem [resolvable:$true] %s53_s17 }
   0x5   :  { %56 = dma.hbm_to_vmem [thread:$0]  %s52_s15, 64, %s54_s17, [#allocation6]  }
   0x6   :  { %s79_s22 = sshll.u32 %s4261_s21, 4  ;;  %s36_s25 = sshll.u32 %s5328_s4, 4  ;;  %s80_s22 = int_to_ptr.vmem [resolvable:$true] %s79_s22  ;;  %s37_s25 = int_to_ptr.hbm [resolvable:$true] %s36_s25 }
   0x7   :  { %82 = dma.hbm_to_vmem [thread:$0]  %s78_s20, 32, %s80_s22, [#allocation9]  }
   0x8   :  { %s64_s27 = sshll.u32 %s5333_s9, 4  ;;  %s4262_s28 = smov [#allocation2]   ;;  %s65_s27 = int_to_ptr.hbm [resolvable:$true] %s64_s27 }
   0x9   :  { %s38_s29 = sshll.u32 %s4262_s28, 4  ;;  %s4263_s11 = smov [#allocation7]   ;;  %s39_s29 = int_to_ptr.vmem [resolvable:$true] %s38_s29 }
   0xa   :  { %41 = dma.hbm_to_vmem [thread:$0]  %s37_s25, 128, %s39_s29, [#allocation3]  }
   0xb   :  { %s66_s30 = sshll.u32 %s4263_s11, 4  ;;  %s90_s17 = sshll.u32 %s5337_s13, 4  ;;  %s67_s30 = int_to_ptr.vmem [resolvable:$true] %s66_s30  ;;  %s91_s17 = int_to_ptr.hbm [resolvable:$true] %s90_s17 }
   0xc   :  { %69 = dma.hbm_to_vmem [thread:$0]  %s65_s27, 64, %s67_s30, [#allocation6]  }
   0xd   :  { %s4264_s4 = smov [#allocation10]  }
   0xe   :  { %s92_s18 = sshll.u32 %s4264_s4, 4  ;;  %s93_s18 = int_to_ptr.vmem [resolvable:$true] %s92_s18 }
   0xf   :  { %95 = dma.hbm_to_vmem [thread:$0]  %s91_s17, 32, %s93_s18, [#allocation9]  }
  0x10   :  { %4252 = dma.done.wait [#allocation3], 128  }
  0x11   :  { %4253 = vsyncadd [#allocation3], 4294967168 }
  0x12   :  { %4254 = dma.done.wait [#allocation6], 128  }
  0x13   :  { %4255 = vsyncadd [#allocation6], 4294967168 }
  0x14   :  { %4256 = dma.done.wait [#allocation9], 64  }
  0x15   :  { %4257 = vsyncadd [#allocation9], 4294967232  ;;  %vm130_vm0 = vcmask 261120   ;;  %v4374_v0 = vld [vmem:[%s5324_s0 + $0x8] sm:$0xff]  ;;  %v4381_v2 = vld [vmem:[%s5324_s0] sm:$0xff]  ;;  %v4265_v4 = vmov 32.0  }
  0x16   :  { %v134_v1 = vsel %vm130_vm0, %v4374_v0, 0.0  ;;  %v131_v3 = vsel %vm130_vm0, %v4381_v2, 0.0  ;;  %3904 = vrcp.f32 %v4265_v4  ;;  %v4266_v21 = vmov 31.0   ;;  %v230_v28 = vld [vmem:[%s5330_s6 + $0x18] sm:$0xff]  ;;  %v229_v29 = vld [vmem:[%s5330_s6 + $0x10] sm:$0xff]  ;;  %v228_v31 = vld [vmem:[%s5330_s6 + $0x8] sm:$0xff] }
  0x17   :  { %135 = vadd.xlane.f32.xlu0 %v134_v1  ;;  %3906 = vrcp.f32 %v4266_v21  ;;  %3777 = vmatpush.msra.mxu1 %v230_v28  ;;  %v227_v33 = vld [vmem:[%s5330_s6] sm:$0xff]  ;;  %s4267_s29 = smov 96   ;;  %vm271_vm15 = vcmask 64512   ;;  %s4268_s17 = smov 64  }
  0x18   :  { %250 = vmatpush.msra.mxu0 %v230_v28  ;;  %v4417_v1 = vld [vmem:[#allocation2] sm:$0x7f]  ;;  %s4269_s4 = smov 88   ;;  %s4270_s18 = smov 120  }
  0x19   :  { %3778 = vmatpush.msra.mxu1 %v229_v29  ;;  %s4271_s9 = smov 80   ;;  %s4272_s19 = smov 112  }
  0x1a   :  { %251 = vmatpush.msra.mxu0 %v229_v29  ;;  %v4430_v29 = vld [vmem:[#allocation5] sm:$0xf]  ;;  %s4273_s13 = smov 104   ;;  %s4274_s20 = smov 72  }
  0x1b   :  { %3779 = vmatpush.msra.mxu1 %v228_v31  ;;  %s4275_s22 = smov 56   ;;  %s4276_s23 = smov 48  }
  0x1c   :  { %v3905_v5 = vpop.eup %3904  ;;  %252 = vmatpush.msra.mxu0 %v228_v31  ;;  %s4277_s24 = smov 40   ;;  %s4279_s11 = smov 128  }
  0x1d   :  { %v138_v6 = vmul.f32 32.0, %v3905_v5  ;;  %vm142_vm1 = vweird.f32 %v3905_v5  ;;  %v3907_v22 = vpop.eup %3906  ;;  %3780 = vmatpush.msra.mxu1 %v227_v33  ;;  %s4280_s30 = smov 8  }
  0x1e   :  { %v157_v23 = vmul.f32 31.0, %v3907_v22  ;;  %vm161_vm2 = vweird.f32 %v3907_v22  ;;  %253 = vmatpush.msra.mxu0 %v227_v33 }
  0x1f   :  { %132 = vadd.xlane.f32.xlu0 %v131_v3  ;;  %v139_v7 = vsub.f32 1.0, %v138_v6 }
  0x20   :  { %v158_v24 = vsub.f32 1.0, %v157_v23 }
  0x21   :  { %v140_v8 = vmul.f32 %v3905_v5, %v139_v7 }
  0x22   :  { %v159_v25 = vmul.f32 %v3907_v22, %v158_v24 }
  0x23   :  { %v141_v9 = vadd.f32 %v3905_v5, %v140_v8  ;;  %v221_v8 = vperm.slane %v4417_v1, 0 }
  0x24   :  { %v160_v26 = vadd.f32 %v3907_v22, %v159_v25 }
  0x25   :  { %v4385_v10 = vsel %vm142_vm1, %v3905_v5, %v141_v9  ;;  %v4422_v5 = vld [vmem:[%s5329_s5] sm:$0x7f]  ;;  %vm303_vm1 = vcmask 130048  }
  0x26   :  { %v4401_v27 = vsel %vm161_vm2, %v3907_v22, %v160_v26 }
  0x8a   :  { %v136_v11 = vpop.xlane.xlu0 %135 }
  0x8b   :  { %v145_v12 = vmul.f32 %v4385_v10, %v136_v11 }
  0x8d   :  { %v4389_v13 = vsub.f32 %v4374_v0, %v145_v12 }
  0x8f   :  { %v149_v14 = vmul.f32 %v4389_v13, %v4389_v13 }
  0x91   :  { %v153_v15 = vsel %vm130_vm0, %v149_v14, 0.0  ;;  %v224_v14 = vperm.slane %v4422_v5, 0 }
  0x92   :  { %154 = vadd.xlane.f32.xlu1 %v153_v15  ;;  %v133_v16 = vpop.xlane.xlu0 %132 }
  0x93   :  { %v144_v17 = vmul.f32 %v4385_v10, %v133_v16 }
  0x95   :  { %v4396_v18 = vsub.f32 %v4381_v2, %v144_v17 }
  0x97   :  { %v148_v19 = vmul.f32 %v4396_v18, %v4396_v18 }
  0x99   :  { %v150_v20 = vsel %vm130_vm0, %v148_v19, 0.0 }
  0x9a   :  { %151 = vadd.xlane.f32.xlu1 %v150_v20 }
 0x105   :  { %v155_v30 = vpop.xlane.xlu1 %154 }
 0x106   :  { %v164_v32 = vmul.f32 %v4401_v27, %v155_v30  ;;  %v231_v30 = vperm.slane %v4430_v29, 0 }
 0x108   :  { %3908 = vrsqrt.f32 %v164_v32  ;;  %vm184_vm3 = vcmp.eq.f32.partialorder %v164_v32, inf  ;;  %v187_v46 = vand.u32 2147483648, %v164_v32  ;;  %vm186_vm4 = vcmp.eq.f32.partialorder %v164_v32, 0.0 }
 0x10d   :  { %v152_v34 = vpop.xlane.xlu1 %151 }
 0x10e   :  { %v3909_v35 = vpop.eup %3908  ;;  %v163_v36 = vmul.f32 %v4401_v27, %v152_v34 }
 0x10f   :  { %v178_v37 = vmul.f32 %v3909_v35, %v164_v32 }
 0x110   :  { %3910 = vrsqrt.f32 %v163_v36  ;;  %vm172_vm5 = vcmp.eq.f32.partialorder %v163_v36, inf  ;;  %v175_v54 = vand.u32 2147483648, %v163_v36  ;;  %vm174_vm6 = vcmp.eq.f32.partialorder %v163_v36, 0.0 }
 0x111   :  { %v179_v38 = vmul.f32 %v3909_v35, %v178_v37 }
 0x113   :  { %v180_v39 = vmul.f32 0.5, %v179_v38 }
 0x115   :  { %v181_v40 = vsub.f32 1.5, %v180_v39 }
 0x116   :  { %v3911_v41 = vpop.eup %3910 }
 0x117   :  { %v182_v42 = vmul.f32 %v3909_v35, %v181_v40  ;;  %v166_v43 = vmul.f32 %v3911_v41, %v163_v36  ;;  %v4449_v40 = vld [vmem:[%s5326_s2 + $0x8] sm:$0xff] }
 0x119   :  { %v183_v44 = vmul.f32 %v182_v42, %v164_v32  ;;  %v167_v45 = vmul.f32 %v3911_v41, %v166_v43 }
 0x11b   :  { %v185_v47 = vsel %vm184_vm3, %v164_v32, %v183_v44  ;;  %v168_v48 = vmul.f32 0.5, %v167_v45 }
 0x11c   :  { %v188_v49 = vsel %vm186_vm4, %v187_v46, %v185_v47 }
 0x11d   :  { %v169_v50 = vsub.f32 1.5, %v168_v48  ;;  %v190_v51 = vadd.f32 1e-06, %v188_v49 }
 0x11f   :  { %v170_v52 = vmul.f32 %v3911_v41, %v169_v50  ;;  %3912 = vrcp.f32 %v190_v51  ;;  %v216_v61 = vand.u32 2147483648, %v190_v51  ;;  %v214_v63 = vand.u32 2147483647, %v190_v51 }
 0x120   :  { %vm210_vm8 = vweird.f32 %v190_v51 }
 0x121   :  { %v171_v53 = vmul.f32 %v170_v52, %v163_v36  ;;  %v217_v6 = vor.u32 1.1754944e-38, %v216_v61  ;;  %vm215_vm10 = vcmp.eq.f32.partialorder %v214_v63, 8.507059e+37 }
 0x123   :  { %v173_v55 = vsel %vm172_vm5, %v163_v36, %v171_v53  ;;  %v4442_v36 = vld [vmem:[%s5326_s2] sm:$0xff] }
 0x124   :  { %v176_v56 = vsel %vm174_vm6, %v175_v54, %v173_v55 }
 0x125   :  { %v3913_v57 = vpop.eup %3912  ;;  %v189_v58 = vadd.f32 1e-06, %v176_v56 }
 0x126   :  { %v206_v59 = vmul.f32 %v3913_v57, %v190_v51  ;;  %vm211_vm7 = vweird.f32 %v3913_v57 }
 0x127   :  { %3914 = vrcp.f32 %v189_v58  ;;  %vm212_vm9 = vmor %vm210_vm8, %vm211_vm7  ;;  %v202_v16 = vand.u32 2147483648, %v189_v58  ;;  %v200_v20 = vand.u32 2147483647, %v189_v58  ;;  %vm196_vm12 = vweird.f32 %v189_v58 }
 0x128   :  { %v207_v60 = vsub.f32 1.0, %v206_v59  ;;  %v261_v59 = vld [vmem:[%s5332_s8] sm:$0xff] }
 0x129   :  { %v203_v23 = vor.u32 1.1754944e-38, %v202_v16  ;;  %vm201_vm14 = vcmp.eq.f32.partialorder %v200_v20, 8.507059e+37 }
 0x12a   :  { %v208_v62 = vmul.f32 %v3913_v57, %v207_v60 }
 0x12c   :  { %v209_v3 = vadd.f32 %v3913_v57, %v208_v62 }
 0x12d   :  { %v3915_v4 = vpop.eup %3914 }
 0x12e   :  { %v213_v7 = vsel %vm212_vm9, %v3913_v57, %v209_v3  ;;  %v192_v9 = vmul.f32 %v3915_v4, %v189_v58  ;;  %vm197_vm11 = vweird.f32 %v3915_v4 }
 0x12f   :  { %v218_v11 = vsel %vm215_vm10, %v217_v6, %v213_v7  ;;  %vm198_vm13 = vmor %vm196_vm12, %vm197_vm11 }
 0x130   :  { %v220_v12 = vmul.f32 %v218_v11, %v4389_v13  ;;  %v193_v15 = vsub.f32 1.0, %v192_v9 }
 0x132   :  { %v223_v17 = vmul.f32 %v221_v8, %v220_v12  ;;  %v194_v19 = vmul.f32 %v3915_v4, %v193_v15 }
 0x134   :  { %v226_v21 = vadd.f32 %v224_v14, %v223_v17  ;;  %v195_v22 = vadd.f32 %v3915_v4, %v194_v19 }
 0x136   :  { %3594 = vmatmul.msk.f32.vlgmr.msra.gmra.mxu1 %vm130_vm0, %v226_v21  ;;  %v199_v24 = vsel %vm198_vm13, %v3915_v4, %v195_v22 }
 0x137   :  { %v204_v25 = vsel %vm201_vm14, %v203_v23, %v199_v24 }
 0x138   :  { %v219_v13 = vmul.f32 %v204_v25, %v4396_v18 }
 0x13a   :  { %v222_v26 = vmul.f32 %v221_v8, %v219_v13 }
 0x13c   :  { %v225_v28 = vadd.f32 %v224_v14, %v222_v26 }
 0x13e   :  { %3593 = vmatmul.msk.f32.vlgmr.msra.gmra.mxu0 %vm130_vm0, %v225_v28 }
 0x1b3   :  { %v258_v31 = vpop.f32.mrf.mxu1 }
 0x1b4   :  { %v259_v32 = vadd.f32 %v258_v31, %v231_v30 }
 0x1b6   :  { %269 = vrot.lane.b32.xlu2 %v259_v32, %s4267_s29 }
 0x1bb   :  { %v255_v33 = vpop.f32.mrf.mxu0 }
 0x1bc   :  { %v256_v34 = vadd.f32 %v255_v33, %v231_v30 }
 0x1be   :  { %267 = vrot.lane.b32.xlu2 %v256_v34, %s4267_s29  ;;  %v4453_v44 = vpack.i.bf16 %v256_v34, %v259_v32 }
 0x210   :  { %v270_v35 = vpop.permute.xlu2 %269 }
 0x211   :  { %3595 = vmatpush.xpose.msk.msrb.mxu1 %vm271_vm15, %v270_v35 }
 0x218   :  { %v268_v18 = vpop.permute.xlu2 %267 }
 0x219   :  { %3596 = vmatpush.xpose.msk.msrb.mxu1 %vm271_vm15, %v268_v18 }
 0x21c   :  { %3597 = vmatmul.msk.f32.vlgmr.msrb.gmra.mxu1 %vm271_vm15, %v256_v34 }
 0x21d   :  { %559 = vmatpush.msra.mxu1 %v261_v59 }
 0x224   :  { %3598 = vmatmul.msk.f32.gmra.mxu1 %vm271_vm15, %v259_v32 }
 0x299   :  { %v297_v37 = vpop.f32.mrf.mxu1 }
 0x29a   :  { %v298_v38 = vadd.f32 %v297_v37, %v4442_v36 }
 0x29c   :  { %v304_v39 = vsel %vm303_vm1, %v298_v38, -inf }
 0x29d   :  { %305 = vmax.xlane.f32.xlu0 %v304_v39 }
 0x2a1   :  { %v300_v41 = vpop.f32.mrf.mxu1 }
 0x2a2   :  { %v301_v42 = vadd.f32 %v300_v41, %v4449_v40 }
 0x2a4   :  { %v307_v43 = vsel %vm303_vm1, %v301_v42, -inf }
 0x2a5   :  { %308 = vmax.xlane.f32.xlu1 %v307_v43 }
 0x2be   :  { %3805 = vrot.lane.b32.xlu1 %v4453_v44, %s4268_s17 }
 0x2c6   :  { %391 = vrot.lane.b32.xlu1 %v256_v34, %s4269_s4 }
 0x2ce   :  { %389 = vrot.lane.b32.xlu1 %v259_v32, %s4270_s18 }
 0x2d6   :  { %571 = vrot.lane.b32.xlu1 %v256_v34, %s4271_s9 }
 0x2de   :  { %567 = vrot.lane.b32.xlu1 %v256_v34, %s4272_s19 }
 0x2e6   :  { %569 = vrot.lane.b32.xlu1 %v259_v32, %s4272_s19 }
 0x310   :  { %v306_v45 = vpop.xlane.xlu0 %305 }
 0x311   :  { %v310_v46 = vsub.f32 %v298_v38, %v306_v45 }
 0x313   :  { %v312_v47 = vmul.f32 1.442695, %v310_v46 }
 0x315   :  { %3916 = vpow2.f32 %v312_v47 }
 0x318   :  { %v309_v48 = vpop.xlane.xlu1 %308 }
 0x319   :  { %v311_v49 = vsub.f32 %v301_v42, %v309_v48 }
 0x31b   :  { %v3917_v50 = vpop.eup %3916  ;;  %v314_v51 = vmul.f32 1.442695, %v311_v49 }
 0x31c   :  { %v316_v52 = vsel %vm303_vm1, %v3917_v50, 0.0 }
 0x31d   :  { %3918 = vpow2.f32 %v314_v51  ;;  %317 = vadd.xlane.f32.xlu2 %v316_v52 }
 0x323   :  { %v3919_v53 = vpop.eup %3918 }
 0x324   :  { %v319_v54 = vsel %vm303_vm1, %v3919_v53, 0.0 }
 0x325   :  { %320 = vadd.xlane.f32.xlu0 %v319_v54 }
 0x330   :  { %v3806_v55 = vpop.permute.xlu1 %3805 }
 0x331   :  { %v3807_v56 = vunpack.i.l.bf16 %v3806_v55  ;;  %v3808_v57 = vunpack.i.h.bf16 %v3806_v55 }
 0x333   :  { %378 = vmatpush.msra.mxu2 %v3807_v56  ;;  %3781 = vmatpush.msra.mxu3 %v3807_v56 }
 0x335   :  { %379 = vmatpush.msra.mxu2 %v3808_v57  ;;  %3782 = vmatpush.msra.mxu3 %v3808_v57 }
 0x336   :  { %573 = vrot.lane.b32.xlu2 %v259_v32, %s4271_s9 }
 0x338   :  { %v392_v14 = vpop.permute.xlu1 %391 }
 0x339   :  { %393 = vrot.lane.b32.xlu0 %v259_v32, %s4269_s4 }
 0x33e   :  { %722 = vrot.lane.b32.xlu2 %v259_v32, %s4273_s13 }
 0x340   :  { %v390_v26 = vpop.permute.xlu1 %389 }
 0x341   :  { %387 = vrot.lane.b32.xlu0 %v256_v34, %s4270_s18 }
 0x349   :  { %726 = vrot.lane.b32.xlu0 %v259_v32, %s4274_s20  ;;  %v572_v32 = vpop.permute.xlu1 %571 }
 0x351   :  { %724 = vrot.lane.b32.xlu0 %v256_v34, %s4274_s20 }
 0x359   :  { %720 = vrot.lane.b32.xlu0 %v256_v34, %s4273_s13  ;;  %v568_v34 = vpop.permute.xlu1 %567 }
 0x361   :  { %v570_v18 = vpop.permute.xlu1 %569 }
 0x390   :  { %v318_v58 = vpop.xlane.xlu2 %317 }
 0x391   :  { %3920 = vrcp.f32 %v318_v58  ;;  %v333_v3 = vand.u32 2147483648, %v318_v58  ;;  %v331_v6 = vand.u32 2147483647, %v318_v58  ;;  %vm327_vm3 = vweird.f32 %v318_v58 }
 0x393   :  { %v334_v9 = vor.u32 1.1754944e-38, %v333_v3  ;;  %vm332_vm5 = vcmp.eq.f32.partialorder %v331_v6, 8.507059e+37 }
 0x397   :  { %v3921_v60 = vpop.eup %3920 }
 0x398   :  { %v323_v61 = vmul.f32 %v3921_v60, %v318_v58  ;;  %v321_v62 = vpop.xlane.xlu0 %320  ;;  %vm328_vm2 = vweird.f32 %v3921_v60  ;;  %v574_v30 = vpop.permute.xlu2 %573 }
 0x399   :  { %3922 = vrcp.f32 %v321_v62  ;;  %vm329_vm4 = vmor %vm327_vm3, %vm328_vm2  ;;  %v347_v19 = vand.u32 2147483648, %v321_v62  ;;  %v345_v21 = vand.u32 2147483647, %v321_v62  ;;  %vm341_vm7 = vweird.f32 %v321_v62 }
 0x39a   :  { %v324_v63 = vsub.f32 1.0, %v323_v61 }
 0x39b   :  { %v348_v23 = vor.u32 1.1754944e-38, %v347_v19  ;;  %vm346_vm9 = vcmp.eq.f32.partialorder %v345_v21, 8.507059e+37 }
 0x39c   :  { %v325_v4 = vmul.f32 %v3921_v60, %v324_v63 }
 0x39e   :  { %v326_v7 = vadd.f32 %v3921_v60, %v325_v4 }
 0x39f   :  { %v3923_v8 = vpop.eup %3922 }
 0x3a0   :  { %v337_v11 = vmul.f32 %v3923_v8, %v321_v62  ;;  %v330_v12 = vsel %vm329_vm4, %v3921_v60, %v326_v7  ;;  %vm342_vm6 = vweird.f32 %v3923_v8  ;;  %v723_v45 = vpop.permute.xlu2 %722 }
 0x3a1   :  { %v335_v15 = vsel %vm332_vm5, %v334_v9, %v330_v12  ;;  %vm343_vm8 = vmor %vm341_vm7, %vm342_vm6 }
 0x3a2   :  { %v338_v16 = vsub.f32 1.0, %v337_v11  ;;  %v350_v17 = vmul.f32 %v3917_v50, %v335_v15 }
 0x3a4   :  { %3599 = vmatmul.msk.f32.vlgmr.msra.gmra.mxu2 %vm303_vm1, %v350_v17  ;;  %v339_v20 = vmul.f32 %v3923_v8, %v338_v16 }
 0x3a6   :  { %v340_v22 = vadd.f32 %v3923_v8, %v339_v20 }
 0x3a8   :  { %v344_v24 = vsel %vm343_vm8, %v3923_v8, %v340_v22 }
 0x3a9   :  { %v349_v25 = vsel %vm346_vm9, %v348_v23, %v344_v24 }
 0x3aa   :  { %v351_v13 = vmul.f32 %v3919_v53, %v349_v25 }
 0x3ab   :  { %v394_v28 = vpop.permute.xlu0 %393 }
 0x3ac   :  { %3600 = vmatmul.msk.f32.vlgmr.msra.gmra.mxu3 %vm303_vm1, %v351_v13 }
 0x3ad   :  { %3601 = vmatpush.xpose.msk.msrb.mxu3 %vm271_vm15, %v394_v28 }
 0x3b1   :  { %3602 = vmatpush.xpose.msk.msrb.mxu3 %vm271_vm15, %v392_v14 }
 0x3b3   :  { %v388_v31 = vpop.permute.xlu0 %387 }
 0x3b4   :  { %3603 = vmatmul.msk.f32.vlgmr.msrb.gmra.mxu3 %vm271_vm15, %v388_v31 }
 0x3b5   :  { %3611 = vmatpush.xpose.msk.msra.mxu3 %vm271_vm15, %v574_v30 }
 0x3b9   :  { %3612 = vmatpush.xpose.msk.msra.mxu3 %vm271_vm15, %v572_v32 }
 0x3bb   :  { %v727_v33 = vpop.permute.xlu0 %726 }
 0x3bc   :  { %3604 = vmatmul.msk.f32.gmra.mxu3 %vm271_vm15, %v390_v26  ;;  %3619 = vmatpush.xpose.msk.msrb.mxu1 %vm271_vm15, %v727_v33 }
 0x3c3   :  { %v725_v35 = vpop.permute.xlu0 %724 }
 0x3c4   :  { %3613 = vmatmul.msk.f32.vlgmr.msra.gmra.mxu3 %vm271_vm15, %v568_v34  ;;  %3620 = vmatpush.xpose.msk.msrb.mxu1 %vm271_vm15, %v725_v35 }
 0x3cb   :  { %v721_v39 = vpop.permute.xlu0 %720 }
 0x3cc   :  { %3614 = vmatmul.msk.f32.gmra.mxu3 %vm271_vm15, %v570_v18 }
 0x427   :  { %v381_v37 = vpop.f32.mrf.mxu2 }
 0x428   :  { %3609 = vmatmul.msk.f32.vlgmr.msra.gmra.mxu1 %vm271_vm15, %v381_v37 }
 0x42f   :  { %v384_v38 = vpop.f32.mrf.mxu3 }
 0x430   :  { %3610 = vmatmul.msk.f32.gmra.mxu1 %vm271_vm15, %v384_v38 }
 0x437   :  { %v420_v41 = vpop.f32.mrf.mxu3 }
 0x438   :  { %v421_v42 = vadd.f32 %v420_v41, %v4442_v36  ;;  %3621 = vmatmul.msk.f32.vlgmr.msrb.gmra.mxu1 %vm271_vm15, %v721_v39 }
 0x43a   :  { %v426_v43 = vsel %vm303_vm1, %v421_v42, -inf }
 0x43b   :  { %427 = vmax.xlane.f32.xlu0 %v426_v43 }
 0x43f   :  { %v423_v46 = vpop.f32.mrf.mxu3 }
 0x440   :  { %v424_v47 = vadd.f32 %v423_v46, %v4449_v40  ;;  %3622 = vmatmul.msk.f32.gmra.mxu1 %vm271_vm15, %v723_v45 }
 0x442   :  { %v429_v48 = vsel %vm303_vm1, %v424_v47, -inf }
 0x443   :  { %430 = vmax.xlane.f32.xlu1 %v429_v48 }
 0x447   :  { %v600_v49 = vpop.f32.mrf.mxu3 }
 0x448   :  { %v601_v50 = vadd.f32 %v600_v49, %v4442_v36 }
 0x44a   :  { %v606_v51 = vsel %vm303_vm1, %v601_v50, -inf }
 0x44b   :  { %607 = vmax.xlane.f32.xlu0 %v606_v51 }
 0x44f   :  { %v603_v52 = vpop.f32.mrf.mxu3 }
 0x450   :  { %v604_v53 = vadd.f32 %v603_v52, %v4449_v40 }
 0x452   :  { %v609_v54 = vsel %vm303_vm1, %v604_v53, -inf }
 0x453   :  { %610 = vmax.xlane.f32.xlu1 %v609_v54 }
 0x4a5   :  { %v4498_v55 = vpop.f32.mrf.mxu1 }
 0x4ad   :  { %v4500_v56 = vpop.f32.mrf.mxu1 }
 0x4ae   :  { %v428_v57 = vpop.xlane.xlu0 %427 }
 0x4af   :  { %v432_v58 = vsub.f32 %v421_v42, %v428_v57 }
 0x4b1   :  { %v434_v59 = vmul.f32 1.442695, %v432_v58 }
 0x4b3   :  { %3924 = vpow2.f32 %v434_v59 }
 0x4b5   :  { %v753_v60 = vpop.f32.mrf.mxu1 }
 0x4b6   :  { %v754_v61 = vadd.f32 %v753_v60, %v4442_v36  ;;  %v431_v62 = vpop.xlane.xlu1 %430 }
 0x4b7   :  { %v433_v63 = vsub.f32 %v424_v47, %v431_v62 }
 0x4b8   :  { %v759_v3 = vsel %vm303_vm1, %v754_v61, -inf }
 0x4b9   :  { %v4504_v4 = vpop.eup %3924  ;;  %760 = vmax.xlane.f32.xlu2 %v759_v3  ;;  %v436_v7 = vmul.f32 1.442695, %v433_v63 }
 0x4ba   :  { %v438_v6 = vsel %vm303_vm1, %v4504_v4, 0.0 }
 0x4bb   :  { %439 = vadd.xlane.f32.xlu0 %v438_v6  ;;  %3926 = vpow2.f32 %v436_v7 }
 0x4bd   :  { %v756_v8 = vpop.f32.mrf.mxu1 }
 0x4be   :  { %v757_v9 = vadd.f32 %v756_v8, %v4449_v40  ;;  %v608_v11 = vpop.xlane.xlu0 %607 }
 0x4bf   :  { %v612_v12 = vsub.f32 %v601_v50, %v608_v11 }
 0x4c0   :  { %v762_v36 = vsel %vm303_vm1, %v757_v9, -inf }
 0x4c1   :  { %v614_v14 = vmul.f32 1.442695, %v612_v12  ;;  %763 = vmax.xlane.f32.xlu2 %v762_v36  ;;  %v4510_v15 = vpop.eup %3926 }
 0x4c2   :  { %v441_v19 = vsel %vm303_vm1, %v4510_v15, 0.0 }
 0x4c3   :  { %3928 = vpow2.f32 %v614_v14 }
 0x4c6   :  { %v611_v16 = vpop.xlane.xlu1 %610 }
 0x4c7   :  { %v613_v17 = vsub.f32 %v604_v53, %v611_v16 }
 0x4c9   :  { %v4514_v20 = vpop.eup %3928  ;;  %v616_v21 = vmul.f32 1.442695, %v613_v17  ;;  %442 = vadd.xlane.f32.xlu2 %v441_v19 }
 0x4ca   :  { %v618_v40 = vsel %vm303_vm1, %v4514_v20, 0.0 }
 0x4cb   :  { %3930 = vpow2.f32 %v616_v21  ;;  %619 = vadd.xlane.f32.xlu0 %v618_v40 }
 0x4d1   :  { %v4518_v22 = vpop.eup %3930 }
 0x4d2   :  { %v621_v23 = vsel %vm303_vm1, %v4518_v22, 0.0 }
 0x4d3   :  { %622 = vadd.xlane.f32.xlu0 %v621_v23 }
 0x4e1   :  { %3810 = vrot.lane.b32.xlu2 %v4453_v44, %s4275_s22 }
 0x4e7   :  { %3820 = vrot.lane.b32.xlu0 %v4453_v44, %s4276_s23 }
 0x52c   :  { %v761_v24 = vpop.xlane.xlu2 %760 }
 0x52d   :  { %v765_v25 = vsub.f32 %v754_v61, %v761_v24 }
 0x52e   :  { %v440_v13 = vpop.xlane.xlu0 %439 }
 0x52f   :  { %v767_v26 = vmul.f32 1.442695, %v765_v25  ;;  %3932 = vrcp.f32 %v440_v13  ;;  %v455_v43 = vand.u32 2147483648, %v440_v13  ;;  %vm449_vm11 = vweird.f32 %v440_v13 }
 0x530   :  { %v453_v45 = vand.u32 2147483647, %v440_v13 }
 0x531   :  { %3934 = vpow2.f32 %v767_v26  ;;  %v456_v49 = vor.u32 1.1754944e-38, %v455_v43 }
 0x532   :  { %vm454_vm13 = vcmp.eq.f32.partialorder %v453_v45, 8.507059e+37 }
 0x534   :  { %v764_v28 = vpop.xlane.xlu2 %763 }
 0x535   :  { %v3933_v30 = vpop.eup %3932  ;;  %v766_v31 = vsub.f32 %v757_v9, %v764_v28 }
 0x536   :  { %v445_v32 = vmul.f32 %v3933_v30, %v440_v13  ;;  %vm450_vm10 = vweird.f32 %v3933_v30 }
 0x537   :  { %v4526_v33 = vpop.eup %3934  ;;  %v769_v34 = vmul.f32 1.442695, %v766_v31  ;;  %vm451_vm12 = vmor %vm449_vm11, %vm450_vm10 }
 0x538   :  { %v446_v35 = vsub.f32 1.0, %v445_v32  ;;  %v771_v18 = vsel %vm303_vm1, %v4526_v33, 0.0 }
 0x539   :  { %3936 = vpow2.f32 %v769_v34  ;;  %772 = vadd.xlane.f32.xlu1 %v771_v18 }
 0x53a   :  { %v447_v37 = vmul.f32 %v3933_v30, %v446_v35 }
 0x53c   :  { %v443_v38 = vpop.xlane.xlu2 %442  ;;  %v448_v39 = vadd.f32 %v3933_v30, %v447_v37 }
 0x53d   :  { %3938 = vrcp.f32 %v443_v38  ;;  %v469_v59 = vand.u32 2147483648, %v443_v38  ;;  %v467_v3 = vand.u32 2147483647, %v443_v38  ;;  %vm463_vm2 = vweird.f32 %v443_v38 }
 0x53e   :  { %v620_v41 = vpop.xlane.xlu0 %619  ;;  %v452_v47 = vsel %vm451_vm12, %v3933_v30, %v448_v39 }
 0x53f   :  { %v4530_v42 = vpop.eup %3936  ;;  %3940 = vrcp.f32 %v620_v41  ;;  %v457_v54 = vsel %vm454_vm13, %v456_v49, %v452_v47  ;;  %v470_v7 = vor.u32 1.1754944e-38, %v469_v59  ;;  %vm468_vm4 = vcmp.eq.f32.partialorder %v467_v3, 8.507059e+37 }
 0x540   :  { %v774_v46 = vsel %vm303_vm1, %v4530_v42, 0.0  ;;  %v472_v63 = vmul.f32 %v4504_v4, %v457_v54  ;;  %v635_v19 = vand.u32 2147483648, %v620_v41  ;;  %vm629_vm6 = vweird.f32 %v620_v41 }
 0x541   :  { %775 = vadd.xlane.f32.xlu1 %v774_v46  ;;  %v633_v21 = vand.u32 2147483647, %v620_v41 }
 0x542   :  { %v636_v24 = vor.u32 1.1754944e-38, %v635_v19 }
 0x543   :  { %v3939_v48 = vpop.eup %3938  ;;  %vm634_vm8 = vcmp.eq.f32.partialorder %v633_v21, 8.507059e+37  ;;  %v4563_v21 = vld [vmem:[#allocation7] sm:$0xf] }
 0x544   :  { %v459_v50 = vmul.f32 %v3939_v48, %v443_v38  ;;  %v3811_v51 = vpop.permute.xlu2 %3810  ;;  %vm464_vm14 = vweird.f32 %v3939_v48  ;;  %v262_v38 = vld [vmem:[%s5332_s8 + $0x8] sm:$0xff] }
 0x545   :  { %v3941_v52 = vpop.eup %3940  ;;  %v3812_v53 = vunpack.i.l.bf16 %v3811_v51  ;;  %v3813_v61 = vunpack.i.h.bf16 %v3811_v51  ;;  %vm465_vm3 = vmor %vm463_vm2, %vm464_vm14  ;;  %530 = vmatpush.msrb.mxu0 %v262_v38  ;;  %v3630_v38 = vld [vmem:[%s5330_s6 + $0x38] sm:$0xff] }
 0x546   :  { %v460_v57 = vsub.f32 1.0, %v459_v50  ;;  %v623_v58 = vpop.xlane.xlu0 %622  ;;  %v625_v60 = vmul.f32 %v3941_v52, %v620_v41  ;;  %vm630_vm5 = vweird.f32 %v3941_v52 }
 0x547   :  { %3942 = vrcp.f32 %v623_v58  ;;  %500 = vmatpush.msrb.mxu2 %v3812_v53  ;;  %vm631_vm7 = vmor %vm629_vm6, %vm630_vm5  ;;  %v649_v28 = vand.u32 2147483648, %v623_v58  ;;  %vm643_vm10 = vweird.f32 %v623_v58  ;;  %v647_v32 = vand.u32 2147483647, %v623_v58 }
 0x548   :  { %v461_v62 = vmul.f32 %v3939_v48, %v460_v57  ;;  %v626_v8 = vsub.f32 1.0, %v625_v60 }
 0x549   :  { %501 = vmatpush.msrb.mxu2 %v3813_v61  ;;  %v650_v35 = vor.u32 1.1754944e-38, %v649_v28  ;;  %vm648_vm12 = vcmp.eq.f32.partialorder %v647_v32, 8.507059e+37 }
 0x54a   :  { %3605 = vmatmul.msk.f32.vlgmr.msrb.gmra.mxu2 %vm303_vm1, %v472_v63  ;;  %v462_v6 = vadd.f32 %v3939_v48, %v461_v62  ;;  %v627_v36 = vmul.f32 %v3941_v52, %v626_v8 }
 0x54c   :  { %v466_v9 = vsel %vm465_vm3, %v3939_v48, %v462_v6  ;;  %v628_v4 = vadd.f32 %v3941_v52, %v627_v36 }
 0x54d   :  { %v3943_v11 = vpop.eup %3942  ;;  %v471_v12 = vsel %vm468_vm4, %v470_v7, %v466_v9 }
 0x54e   :  { %v639_v14 = vmul.f32 %v3943_v11, %v623_v58  ;;  %v473_v16 = vmul.f32 %v4510_v15, %v471_v12  ;;  %v632_v40 = vsel %vm631_vm7, %v3941_v52, %v628_v4  ;;  %vm644_vm9 = vweird.f32 %v3943_v11 }
 0x54f   :  { %v637_v13 = vsel %vm634_vm8, %v636_v24, %v632_v40  ;;  %vm645_vm11 = vmor %vm643_vm10, %vm644_vm9  ;;  %v873_v24 = vperm.slane %v4563_v21, 0 }
 0x550   :  { %v640_v17 = vsub.f32 1.0, %v639_v14  ;;  %v652_v31 = vmul.f32 %v4514_v20, %v637_v13  ;;  %v264_v14 = vld [vmem:[%s5332_s8 + $0x18] sm:$0xff] }
 0x552   :  { %3606 = vmatmul.msk.f32.gmra.mxu2 %vm303_vm1, %v473_v16  ;;  %v641_v23 = vmul.f32 %v3943_v11, %v640_v17 }
 0x554   :  { %v642_v15 = vadd.f32 %v3943_v11, %v641_v23 }
 0x556   :  { %v646_v34 = vsel %vm645_vm11, %v3943_v11, %v642_v15 }
 0x557   :  { %v651_v18 = vsel %vm648_vm12, %v650_v35, %v646_v34 }
 0x558   :  { %v653_v37 = vmul.f32 %v4518_v22, %v651_v18  ;;  %v263_v22 = vld [vmem:[%s5332_s8 + $0x10] sm:$0xff] }
 0x559   :  { %v3821_v25 = vpop.permute.xlu0 %3820  ;;  %710 = vmatpush.msra.mxu0 %v263_v22 }
 0x55a   :  { %v3822_v26 = vunpack.i.l.bf16 %v3821_v25  ;;  %3815 = vrot.lane.b32.xlu1 %v4453_v44, %s4277_s24  ;;  %v3823_v30 = vunpack.i.h.bf16 %v3821_v25 }
 0x55c   :  { %680 = vmatpush.msra.mxu2 %v3822_v26 }
 0x55e   :  { %681 = vmatpush.msra.mxu2 %v3823_v30 }
 0x55f   :  { %3615 = vmatmul.msk.f32.vlgmr.msra.gmra.mxu2 %vm303_vm1, %v652_v31 }
 0x560   :  { %863 = vmatpush.msrb.mxu2 %v264_v14 }
 0x567   :  { %3616 = vmatmul.msk.f32.gmra.mxu2 %vm303_vm1, %v653_v37 }
 0x5ac   :  { %v773_v44 = vpop.xlane.xlu1 %772 }
 0x5ad   :  { %3944 = vrcp.f32 %v773_v44  ;;  %v788_v50 = vand.u32 2147483648, %v773_v44  ;;  %vm782_vm14 = vweird.f32 %v773_v44  ;;  %v786_v51 = vand.u32 2147483647, %v773_v44 }
 0x5af   :  { %v789_v54 = vor.u32 1.1754944e-38, %v788_v50  ;;  %vm787_vm3 = vcmp.eq.f32.partialorder %v786_v51, 8.507059e+37 }
 0x5b3   :  { %v3945_v39 = vpop.eup %3944 }
 0x5b4   :  { %v776_v20 = vpop.xlane.xlu1 %775  ;;  %v778_v41 = vmul.f32 %v3945_v39, %v773_v44  ;;  %vm783_vm13 = vweird.f32 %v3945_v39 }
 0x5b5   :  { %3946 = vrcp.f32 %v776_v20  ;;  %vm784_vm2 = vmor %vm782_vm14, %vm783_vm13  ;;  %v802_v62 = vand.u32 2147483648, %v776_v20  ;;  %vm796_vm5 = vweird.f32 %v776_v20  ;;  %v800_v6 = vand.u32 2147483647, %v776_v20 }
 0x5b6   :  { %v779_v43 = vsub.f32 1.0, %v778_v41 }
 0x5b7   :  { %v803_v8 = vor.u32 1.1754944e-38, %v802_v62  ;;  %vm801_vm7 = vcmp.eq.f32.partialorder %v800_v6, 8.507059e+37 }
 0x5b8   :  { %v780_v46 = vmul.f32 %v3945_v39, %v779_v43 }
 0x5ba   :  { %v781_v48 = vadd.f32 %v3945_v39, %v780_v46 }
 0x5bb   :  { %v3947_v45 = vpop.eup %3946 }
 0x5bc   :  { %v792_v47 = vmul.f32 %v3947_v45, %v776_v20  ;;  %v785_v52 = vsel %vm784_vm2, %v3945_v39, %v781_v48  ;;  %vm797_vm4 = vweird.f32 %v3947_v45 }
 0x5bd   :  { %v790_v58 = vsel %vm787_vm3, %v789_v54, %v785_v52  ;;  %vm798_vm6 = vmor %vm796_vm5, %vm797_vm4 }
 0x5be   :  { %v793_v49 = vsub.f32 1.0, %v792_v47  ;;  %v805_v3 = vmul.f32 %v4526_v33, %v790_v58 }
 0x5c0   :  { %v794_v53 = vmul.f32 %v3947_v45, %v793_v49 }
 0x5c2   :  { %v795_v61 = vadd.f32 %v3947_v45, %v794_v53  ;;  %v4608_v53 = vperm.slane %v4430_v29, 1 }
 0x5c4   :  { %v799_v7 = vsel %vm798_vm6, %v3947_v45, %v795_v61 }
 0x5c5   :  { %v804_v11 = vsel %vm801_vm7, %v803_v8, %v799_v7 }
 0x5c6   :  { %v806_v12 = vmul.f32 %v4530_v42, %v804_v11 }
 0x5cc   :  { %v3816_v57 = vpop.permute.xlu1 %3815 }
 0x5cd   :  { %v3817_v59 = vunpack.i.l.bf16 %v3816_v57  ;;  %v503_v60 = vpop.f32.mrf.mxu2  ;;  %v3818_v63 = vunpack.i.h.bf16 %v3816_v57 }
 0x5ce   :  { %3607 = vmatmul.msk.f32.vlgmr.msrb.gmra.mxu0 %vm271_vm15, %v503_v60 }
 0x5cf   :  { %833 = vmatpush.msrb.mxu3 %v3817_v59  ;;  %984 = vmatpush.msrb.mxu0 %v3630_v38 }
 0x5d1   :  { %834 = vmatpush.msrb.mxu3 %v3818_v63 }
 0x5d2   :  { %3623 = vmatmul.msk.f32.vlgmr.msrb.gmra.mxu3 %vm303_vm1, %v805_v3 }
 0x5d5   :  { %v506_v9 = vpop.f32.mrf.mxu2 }
 0x5d6   :  { %3608 = vmatmul.msk.f32.gmra.mxu0 %vm271_vm15, %v506_v9 }
 0x5da   :  { %3624 = vmatmul.msk.f32.gmra.mxu3 %vm303_vm1, %v806_v12 }
 0x5e2   :  { %v683_v36 = vpop.f32.mrf.mxu2 }
 0x5e3   :  { %3617 = vmatmul.msk.f32.vlgmr.msra.gmra.mxu0 %vm271_vm15, %v683_v36 }
 0x5ea   :  { %v686_v33 = vpop.f32.mrf.mxu2 }
 0x5eb   :  { %3618 = vmatmul.msk.f32.gmra.mxu0 %vm271_vm15, %v686_v33 }
 0x64b   :  { %v532_v42 = vpop.f32.mrf.mxu0 }
 0x64c   :  { %v562_v40 = vadd.f32 %v4498_v55, %v532_v42 }
 0x653   :  { %v535_v17 = vpop.f32.mrf.mxu0 }
 0x654   :  { %v565_v28 = vadd.f32 %v4500_v56, %v535_v17  ;;  %v3628_v56 = vld [vmem:[%s5330_s6 + $0x28] sm:$0xff]  ;;  %v118_v17 = vld [vmem:[%s5325_s1] sm:$0xff] }
 0x655   :  { %v836_v16 = vpop.f32.mrf.mxu3 }
 0x656   :  { %3625 = vmatmul.msk.f32.vlgmr.msrb.gmra.mxu2 %vm271_vm15, %v836_v16 }
 0x65d   :  { %v839_v4 = vpop.f32.mrf.mxu3 }
 0x65e   :  { %3626 = vmatmul.msk.f32.gmra.mxu2 %vm271_vm15, %v839_v4 }
 0x660   :  { %v712_v19 = vpop.f32.mrf.mxu0 }
 0x661   :  { %v718_v23 = vadd.f32 %v712_v19, %v562_v40 }
 0x668   :  { %v715_v15 = vpop.f32.mrf.mxu0 }
 0x669   :  { %v719_v31 = vadd.f32 %v715_v15, %v565_v28 }
 0x6d9   :  { %v865_v25 = vpop.f32.mrf.mxu2 }
 0x6da   :  { %v871_v13 = vadd.f32 %v865_v25, %v718_v23 }
 0x6dc   :  { %v874_v26 = vadd.f32 %v873_v24, %v871_v13 }
 0x6de   :  { %v4569_v30 = vadd.f32 %v874_v26, %v4381_v2  ;;  %v3627_v2 = vld [vmem:[%s5330_s6 + $0x20] sm:$0xff]  ;;  %v119_v26 = vld [vmem:[%s5325_s1 + $0x8] sm:$0xff] }
 0x6df   :  { %v3829_v44 = vpack.i.bf16 %v3627_v2, %v3628_v56 }
 0x6e0   :  { %v878_v32 = vsel %vm130_vm0, %v4569_v30, 0.0 }
 0x6e1   :  { %879 = vadd.xlane.f32.xlu2 %v878_v32  ;;  %v868_v34 = vpop.f32.mrf.mxu2 }
 0x6e2   :  { %v872_v35 = vadd.f32 %v868_v34, %v719_v31 }
 0x6e4   :  { %v875_v55 = vadd.f32 %v873_v24, %v872_v35 }
 0x6e6   :  { %v4574_v18 = vadd.f32 %v875_v55, %v4374_v0  ;;  %v3629_v0 = vld [vmem:[%s5330_s6 + $0x30] sm:$0xff] }
 0x6e7   :  { %985 = vmatpush.msrb.mxu0 %v3629_v0  ;;  %v3824_v50 = vpack.i.bf16 %v3629_v0, %v3630_v38  ;;  %v954_v0 = vperm.slane %v4417_v1, 1 }
 0x6e8   :  { %v881_v37 = vsel %vm130_vm0, %v4574_v18, 0.0 }
 0x6e9   :  { %882 = vadd.xlane.f32.xlu0 %v881_v37  ;;  %986 = vmatpush.msrb.mxu0 %v3628_v56 }
 0x6eb   :  { %987 = vmatpush.msrb.mxu0 %v3627_v2 }
 0x6fd   :  { %3830 = vrot.lane.b32.xlu0 %v3829_v44, %s4267_s29 }
 0x754   :  { %v880_v20 = vpop.xlane.xlu2 %879 }
 0x755   :  { %v884_v39 = vmul.f32 %v880_v20, %v4385_v10 }
 0x757   :  { %v4593_v41 = vsub.f32 %v4569_v30, %v884_v39 }
 0x759   :  { %v888_v43 = vmul.f32 %v4593_v41, %v4593_v41 }
 0x75b   :  { %v890_v45 = vsel %vm130_vm0, %v888_v43, 0.0 }
 0x75c   :  { %891 = vadd.xlane.f32.xlu1 %v890_v45  ;;  %v883_v46 = vpop.xlane.xlu0 %882  ;;  %v957_v45 = vperm.slane %v4422_v5, 1 }
 0x75d   :  { %v885_v47 = vmul.f32 %v883_v46, %v4385_v10 }
 0x75f   :  { %v4600_v22 = vsub.f32 %v4574_v18, %v885_v47 }
 0x761   :  { %v889_v48 = vmul.f32 %v4600_v22, %v4600_v22 }
 0x763   :  { %v893_v49 = vsel %vm130_vm0, %v889_v48, 0.0 }
 0x764   :  { %894 = vadd.xlane.f32.xlu2 %v893_v49 }
 0x76f   :  { %v3831_v3 = vpop.permute.xlu0 %3830 }
 0x770   :  { %v3832_v11 = vunpack.i.l.bf16 %v3831_v3  ;;  %v3833_v14 = vunpack.i.h.bf16 %v3831_v3 }
 0x775   :  { %1012 = vrot.lane.b32.xlu1 %v4608_v53, %s4267_s29 }
 0x77c   :  { %3825 = vrot.lane.b32.xlu2 %v3824_v50, %s4267_s29 }
 0x7cf   :  { %v892_v51 = vpop.xlane.xlu1 %891 }
 0x7d0   :  { %v896_v52 = vmul.f32 %v892_v51, %v4401_v27 }
 0x7d2   :  { %3948 = vrsqrt.f32 %v896_v52  ;;  %vm905_vm8 = vcmp.eq.f32.partialorder %v896_v52, inf  ;;  %v908_v33 = vand.u32 2147483648, %v896_v52  ;;  %vm907_vm9 = vcmp.eq.f32.partialorder %v896_v52, 0.0 }
 0x7d7   :  { %v895_v54 = vpop.xlane.xlu2 %894 }
 0x7d8   :  { %v3949_v57 = vpop.eup %3948  ;;  %v897_v58 = vmul.f32 %v895_v54, %v4401_v27 }
 0x7d9   :  { %v899_v59 = vmul.f32 %v3949_v57, %v896_v52 }
 0x7da   :  { %3950 = vrsqrt.f32 %v897_v58  ;;  %vm917_vm10 = vcmp.eq.f32.partialorder %v897_v58, inf  ;;  %v920_v25 = vand.u32 2147483648, %v897_v58  ;;  %vm919_vm11 = vcmp.eq.f32.partialorder %v897_v58, 0.0 }
 0x7db   :  { %v900_v60 = vmul.f32 %v3949_v57, %v899_v59 }
 0x7dd   :  { %v901_v61 = vmul.f32 0.5, %v900_v60 }
 0x7df   :  { %v902_v62 = vsub.f32 1.5, %v901_v61  ;;  %v3826_v63 = vpop.permute.xlu2 %3825 }
 0x7e0   :  { %v3951_v6 = vpop.eup %3950  ;;  %v3828_v7 = vunpack.i.h.bf16 %v3826_v63  ;;  %v3827_v8 = vunpack.i.l.bf16 %v3826_v63 }
 0x7e1   :  { %v903_v29 = vmul.f32 %v3949_v57, %v902_v62  ;;  %v911_v9 = vmul.f32 %v3951_v6, %v897_v58 }
 0x7e2   :  { %1033 = vmatpush.msra.mxu1 %v3827_v8  ;;  %v4636_v8 = vld [vmem:[%s5327_s3] sm:$0xff] }
 0x7e3   :  { %v904_v12 = vmul.f32 %v903_v29, %v896_v52  ;;  %v912_v36 = vmul.f32 %v3951_v6, %v911_v9 }
 0x7e4   :  { %1034 = vmatpush.msra.mxu1 %v3828_v7 }
 0x7e5   :  { %v906_v16 = vsel %vm905_vm8, %v896_v52, %v904_v12  ;;  %v913_v4 = vmul.f32 0.5, %v912_v36  ;;  %v4643_v12 = vld [vmem:[%s5327_s3 + $0x8] sm:$0xff] }
 0x7e6   :  { %v909_v42 = vsel %vm907_vm9, %v908_v33, %v906_v16  ;;  %1035 = vmatpush.msra.mxu1 %v3832_v11 }
 0x7e7   :  { %v922_v19 = vadd.f32 1e-06, %v909_v42  ;;  %v914_v40 = vsub.f32 1.5, %v913_v4  ;;  %v1013_v60 = vpop.permute.xlu1 %1012 }
 0x7e8   :  { %1036 = vmatpush.msra.mxu1 %v3833_v14 }
 0x7e9   :  { %3952 = vrcp.f32 %v922_v19  ;;  %v915_v23 = vmul.f32 %v3951_v6, %v914_v40  ;;  %3633 = vmatmul.msk.f32.vlgmr.msra.gmra.mxu1 %vm130_vm0, %v118_v17  ;;  %v935_v35 = vand.u32 2147483648, %v922_v19  ;;  %v933_v37 = vand.u32 2147483647, %v922_v19 }
 0x7ea   :  { %vm929_vm13 = vweird.f32 %v922_v19 }
 0x7eb   :  { %v916_v24 = vmul.f32 %v915_v23, %v897_v58  ;;  %v936_v44 = vor.u32 1.1754944e-38, %v935_v35  ;;  %vm934_vm2 = vcmp.eq.f32.partialorder %v933_v37, 8.507059e+37 }
 0x7ed   :  { %v918_v13 = vsel %vm917_vm10, %v897_v58, %v916_v24 }
 0x7ee   :  { %v921_v15 = vsel %vm919_vm11, %v920_v25, %v918_v13 }
 0x7ef   :  { %v3953_v28 = vpop.eup %3952  ;;  %v923_v31 = vadd.f32 1e-06, %v921_v15 }
 0x7f0   :  { %v925_v32 = vmul.f32 %v3953_v28, %v922_v19  ;;  %vm930_vm12 = vweird.f32 %v3953_v28 }
 0x7f1   :  { %3634 = vmatmul.msk.f32.gmra.mxu1 %vm130_vm0, %v119_v26  ;;  %3954 = vrcp.f32 %v923_v31  ;;  %vm931_vm14 = vmor %vm929_vm13, %vm930_vm12  ;;  %v949_v47 = vand.u32 2147483648, %v923_v31  ;;  %v947_v50 = vand.u32 2147483647, %v923_v31  ;;  %vm943_vm4 = vweird.f32 %v923_v31 }
 0x7f2   :  { %v926_v34 = vsub.f32 1.0, %v925_v32 }
 0x7f3   :  { %v950_v54 = vor.u32 1.1754944e-38, %v949_v47  ;;  %vm948_vm6 = vcmp.eq.f32.partialorder %v947_v50, 8.507059e+37 }
 0x7f4   :  { %v927_v55 = vmul.f32 %v3953_v28, %v926_v34 }
 0x7f6   :  { %v928_v2 = vadd.f32 %v3953_v28, %v927_v55 }
 0x7f7   :  { %v3955_v56 = vpop.eup %3954 }
 0x7f8   :  { %v932_v38 = vsel %vm931_vm14, %v3953_v28, %v928_v2  ;;  %v939_v20 = vmul.f32 %v3955_v56, %v923_v31  ;;  %vm944_vm3 = vweird.f32 %v3955_v56  ;;  %v3635_v31 = vld [vmem:[%s5332_s8 + $0x20] sm:$0xff] }
 0x7f9   :  { %v937_v39 = vsel %vm934_vm2, %v936_v44, %v932_v38  ;;  %vm945_vm5 = vmor %vm943_vm4, %vm944_vm3 }
 0x7fa   :  { %v952_v43 = vmul.f32 %v937_v39, %v4593_v41  ;;  %v940_v46 = vsub.f32 1.0, %v939_v20 }
 0x7fc   :  { %v955_v48 = vmul.f32 %v954_v0, %v952_v43  ;;  %v941_v49 = vmul.f32 %v3955_v56, %v940_v46 }
 0x7fe   :  { %v958_v51 = vadd.f32 %v957_v45, %v955_v48  ;;  %v942_v52 = vadd.f32 %v3955_v56, %v941_v49 }
 0x800   :  { %3631 = vmatmul.msk.f32.vlgmr.msrb.gmra.mxu0 %vm130_vm0, %v958_v51  ;;  %v946_v1 = vsel %vm945_vm5, %v3955_v56, %v942_v52 }
 0x801   :  { %v951_v57 = vsel %vm948_vm6, %v950_v54, %v946_v1 }
 0x802   :  { %v953_v41 = vmul.f32 %v951_v57, %v4600_v22 }
 0x804   :  { %v956_v58 = vmul.f32 %v954_v0, %v953_v41 }
 0x806   :  { %v959_v5 = vadd.f32 %v957_v45, %v956_v58 }
 0x808   :  { %3632 = vmatmul.msk.f32.gmra.mxu0 %vm130_vm0, %v959_v5 }
 0x866   :  { %v1038_v59 = vpop.f32.mrf.mxu1 }
 0x867   :  { %v1039_v63 = vadd.f32 %v1038_v59, %v1013_v60 }
 0x86e   :  { %v1041_v61 = vpop.f32.mrf.mxu1 }
 0x86f   :  { %v1042_v62 = vadd.f32 %v1041_v61, %v1013_v60 }
 0x871   :  { %3639 = vmatpush.xpose.msk.msra.mxu3 %vm271_vm15, %v1042_v62  ;;  %v4647_v14 = vpack.i.bf16 %v1039_v63, %v1042_v62 }
 0x875   :  { %3640 = vmatpush.xpose.msk.msra.mxu3 %vm271_vm15, %v1039_v63 }
 0x87d   :  { %v989_v3 = vpop.f32.mrf.mxu0 }
 0x87e   :  { %v990_v6 = vadd.f32 %v989_v3, %v4608_v53 }
 0x880   :  { %3641 = vmatmul.msk.f32.vlgmr.msra.gmra.mxu3 %vm271_vm15, %v990_v6 }
 0x885   :  { %v992_v7 = vpop.f32.mrf.mxu0 }
 0x886   :  { %v993_v22 = vadd.f32 %v992_v7, %v4608_v53 }
 0x888   :  { %3642 = vmatmul.msk.f32.gmra.mxu3 %vm271_vm15, %v993_v22 }
 0x903   :  { %v1078_v29 = vpop.f32.mrf.mxu3 }
 0x904   :  { %v1079_v9 = vadd.f32 %v1078_v29, %v4636_v8 }
 0x906   :  { %v1084_v11 = vsel %vm303_vm1, %v1079_v9, -inf }
 0x907   :  { %1085 = vmax.xlane.f32.xlu0 %v1084_v11 }
 0x90b   :  { %v1081_v36 = vpop.f32.mrf.mxu3 }
 0x90c   :  { %v1082_v53 = vadd.f32 %v1081_v36, %v4643_v12 }
 0x90e   :  { %v1087_v33 = vsel %vm303_vm1, %v1082_v53, -inf }
 0x90f   :  { %1088 = vmax.xlane.f32.xlu2 %v1087_v33 }
 0x927   :  { %3835 = vrot.lane.b32.xlu2 %v4647_v14, %s4267_s29 }
 0x92f   :  { %1167 = vrot.lane.b32.xlu2 %v990_v6, %s4270_s18 }
 0x937   :  { %1506 = vrot.lane.b32.xlu2 %v1042_v62, %s4273_s13 }
 0x93f   :  { %1347 = vrot.lane.b32.xlu2 %v990_v6, %s4272_s19 }
 0x947   :  { %1502 = vrot.lane.b32.xlu2 %v993_v22, %s4273_s13 }
 0x97a   :  { %v1086_v16 = vpop.xlane.xlu0 %1085 }
 0x97b   :  { %v1090_v4 = vsub.f32 %v1079_v9, %v1086_v16 }
 0x97d   :  { %v1092_v42 = vmul.f32 1.442695, %v1090_v4 }
 0x97f   :  { %3956 = vpow2.f32 %v1092_v42 }
 0x982   :  { %v1089_v17 = vpop.xlane.xlu2 %1088 }
 0x983   :  { %v1091_v19 = vsub.f32 %v1082_v53, %v1089_v17 }
 0x985   :  { %v3957_v40 = vpop.eup %3956  ;;  %v1094_v23 = vmul.f32 1.442695, %v1091_v19 }
 0x986   :  { %v1096_v24 = vsel %vm303_vm1, %v3957_v40, 0.0 }
 0x987   :  { %3958 = vpow2.f32 %v1094_v23  ;;  %1097 = vadd.xlane.f32.xlu1 %v1096_v24 }
 0x98a   :  { %v3836_v25 = vpop.permute.xlu2 %3835 }
 0x98b   :  { %v3837_v13 = vunpack.i.l.bf16 %v3836_v25  ;;  %v3838_v15 = vunpack.i.h.bf16 %v3836_v25 }
 0x98d   :  { %v3959_v26 = vpop.eup %3958  ;;  %1158 = vmatpush.msra.mxu2 %v3837_v13 }
 0x98e   :  { %v1099_v28 = vsel %vm303_vm1, %v3959_v26, 0.0 }
 0x98f   :  { %1159 = vmatpush.msra.mxu2 %v3838_v15  ;;  %1100 = vadd.xlane.f32.xlu0 %v1099_v28 }
 0x991   :  { %1339 = vmatpush.msrb.mxu2 %v3635_v31 }
 0x992   :  { %v1168_v37 = vpop.permute.xlu2 %1167 }
 0x99a   :  { %v1507_v50 = vpop.permute.xlu2 %1506 }
 0x9a0   :  { %1173 = vrot.lane.b32.xlu1 %v1042_v62, %s4270_s18 }
 0x9a2   :  { %v1348_v3 = vpop.permute.xlu2 %1347 }
 0x9a3   :  { %1171 = vrot.lane.b32.xlu0 %v1039_v63, %s4270_s18 }
 0x9a8   :  { %1353 = vrot.lane.b32.xlu1 %v1042_v62, %s4272_s19 }
 0x9aa   :  { %v1503_v17 = vpop.permute.xlu2 %1502 }
 0x9ab   :  { %1169 = vrot.lane.b32.xlu0 %v993_v22, %s4270_s18 }
 0x9b0   :  { %1504 = vrot.lane.b32.xlu1 %v1039_v63, %s4273_s13 }
 0x9b3   :  { %1351 = vrot.lane.b32.xlu0 %v1039_v63, %s4272_s19 }
 0x9b8   :  { %1349 = vrot.lane.b32.xlu1 %v993_v22, %s4272_s19 }
 0x9bb   :  { %1500 = vrot.lane.b32.xlu0 %v990_v6, %s4273_s13 }
 0x9fa   :  { %v1098_v32 = vpop.xlane.xlu1 %1097 }
 0x9fb   :  { %3960 = vrcp.f32 %v1098_v32  ;;  %v1113_v56 = vand.u32 2147483648, %v1098_v32  ;;  %v1111_v38 = vand.u32 2147483647, %v1098_v32  ;;  %vm1107_vm8 = vweird.f32 %v1098_v32 }
 0x9fd   :  { %v1114_v39 = vor.u32 1.1754944e-38, %v1113_v56  ;;  %vm1112_vm10 = vcmp.eq.f32.partialorder %v1111_v38, 8.507059e+37 }
 0xa01   :  { %v3961_v34 = vpop.eup %3960 }
 0xa02   :  { %v1103_v35 = vmul.f32 %v3961_v34, %v1098_v32  ;;  %v1101_v55 = vpop.xlane.xlu0 %1100  ;;  %vm1108_vm7 = vweird.f32 %v3961_v34 }
 0xa03   :  { %3962 = vrcp.f32 %v1101_v55  ;;  %vm1109_vm9 = vmor %vm1107_vm8, %vm1108_vm7  ;;  %v1127_v49 = vand.u32 2147483648, %v1101_v55  ;;  %v1125_v52 = vand.u32 2147483647, %v1101_v55  ;;  %vm1121_vm12 = vweird.f32 %v1101_v55 }
 0xa04   :  { %v1104_v2 = vsub.f32 1.0, %v1103_v35 }
 0xa05   :  { %v1128_v1 = vor.u32 1.1754944e-38, %v1127_v49  ;;  %vm1126_vm14 = vcmp.eq.f32.partialorder %v1125_v52, 8.507059e+37 }
 0xa06   :  { %v1105_v44 = vmul.f32 %v3961_v34, %v1104_v2 }
 0xa08   :  { %v1106_v0 = vadd.f32 %v3961_v34, %v1105_v44 }
 0xa09   :  { %v3963_v20 = vpop.eup %3962 }
 0xa0a   :  { %v1110_v43 = vsel %vm1109_vm9, %v3961_v34, %v1106_v0  ;;  %v1117_v45 = vmul.f32 %v3963_v20, %v1101_v55  ;;  %vm1122_vm11 = vweird.f32 %v3963_v20 }
 0xa0b   :  { %v1115_v46 = vsel %vm1112_vm10, %v1114_v39, %v1110_v43  ;;  %vm1123_vm13 = vmor %vm1121_vm12, %vm1122_vm11 }
 0xa0c   :  { %v1118_v47 = vsub.f32 1.0, %v1117_v45  ;;  %v1130_v48 = vmul.f32 %v3957_v40, %v1115_v46 }
 0xa0e   :  { %v1119_v51 = vmul.f32 %v3963_v20, %v1118_v47  ;;  %3643 = vmatmul.msk.f32.vlgmr.msra.gmra.mxu2 %vm303_vm1, %v1130_v48 }
 0xa0f   :  { %3663 = vmatpush.xpose.msk.msra.mxu2 %vm271_vm15, %v1507_v50 }
 0xa10   :  { %v1120_v54 = vadd.f32 %v3963_v20, %v1119_v51 }
 0xa12   :  { %v1174_v57 = vpop.permute.xlu1 %1173  ;;  %v1124_v41 = vsel %vm1123_vm13, %v3963_v20, %v1120_v54 }
 0xa13   :  { %3645 = vmatpush.xpose.msk.msra.mxu0 %vm271_vm15, %v1174_v57  ;;  %v1129_v58 = vsel %vm1126_vm14, %v1128_v1, %v1124_v41 }
 0xa14   :  { %v1131_v5 = vmul.f32 %v3959_v26, %v1129_v58 }
 0xa15   :  { %v1172_v59 = vpop.permute.xlu0 %1171 }
 0xa16   :  { %3644 = vmatmul.msk.f32.gmra.mxu2 %vm303_vm1, %v1131_v5 }
 0xa17   :  { %3646 = vmatpush.xpose.msk.msra.mxu0 %vm271_vm15, %v1172_v59 }
 0xa1a   :  { %v1354_v60 = vpop.permute.xlu1 %1353  ;;  %3647 = vmatmul.msk.f32.vlgmr.msra.gmra.mxu0 %vm271_vm15, %v1168_v37 }
 0xa1b   :  { %3655 = vmatpush.xpose.msk.msrb.mxu0 %vm271_vm15, %v1354_v60 }
 0xa1d   :  { %v1170_v61 = vpop.permute.xlu0 %1169 }
 0xa22   :  { %v1505_v62 = vpop.permute.xlu1 %1504  ;;  %3648 = vmatmul.msk.f32.gmra.mxu0 %vm271_vm15, %v1170_v61 }
 0xa23   :  { %3664 = vmatpush.xpose.msk.msra.mxu2 %vm271_vm15, %v1505_v62 }
 0xa25   :  { %v1352_v63 = vpop.permute.xlu0 %1351 }
 0xa26   :  { %3656 = vmatpush.xpose.msk.msrb.mxu0 %vm271_vm15, %v1352_v63 }
 0xa2a   :  { %3657 = vmatmul.msk.f32.vlgmr.msrb.gmra.mxu0 %vm271_vm15, %v1348_v3  ;;  %v1350_v6 = vpop.permute.xlu1 %1349 }
 0xa2d   :  { %v1501_v33 = vpop.permute.xlu0 %1500 }
 0xa32   :  { %3658 = vmatmul.msk.f32.gmra.mxu0 %vm271_vm15, %v1350_v6 }
 0xa91   :  { %v1161_v7 = vpop.f32.mrf.mxu2 }
 0xa92   :  { %3653 = vmatmul.msk.f32.vlgmr.msrb.gmra.mxu2 %vm271_vm15, %v1161_v7 }
 0xa97   :  { %v1200_v22 = vpop.f32.mrf.mxu0 }
 0xa98   :  { %v1201_v29 = vadd.f32 %v1200_v22, %v4636_v8 }
 0xa99   :  { %v1164_v9 = vpop.f32.mrf.mxu2 }
 0xa9a   :  { %3654 = vmatmul.msk.f32.gmra.mxu2 %vm271_vm15, %v1164_v9  ;;  %v1206_v11 = vsel %vm303_vm1, %v1201_v29, -inf }
 0xa9b   :  { %1207 = vmax.xlane.f32.xlu0 %v1206_v11 }
 0xa9f   :  { %v1203_v36 = vpop.f32.mrf.mxu0 }
 0xaa0   :  { %v1204_v53 = vadd.f32 %v1203_v36, %v4643_v12 }
 0xaa2   :  { %3665 = vmatmul.msk.f32.vlgmr.msra.gmra.mxu2 %vm271_vm15, %v1501_v33  ;;  %v1209_v16 = vsel %vm303_vm1, %v1204_v53, -inf }
 0xaa3   :  { %1210 = vmax.xlane.f32.xlu1 %v1209_v16 }
 0xaa7   :  { %v1380_v4 = vpop.f32.mrf.mxu0 }
 0xaa8   :  { %v1381_v42 = vadd.f32 %v1380_v4, %v4636_v8 }
 0xaaa   :  { %3666 = vmatmul.msk.f32.gmra.mxu2 %vm271_vm15, %v1503_v17  ;;  %v1386_v19 = vsel %vm303_vm1, %v1381_v42, -inf }
 0xaab   :  { %1387 = vmax.xlane.f32.xlu2 %v1386_v19 }
 0xaaf   :  { %v1383_v40 = vpop.f32.mrf.mxu0 }
 0xab0   :  { %v1384_v23 = vadd.f32 %v1383_v40, %v4643_v12 }
 0xab2   :  { %v1389_v24 = vsel %vm303_vm1, %v1384_v23, -inf }
 0xab3   :  { %1390 = vmax.xlane.f32.xlu0 %v1389_v24 }
 0xb0e   :  { %v1208_v25 = vpop.xlane.xlu0 %1207 }
 0xb0f   :  { %v1212_v13 = vsub.f32 %v1201_v29, %v1208_v25 }
 0xb11   :  { %v1214_v26 = vmul.f32 1.442695, %v1212_v13 }
 0xb13   :  { %3964 = vpow2.f32 %v1214_v26 }
 0xb15   :  { %v4692_v15 = vpop.f32.mrf.mxu2 }
 0xb16   :  { %v1211_v32 = vpop.xlane.xlu1 %1210 }
 0xb17   :  { %v1213_v35 = vsub.f32 %v1204_v53, %v1211_v32 }
 0xb19   :  { %v4694_v28 = vpop.eup %3964  ;;  %v1216_v55 = vmul.f32 1.442695, %v1213_v35 }
 0xb1a   :  { %v1218_v31 = vsel %vm303_vm1, %v4694_v28, 0.0 }
 0xb1b   :  { %1219 = vadd.xlane.f32.xlu0 %v1218_v31  ;;  %3966 = vpow2.f32 %v1216_v55 }
 0xb1d   :  { %v4698_v34 = vpop.f32.mrf.mxu2 }
 0xb1e   :  { %v1388_v37 = vpop.xlane.xlu2 %1387 }
 0xb1f   :  { %v1392_v56 = vsub.f32 %v1381_v42, %v1388_v37 }
 0xb21   :  { %v1394_v39 = vmul.f32 1.442695, %v1392_v56  ;;  %v4702_v45 = vpop.eup %3966  ;;  %v3636_v56 = vld [vmem:[%s5332_s8 + $0x28] sm:$0xff] }
 0xb22   :  { %v1221_v48 = vsel %vm303_vm1, %v4702_v45, 0.0  ;;  %1310 = vmatpush.msrb.mxu3 %v3636_v56 }
 0xb23   :  { %3968 = vpow2.f32 %v1394_v39 }
 0xb25   :  { %v1533_v2 = vpop.f32.mrf.mxu2 }
 0xb26   :  { %v1534_v44 = vadd.f32 %v1533_v2, %v4636_v8  ;;  %v1391_v38 = vpop.xlane.xlu0 %1390 }
 0xb27   :  { %v1393_v0 = vsub.f32 %v1384_v23, %v1391_v38 }
 0xb28   :  { %v1539_v20 = vsel %vm303_vm1, %v1534_v44, -inf }
 0xb29   :  { %1540 = vmax.xlane.f32.xlu1 %v1539_v20  ;;  %v1396_v43 = vmul.f32 1.442695, %v1393_v0  ;;  %v4710_v49 = vpop.eup %3968 }
 0xb2b   :  { %3970 = vpow2.f32 %v1396_v43 }
 0xb2d   :  { %v1536_v46 = vpop.f32.mrf.mxu2 }
 0xb2e   :  { %v1537_v47 = vadd.f32 %v1536_v46, %v4643_v12  ;;  %v1398_v12 = vsel %vm303_vm1, %v4710_v49, 0.0 }
 0xb2f   :  { %3840 = vrot.lane.b32.xlu0 %v4647_v14, %s4269_s4 }
 0xb30   :  { %v1542_v8 = vsel %vm303_vm1, %v1537_v47, -inf }
 0xb31   :  { %1543 = vmax.xlane.f32.xlu2 %v1542_v8  ;;  %1222 = vadd.xlane.f32.xlu1 %v1221_v48  ;;  %v4712_v50 = vpop.eup %3970 }
 0xb32   :  { %v1401_v51 = vsel %vm303_vm1, %v4712_v50, 0.0 }
 0xb37   :  { %3850 = vrot.lane.b32.xlu0 %v4647_v14, %s4274_s20 }
 0xb39   :  { %1399 = vadd.xlane.f32.xlu2 %v1398_v12  ;;  %1402 = vadd.xlane.f32.xlu1 %v1401_v51 }
 0xb8e   :  { %v1220_v52 = vpop.xlane.xlu0 %1219 }
 0xb8f   :  { %3972 = vrcp.f32 %v1220_v52  ;;  %v1235_v5 = vand.u32 2147483648, %v1220_v52  ;;  %vm1229_vm3 = vweird.f32 %v1220_v52  ;;  %v1233_v60 = vand.u32 2147483647, %v1220_v52 }
 0xb91   :  { %v1236_v3 = vor.u32 1.1754944e-38, %v1235_v5  ;;  %vm1234_vm5 = vcmp.eq.f32.partialorder %v1233_v60, 8.507059e+37 }
 0xb95   :  { %v3973_v54 = vpop.eup %3972 }
 0xb96   :  { %v1225_v1 = vmul.f32 %v3973_v54, %v1220_v52  ;;  %vm1230_vm2 = vweird.f32 %v3973_v54 }
 0xb97   :  { %vm1231_vm4 = vmor %vm1229_vm3, %vm1230_vm2 }
 0xb98   :  { %v1226_v57 = vsub.f32 1.0, %v1225_v1 }
 0xb9a   :  { %v1227_v41 = vmul.f32 %v3973_v54, %v1226_v57 }
 0xb9c   :  { %v1228_v58 = vadd.f32 %v3973_v54, %v1227_v41  ;;  %v1541_v59 = vpop.xlane.xlu1 %1540 }
 0xb9d   :  { %v1545_v61 = vsub.f32 %v1534_v44, %v1541_v59 }
 0xb9e   :  { %v1232_v62 = vsel %vm1231_vm4, %v3973_v54, %v1228_v58 }
 0xb9f   :  { %v1547_v63 = vmul.f32 1.442695, %v1545_v61  ;;  %v1237_v7 = vsel %vm1234_vm5, %v1236_v3, %v1232_v62 }
 0xba0   :  { %v1252_v53 = vmul.f32 %v4694_v28, %v1237_v7 }
 0xba1   :  { %3974 = vpow2.f32 %v1547_v63  ;;  %v3841_v6 = vpop.permute.xlu0 %3840 }
 0xba2   :  { %v3842_v22 = vunpack.i.l.bf16 %v3841_v6  ;;  %v3843_v29 = vunpack.i.h.bf16 %v3841_v6 }
 0xba4   :  { %v1544_v9 = vpop.xlane.xlu2 %1543  ;;  %v1223_v11 = vpop.xlane.xlu1 %1222  ;;  %1280 = vmatpush.msrb.mxu1 %v3842_v22 }
 0xba5   :  { %v1546_v36 = vsub.f32 %v1537_v47, %v1544_v9  ;;  %3976 = vrcp.f32 %v1223_v11  ;;  %v1249_v13 = vand.u32 2147483648, %v1223_v11  ;;  %v1247_v31 = vand.u32 2147483647, %v1223_v11 }
 0xba6   :  { %1281 = vmatpush.msrb.mxu1 %v3843_v29  ;;  %vm1243_vm7 = vweird.f32 %v1223_v11 }
 0xba7   :  { %v4721_v33 = vpop.eup %3974  ;;  %v1549_v16 = vmul.f32 1.442695, %v1546_v36  ;;  %3649 = vmatmul.msk.f32.vlgmr.msrb.gmra.mxu1 %vm303_vm1, %v1252_v53  ;;  %v1250_v35 = vor.u32 1.1754944e-38, %v1249_v13  ;;  %vm1248_vm9 = vcmp.eq.f32.partialorder %v1247_v31, 8.507059e+37 }
 0xba8   :  { %v1551_v4 = vsel %vm303_vm1, %v4721_v33, 0.0 }
 0xba9   :  { %3978 = vpow2.f32 %v1549_v16  ;;  %1552 = vadd.xlane.f32.xlu2 %v1551_v4  ;;  %v3851_v42 = vpop.permute.xlu0 %3850 }
 0xbaa   :  { %v3852_v17 = vunpack.i.l.bf16 %v3851_v42  ;;  %v3853_v23 = vunpack.i.h.bf16 %v3851_v42 }
 0xbab   :  { %v3977_v19 = vpop.eup %3976 }
 0xbac   :  { %v1239_v40 = vmul.f32 %v3977_v19, %v1223_v11  ;;  %1613 = vmatpush.msra.mxu0 %v3852_v17  ;;  %vm1244_vm6 = vweird.f32 %v3977_v19  ;;  %v1400_v44 = vpop.xlane.xlu2 %1399  ;;  %v1403_v38 = vpop.xlane.xlu1 %1402 }
 0xbad   :  { %vm1245_vm8 = vmor %vm1243_vm7, %vm1244_vm6  ;;  %3980 = vrcp.f32 %v1400_v44  ;;  %v1415_v12 = vand.u32 2147483648, %v1400_v44  ;;  %vm1409_vm11 = vweird.f32 %v1400_v44  ;;  %v1413_v51 = vand.u32 2147483647, %v1400_v44 }
 0xbae   :  { %v1240_v24 = vsub.f32 1.0, %v1239_v40  ;;  %1614 = vmatpush.msra.mxu0 %v3853_v23  ;;  %3982 = vrcp.f32 %v1403_v38  ;;  %vm1423_vm14 = vweird.f32 %v1403_v38  ;;  %v1429_v3 = vand.u32 2147483648, %v1403_v38 }
 0xbaf   :  { %v4726_v25 = vpop.eup %3978  ;;  %v1416_v57 = vor.u32 1.1754944e-38, %v1415_v12  ;;  %vm1414_vm13 = vcmp.eq.f32.partialorder %v1413_v51, 8.507059e+37  ;;  %v1427_v22 = vand.u32 2147483647, %v1403_v38 }
 0xbb0   :  { %v1241_v26 = vmul.f32 %v3977_v19, %v1240_v24  ;;  %v1554_v28 = vsel %vm303_vm1, %v4726_v25, 0.0  ;;  %v1430_v4 = vor.u32 1.1754944e-38, %v1429_v3  ;;  %v1743_v3 = vld [vmem:[%s5334_s10 + $0x18] sm:$0xff] }
 0xbb1   :  { %1555 = vadd.xlane.f32.xlu1 %v1554_v28 }
 0xbb2   :  { %v1242_v32 = vadd.f32 %v3977_v19, %v1241_v26 }
 0xbb3   :  { %v3981_v0 = vpop.eup %3980 }
 0xbb4   :  { %v1246_v55 = vsel %vm1245_vm8, %v3977_v19, %v1242_v32  ;;  %v1405_v20 = vmul.f32 %v3981_v0, %v1400_v44  ;;  %v3983_v43 = vpop.eup %3982  ;;  %vm1410_vm10 = vweird.f32 %v3981_v0  ;;  %vm1428_vm8 = vcmp.eq.f32.partialorder %v1427_v22, 8.507059e+37  ;;  %v1741_v22 = vld [vmem:[%s5334_s10 + $0x8] sm:$0xff] }
 0xbb5   :  { %v1251_v37 = vsel %vm1248_vm9, %v1250_v35, %v1246_v55  ;;  %vm1411_vm12 = vmor %vm1409_vm11, %vm1410_vm10  ;;  %vm1424_vm2 = vweird.f32 %v3983_v43 }
 0xbb6   :  { %v1253_v2 = vmul.f32 %v4702_v45, %v1251_v37  ;;  %v1406_v39 = vsub.f32 1.0, %v1405_v20  ;;  %v3637_v45 = vld [vmem:[%s5332_s8 + $0x30] sm:$0xff]  ;;  %vm1425_vm4 = vmor %vm1423_vm14, %vm1424_vm2 }
 0xbb7   :  { %1490 = vmatpush.msra.mxu3 %v3637_v45 }
 0xbb8   :  { %3650 = vmatmul.msk.f32.gmra.mxu1 %vm303_vm1, %v1253_v2  ;;  %v1407_v46 = vmul.f32 %v3981_v0, %v1406_v39 }
 0xbba   :  { %v1408_v8 = vadd.f32 %v3981_v0, %v1407_v46 }
 0xbbc   :  { %v1412_v52 = vsel %vm1411_vm12, %v3981_v0, %v1408_v8 }
 0xbbd   :  { %v1417_v59 = vsel %vm1414_vm13, %v1416_v57, %v1412_v52 }
 0xbbe   :  { %v1432_v11 = vmul.f32 %v4710_v49, %v1417_v59 }
 0xbc1   :  { %3845 = vrot.lane.b32.xlu2 %v4647_v14, %s4271_s9  ;;  %v1419_v14 = vmul.f32 %v3983_v43, %v1403_v38 }
 0xbc3   :  { %v1420_v48 = vsub.f32 1.0, %v1419_v14  ;;  %v1653_v14 = vperm.slane %v4563_v21, 1 }
 0xbc5   :  { %v1421_v54 = vmul.f32 %v3983_v43, %v1420_v48 }
 0xbc7   :  { %v1422_v63 = vadd.f32 %v3983_v43, %v1421_v54 }
 0xbc9   :  { %v1426_v53 = vsel %vm1425_vm4, %v3983_v43, %v1422_v63 }
 0xbca   :  { %v1431_v23 = vsel %vm1428_vm8, %v1430_v4, %v1426_v53 }
 0xbcb   :  { %v1433_v28 = vmul.f32 %v4712_v50, %v1431_v23  ;;  %v3638_v50 = vld [vmem:[%s5332_s8 + $0x38] sm:$0xff] }
 0xc1c   :  { %v1553_v47 = vpop.xlane.xlu2 %1552 }
 0xc1d   :  { %3984 = vrcp.f32 %v1553_v47  ;;  %v1568_v6 = vand.u32 2147483648, %v1553_v47  ;;  %v1566_v9 = vand.u32 2147483647, %v1553_v47  ;;  %vm1562_vm5 = vweird.f32 %v1553_v47 }
 0xc1f   :  { %v1569_v42 = vor.u32 1.1754944e-38, %v1568_v6  ;;  %vm1567_vm7 = vcmp.eq.f32.partialorder %v1566_v9, 8.507059e+37  ;;  %v1742_v6 = vld [vmem:[%s5334_s10 + $0x10] sm:$0xff]  ;;  %v1740_v9 = vld [vmem:[%s5334_s10] sm:$0xff] }
 0xc23   :  { %v3985_v1 = vpop.eup %3984 }
 0xc24   :  { %v1558_v41 = vmul.f32 %v3985_v1, %v1553_v47  ;;  %v3846_v58 = vpop.permute.xlu2 %3845  ;;  %v1556_v5 = vpop.xlane.xlu1 %1555  ;;  %vm1563_vm3 = vweird.f32 %v3985_v1 }
 0xc25   :  { %v3847_v60 = vunpack.i.l.bf16 %v3846_v58  ;;  %3986 = vrcp.f32 %v1556_v5  ;;  %v1283_v61 = vpop.f32.mrf.mxu1  ;;  %v3848_v7 = vunpack.i.h.bf16 %v3846_v58  ;;  %vm1564_vm6 = vmor %vm1562_vm5, %vm1563_vm3  ;;  %v1582_v13 = vand.u32 2147483648, %v1556_v5 }
 0xc26   :  { %v1559_v62 = vsub.f32 1.0, %v1558_v41  ;;  %3651 = vmatmul.msk.f32.vlgmr.msrb.gmra.mxu3 %vm271_vm15, %v1283_v61  ;;  %v1580_v31 = vand.u32 2147483647, %v1556_v5  ;;  %vm1576_vm10 = vweird.f32 %v1556_v5 }
 0xc27   :  { %1460 = vmatpush.msra.mxu1 %v3847_v60  ;;  %v1583_v35 = vor.u32 1.1754944e-38, %v1582_v13  ;;  %1763 = vmatpush.msrb.mxu3 %v1743_v3 }
 0xc28   :  { %v1560_v29 = vmul.f32 %v3985_v1, %v1559_v62  ;;  %vm1581_vm12 = vcmp.eq.f32.partialorder %v1580_v31, 8.507059e+37 }
 0xc29   :  { %1461 = vmatpush.msra.mxu1 %v3848_v7  ;;  %1764 = vmatpush.msrb.mxu3 %v1742_v6 }
 0xc2a   :  { %v1561_v36 = vadd.f32 %v3985_v1, %v1560_v29  ;;  %3659 = vmatmul.msk.f32.vlgmr.msra.gmra.mxu1 %vm303_vm1, %v1432_v11 }
 0xc2b   :  { %v3987_v16 = vpop.eup %3986  ;;  %1643 = vmatpush.msrb.mxu1 %v3638_v50  ;;  %1765 = vmatpush.msrb.mxu3 %v1741_v22 }
 0xc2c   :  { %v1565_v17 = vsel %vm1564_vm6, %v3985_v1, %v1561_v36  ;;  %v1572_v19 = vmul.f32 %v3987_v16, %v1556_v5  ;;  %vm1577_vm9 = vweird.f32 %v3987_v16 }
 0xc2d   :  { %v1570_v40 = vsel %vm1567_vm7, %v1569_v42, %v1565_v17  ;;  %vm1578_vm11 = vmor %vm1576_vm10, %vm1577_vm9  ;;  %1766 = vmatpush.msrb.mxu3 %v1740_v9 }
 0xc2e   :  { %v1573_v24 = vsub.f32 1.0, %v1572_v19  ;;  %v1585_v49 = vmul.f32 %v4721_v33, %v1570_v40 }
 0xc30   :  { %v1574_v26 = vmul.f32 %v3987_v16, %v1573_v24  ;;  %3667 = vmatmul.msk.f32.vlgmr.msra.gmra.mxu0 %vm303_vm1, %v1585_v49 }
 0xc32   :  { %3660 = vmatmul.msk.f32.gmra.mxu1 %vm303_vm1, %v1433_v28  ;;  %v1575_v32 = vadd.f32 %v3987_v16, %v1574_v26 }
 0xc34   :  { %v1579_v55 = vsel %vm1578_vm11, %v3987_v16, %v1575_v32 }
 0xc35   :  { %v1286_v37 = vpop.f32.mrf.mxu1  ;;  %v1584_v2 = vsel %vm1581_vm12, %v1583_v35, %v1579_v55  ;;  %v1783_v55 = vld [vmem:[%s5336_s12 + $0x38] sm:$0xff]  ;;  %vm1784_vm12 = vcmask 523264  }
 0xc36   :  { %3652 = vmatmul.msk.f32.gmra.mxu3 %vm271_vm15, %v1286_v37  ;;  %v1586_v33 = vmul.f32 %v4726_v25, %v1584_v2  ;;  %v1782_v37 = vld [vmem:[%s5336_s12 + $0x30] sm:$0xff]  ;;  %1799 = vmatpush.msrb.mxu2 %v1783_v55 }
 0xc38   :  { %3668 = vmatmul.msk.f32.gmra.mxu0 %vm303_vm1, %v1586_v33  ;;  %v1781_v33 = vld [vmem:[%s5336_s12 + $0x28] sm:$0xff]  ;;  %1800 = vmatpush.msrb.mxu2 %v1782_v37 }
 0xc3a   :  { %1801 = vmatpush.msrb.mxu2 %v1781_v33 }
 0xca7   :  { %v1463_v56 = vpop.f32.mrf.mxu1 }
 0xca8   :  { %3661 = vmatmul.msk.f32.vlgmr.msra.gmra.mxu3 %vm271_vm15, %v1463_v56 }
 0xca9   :  { %v1312_v25 = vpop.f32.mrf.mxu3 }
 0xcaa   :  { %v1342_v39 = vadd.f32 %v4692_v15, %v1312_v25  ;;  %v1779_v25 = vld [vmem:[%s5336_s12 + $0x18] sm:$0xff] }
 0xcad   :  { %v1616_v44 = vpop.f32.mrf.mxu0 }
 0xcae   :  { %3669 = vmatmul.msk.f32.vlgmr.msrb.gmra.mxu1 %vm271_vm15, %v1616_v44  ;;  %v1780_v44 = vld [vmem:[%s5336_s12 + $0x20] sm:$0xff] }
 0xcaf   :  { %v1466_v38 = vpop.f32.mrf.mxu1  ;;  %1802 = vmatpush.msrb.mxu2 %v1780_v44 }
 0xcb0   :  { %3662 = vmatmul.msk.f32.gmra.mxu3 %vm271_vm15, %v1466_v38 }
 0xcb1   :  { %1803 = vmatpush.msrb.mxu2 %v1779_v25 }
 0xcb5   :  { %v1619_v0 = vpop.f32.mrf.mxu0 }
 0xcb6   :  { %3670 = vmatmul.msk.f32.gmra.mxu1 %vm271_vm15, %v1619_v0 }
 0xcb9   :  { %v1315_v20 = vpop.f32.mrf.mxu3 }
 0xcba   :  { %v1345_v48 = vadd.f32 %v4698_v34, %v1315_v20 }
 0xd2b   :  { %v1492_v43 = vpop.f32.mrf.mxu3  ;;  %v1645_v45 = vpop.f32.mrf.mxu1 }
 0xd2c   :  { %v1498_v46 = vadd.f32 %v1492_v43, %v1342_v39 }
 0xd2e   :  { %v1651_v47 = vadd.f32 %v1645_v45, %v1498_v46 }
 0xd30   :  { %v1654_v8 = vadd.f32 %v1653_v14, %v1651_v47 }
 0xd32   :  { %v4762_v12 = vadd.f32 %v1654_v8, %v4569_v30 }
 0xd33   :  { %v1495_v51 = vpop.f32.mrf.mxu3  ;;  %v1648_v1 = vpop.f32.mrf.mxu1 }
 0xd34   :  { %v1499_v52 = vadd.f32 %v1495_v51, %v1345_v48  ;;  %v1658_v54 = vsel %vm130_vm0, %v4762_v12, 0.0 }
 0xd35   :  { %1659 = vadd.xlane.f32.xlu1 %v1658_v54  ;;  %v4814_v54 = vld [vmem:[#allocation2] sm:$0x7f] }
 0xd36   :  { %v1652_v15 = vadd.f32 %v1648_v1, %v1499_v52  ;;  %v1734_v1 = vperm.slane %v4814_v54, 2 }
 0xd38   :  { %v1655_v57 = vadd.f32 %v1653_v14, %v1652_v15 }
 0xd3a   :  { %v4767_v41 = vadd.f32 %v1655_v57, %v4574_v18 }
 0xd3c   :  { %v1661_v21 = vsel %vm130_vm0, %v4767_v41, 0.0 }
 0xd3d   :  { %1662 = vadd.xlane.f32.xlu0 %v1661_v21 }
 0xda8   :  { %v1660_v34 = vpop.xlane.xlu1 %1659 }
 0xda9   :  { %v1664_v30 = vmul.f32 %v1660_v34, %v4385_v10  ;;  %v4821_v34 = vld [vmem:[%s5329_s5] sm:$0x7f] }
 0xdab   :  { %v4773_v58 = vsub.f32 %v4762_v12, %v1664_v30  ;;  %v1737_v30 = vperm.slane %v4821_v34, 2 }
 0xdad   :  { %v1668_v5 = vmul.f32 %v4773_v58, %v4773_v58 }
 0xdaf   :  { %v1670_v59 = vsel %vm130_vm0, %v1668_v5, 0.0 }
 0xdb0   :  { %1671 = vadd.xlane.f32.xlu1 %v1670_v59  ;;  %v1663_v60 = vpop.xlane.xlu0 %1662 }
 0xdb1   :  { %v1665_v18 = vmul.f32 %v1663_v60, %v4385_v10 }
 0xdb3   :  { %v4780_v61 = vsub.f32 %v4767_v41, %v1665_v18 }
 0xdb5   :  { %v1669_v62 = vmul.f32 %v4780_v61, %v4780_v61 }
 0xdb7   :  { %v1673_v63 = vsel %vm130_vm0, %v1669_v62, 0.0 }
 0xdb8   :  { %1674 = vadd.xlane.f32.xlu1 %v1673_v63 }
 0xe23   :  { %v1672_v7 = vpop.xlane.xlu1 %1671 }
 0xe24   :  { %v1676_v29 = vmul.f32 %v1672_v7, %v4401_v27 }
 0xe26   :  { %3988 = vrsqrt.f32 %v1676_v29  ;;  %vm1685_vm13 = vcmp.eq.f32.partialorder %v1676_v29, inf  ;;  %v1688_v13 = vand.u32 2147483648, %v1676_v29  ;;  %vm1687_vm14 = vcmp.eq.f32.partialorder %v1676_v29, 0.0 }
 0xe2b   :  { %v1675_v11 = vpop.xlane.xlu1 %1674 }
 0xe2c   :  { %v3989_v36 = vpop.eup %3988  ;;  %v1677_v53 = vmul.f32 %v1675_v11, %v4401_v27  ;;  %v1778_v11 = vld [vmem:[%s5336_s12 + $0x10] sm:$0xff] }
 0xe2d   :  { %v1679_v16 = vmul.f32 %v3989_v36, %v1676_v29  ;;  %1804 = vmatpush.msrb.mxu2 %v1778_v11 }
 0xe2e   :  { %3990 = vrsqrt.f32 %v1677_v53  ;;  %vm1697_vm2 = vcmp.eq.f32.partialorder %v1677_v53, inf  ;;  %v1700_v56 = vand.u32 2147483648, %v1677_v53  ;;  %vm1699_vm3 = vcmp.eq.f32.partialorder %v1677_v53, 0.0 }
 0xe2f   :  { %v1680_v4 = vmul.f32 %v3989_v36, %v1679_v16 }
 0xe31   :  { %v1681_v42 = vmul.f32 0.5, %v1680_v4 }
 0xe33   :  { %v1682_v17 = vsub.f32 1.5, %v1681_v42 }
 0xe34   :  { %v3991_v19 = vpop.eup %3990 }
 0xe35   :  { %v1683_v40 = vmul.f32 %v3989_v36, %v1682_v17  ;;  %v1691_v23 = vmul.f32 %v3991_v19, %v1677_v53  ;;  %v1777_v36 = vld [vmem:[%s5336_s12 + $0x8] sm:$0xff] }
 0xe36   :  { %1805 = vmatpush.msrb.mxu2 %v1777_v36 }
 0xe37   :  { %v1684_v24 = vmul.f32 %v1683_v40, %v1676_v29  ;;  %v1692_v49 = vmul.f32 %v3991_v19, %v1691_v23 }
 0xe39   :  { %v1686_v26 = vsel %vm1685_vm13, %v1676_v29, %v1684_v24  ;;  %v1693_v28 = vmul.f32 0.5, %v1692_v49  ;;  %v129_v24 = vld [vmem:[#allocation10] sm:$0x3] }
 0xe3a   :  { %v1689_v31 = vsel %vm1687_vm14, %v1688_v13, %v1686_v26  ;;  %v1816_v49 = vperm.slane %v129_v24, 0  ;;  %v1895_v24 = vperm.slane %v4814_v54, 3 }
 0xe3b   :  { %v1702_v32 = vadd.f32 1e-06, %v1689_v31  ;;  %v1694_v35 = vsub.f32 1.5, %v1693_v28 }
 0xe3d   :  { %3992 = vrcp.f32 %v1702_v32  ;;  %v1695_v2 = vmul.f32 %v3991_v19, %v1694_v35  ;;  %v1715_v46 = vand.u32 2147483648, %v1702_v32  ;;  %v1713_v47 = vand.u32 2147483647, %v1702_v32 }
 0xe3e   :  { %vm1709_vm5 = vweird.f32 %v1702_v32 }
 0xe3f   :  { %v1696_v50 = vmul.f32 %v1695_v2, %v1677_v53  ;;  %v1716_v51 = vor.u32 1.1754944e-38, %v1715_v46  ;;  %vm1714_vm7 = vcmp.eq.f32.partialorder %v1713_v47, 8.507059e+37 }
 0xe41   :  { %v1698_v38 = vsel %vm1697_vm2, %v1677_v53, %v1696_v50  ;;  %v1776_v53 = vld [vmem:[%s5336_s12] sm:$0xff] }
 0xe42   :  { %v1701_v0 = vsel %vm1699_vm3, %v1700_v56, %v1698_v38  ;;  %1806 = vmatpush.msrb.mxu2 %v1776_v53 }
 0xe43   :  { %v3993_v20 = vpop.eup %3992  ;;  %v1703_v39 = vadd.f32 1e-06, %v1701_v0 }
 0xe44   :  { %v1705_v43 = vmul.f32 %v3993_v20, %v1702_v32  ;;  %vm1710_vm4 = vweird.f32 %v3993_v20 }
 0xe45   :  { %3994 = vrcp.f32 %v1703_v39  ;;  %vm1711_vm6 = vmor %vm1709_vm5, %vm1710_vm4  ;;  %v1729_v59 = vand.u32 2147483648, %v1703_v39  ;;  %v1727_v62 = vand.u32 2147483647, %v1703_v39  ;;  %vm1723_vm9 = vweird.f32 %v1703_v39 }
 0xe46   :  { %v1706_v45 = vsub.f32 1.0, %v1705_v43 }
 0xe47   :  { %v1730_v6 = vor.u32 1.1754944e-38, %v1729_v59  ;;  %vm1728_vm11 = vcmp.eq.f32.partialorder %v1727_v62, 8.507059e+37 }
 0xe48   :  { %v1707_v14 = vmul.f32 %v3993_v20, %v1706_v45  ;;  %v3676_v45 = vld [vmem:[%s5330_s6 + $0x48] sm:$0xff] }
 0xe4a   :  { %v1708_v8 = vadd.f32 %v3993_v20, %v1707_v14  ;;  %v3675_v14 = vld [vmem:[%s5330_s6 + $0x40] sm:$0xff] }
 0xe4b   :  { %v3995_v48 = vpop.eup %3994 }
 0xe4c   :  { %v1712_v52 = vsel %vm1711_vm6, %v3993_v20, %v1708_v8  ;;  %v1719_v15 = vmul.f32 %v3995_v48, %v1703_v39  ;;  %vm1724_vm8 = vweird.f32 %v3995_v48  ;;  %v3678_v20 = vld [vmem:[%s5330_s6 + $0x58] sm:$0xff]  ;;  %v3677_v39 = vld [vmem:[%s5330_s6 + $0x50] sm:$0xff] }
 0xe4d   :  { %v1717_v57 = vsel %vm1714_vm7, %v1716_v51, %v1712_v52  ;;  %vm1725_vm10 = vmor %vm1723_vm9, %vm1724_vm8  ;;  %1925 = vmatpush.msrb.mxu0 %v3678_v20 }
 0xe4e   :  { %v1732_v21 = vmul.f32 %v1717_v57, %v4773_v58  ;;  %v1720_v5 = vsub.f32 1.0, %v1719_v15 }
 0xe4f   :  { %1926 = vmatpush.msrb.mxu0 %v3677_v39 }
 0xe50   :  { %v1735_v60 = vmul.f32 %v1734_v1, %v1732_v21  ;;  %v1721_v18 = vmul.f32 %v3995_v48, %v1720_v5 }
 0xe51   :  { %1927 = vmatpush.msrb.mxu0 %v3676_v45 }
 0xe52   :  { %v1738_v63 = vadd.f32 %v1737_v30, %v1735_v60  ;;  %v1722_v3 = vadd.f32 %v3995_v48, %v1721_v18 }
 0xe53   :  { %1928 = vmatpush.msrb.mxu0 %v3675_v14 }
 0xe54   :  { %3671 = vmatmul.msk.f32.vlgmr.msrb.gmra.mxu3 %vm130_vm0, %v1738_v63  ;;  %v1726_v58 = vsel %vm1725_vm10, %v3995_v48, %v1722_v3 }
 0xe55   :  { %v1731_v7 = vsel %vm1728_vm11, %v1730_v6, %v1726_v58 }
 0xe56   :  { %v1733_v22 = vmul.f32 %v1731_v7, %v4780_v61  ;;  %v128_v61 = vld [vmem:[#allocation8] sm:$0x3] }
 0xe57   :  { %v1744_v16 = vperm.slane %v128_v61, 0 }
 0xe58   :  { %v1736_v29 = vmul.f32 %v1734_v1, %v1733_v22 }
 0xe5a   :  { %v1739_v9 = vadd.f32 %v1737_v30, %v1736_v29 }
 0xe5c   :  { %3672 = vmatmul.msk.f32.gmra.mxu3 %vm130_vm0, %v1739_v9 }
 0xed7   :  { %v1768_v4 = vpop.f32.mrf.mxu3 }
 0xed8   :  { %v1769_v42 = vadd.f32 %v1768_v4, %v1744_v16 }
 0xeda   :  { %v1774_v17 = vmax.f32 %v1769_v42, 0.0 }
 0xedc   :  { %3673 = vmatmul.msk.f32.vlgmr.msrb.gmra.mxu2 %vm1784_vm12, %v1774_v17 }
 0xedf   :  { %v1771_v19 = vpop.f32.mrf.mxu3 }
 0xee0   :  { %v1772_v40 = vadd.f32 %v1771_v19, %v1744_v16 }
 0xee2   :  { %v1775_v23 = vmax.f32 %v1772_v40, 0.0 }
 0xee4   :  { %3674 = vmatmul.msk.f32.gmra.mxu2 %vm1784_vm12, %v1775_v23 }
 0xf5f   :  { %v1808_v13 = vpop.f32.mrf.mxu2 }
 0xf60   :  { %v1814_v26 = vadd.f32 %v1808_v13, %v4762_v12 }
 0xf62   :  { %v4839_v28 = vadd.f32 %v1816_v49, %v1814_v26 }
 0xf64   :  { %v1819_v31 = vsel %vm130_vm0, %v4839_v28, 0.0 }
 0xf65   :  { %1820 = vadd.xlane.f32.xlu2 %v1819_v31  ;;  %v1898_v31 = vperm.slane %v4821_v34, 3 }
 0xf67   :  { %v1811_v32 = vpop.f32.mrf.mxu2 }
 0xf68   :  { %v1815_v35 = vadd.f32 %v1811_v32, %v4767_v41 }
 0xf6a   :  { %v4844_v55 = vadd.f32 %v1816_v49, %v1815_v35 }
 0xf6c   :  { %v1822_v37 = vsel %vm130_vm0, %v4844_v55, 0.0 }
 0xf6d   :  { %1823 = vadd.xlane.f32.xlu1 %v1822_v37 }
 0xfd8   :  { %v1821_v2 = vpop.xlane.xlu2 %1820 }
 0xfd9   :  { %v1825_v33 = vmul.f32 %v1821_v2, %v4385_v10 }
 0xfdb   :  { %v4850_v12 = vsub.f32 %v4839_v28, %v1825_v33 }
 0xfdd   :  { %v1829_v50 = vmul.f32 %v4850_v12, %v4850_v12 }
 0xfdf   :  { %v1831_v56 = vsel %vm130_vm0, %v1829_v50, 0.0 }
 0xfe0   :  { %1832 = vadd.xlane.f32.xlu1 %v1831_v56  ;;  %v1824_v44 = vpop.xlane.xlu1 %1823 }
 0xfe1   :  { %v1826_v41 = vmul.f32 %v1824_v44, %v4385_v10 }
 0xfe3   :  { %v4857_v38 = vsub.f32 %v4844_v55, %v1826_v41 }
 0xfe5   :  { %v1830_v0 = vmul.f32 %v4857_v38, %v4857_v38 }
 0xfe7   :  { %v1834_v25 = vsel %vm130_vm0, %v1830_v0, 0.0 }
 0xfe8   :  { %1835 = vadd.xlane.f32.xlu1 %v1834_v25  ;;  %v4882_v25 = vld [vmem:[#allocation5] sm:$0xf] }
 0xfe9   :  { %v1906_v20 = vperm.slane %v4882_v25, 2 }
0x1053   :  { %v1833_v43 = vpop.xlane.xlu1 %1832 }
0x1054   :  { %v1837_v46 = vmul.f32 %v1833_v43, %v4401_v27 }
0x1056   :  { %3996 = vrsqrt.f32 %v1837_v46  ;;  %vm1846_vm13 = vcmp.eq.f32.partialorder %v1837_v46, inf  ;;  %v1849_v60 = vand.u32 2147483648, %v1837_v46  ;;  %vm1848_vm14 = vcmp.eq.f32.partialorder %v1837_v46, 0.0 }
0x105b   :  { %v1836_v47 = vpop.xlane.xlu1 %1835 }
0x105c   :  { %v3997_v8 = vpop.eup %3996  ;;  %v1838_v48 = vmul.f32 %v1836_v47, %v4401_v27 }
0x105d   :  { %v1840_v51 = vmul.f32 %v3997_v8, %v1837_v46 }
0x105e   :  { %3998 = vrsqrt.f32 %v1838_v48  ;;  %vm1858_vm2 = vcmp.eq.f32.partialorder %v1838_v48, inf  ;;  %v1861_v22 = vand.u32 2147483648, %v1838_v48  ;;  %vm1860_vm3 = vcmp.eq.f32.partialorder %v1838_v48, 0.0 }
0x105f   :  { %v1841_v52 = vmul.f32 %v3997_v8, %v1840_v51 }
0x1061   :  { %v1842_v1 = vmul.f32 0.5, %v1841_v52 }
0x1063   :  { %v1843_v15 = vsub.f32 1.5, %v1842_v1  ;;  %v4901_v1 = vld [vmem:[%s5326_s2 + $0x8] sm:$0xff] }
0x1064   :  { %v3999_v57 = vpop.eup %3998 }
0x1065   :  { %v1844_v21 = vmul.f32 %v3997_v8, %v1843_v15  ;;  %v1852_v30 = vmul.f32 %v3999_v57, %v1838_v48  ;;  %v4894_v8 = vld [vmem:[%s5326_s2] sm:$0xff] }
0x1067   :  { %v1845_v5 = vmul.f32 %v1844_v21, %v1837_v46  ;;  %v1853_v59 = vmul.f32 %v3999_v57, %v1852_v30 }
0x1069   :  { %v1847_v18 = vsel %vm1846_vm13, %v1837_v46, %v1845_v5  ;;  %v1854_v62 = vmul.f32 0.5, %v1853_v59 }
0x106a   :  { %v1850_v63 = vsel %vm1848_vm14, %v1849_v60, %v1847_v18 }
0x106b   :  { %v1863_v3 = vadd.f32 1e-06, %v1850_v63  ;;  %v1855_v6 = vsub.f32 1.5, %v1854_v62 }
0x106d   :  { %4000 = vrcp.f32 %v1863_v3  ;;  %v1856_v58 = vmul.f32 %v3999_v57, %v1855_v6  ;;  %v1876_v16 = vand.u32 2147483648, %v1863_v3  ;;  %v1874_v42 = vand.u32 2147483647, %v1863_v3 }
0x106e   :  { %vm1870_vm5 = vweird.f32 %v1863_v3 }
0x106f   :  { %v1857_v7 = vmul.f32 %v1856_v58, %v1838_v48  ;;  %v1877_v40 = vor.u32 1.1754944e-38, %v1876_v16  ;;  %vm1875_vm7 = vcmp.eq.f32.partialorder %v1874_v42, 8.507059e+37 }
0x1071   :  { %v1859_v29 = vsel %vm1858_vm2, %v1838_v48, %v1857_v7 }
0x1072   :  { %v1862_v9 = vsel %vm1860_vm3, %v1861_v22, %v1859_v29 }
0x1073   :  { %v4001_v11 = vpop.eup %4000  ;;  %v1864_v36 = vadd.f32 1e-06, %v1862_v9 }
0x1074   :  { %v1866_v53 = vmul.f32 %v4001_v11, %v1863_v3  ;;  %vm1871_vm4 = vweird.f32 %v4001_v11 }
0x1075   :  { %4002 = vrcp.f32 %v1864_v36  ;;  %vm1872_vm6 = vmor %vm1870_vm5, %vm1871_vm4  ;;  %v1890_v35 = vand.u32 2147483648, %v1864_v36  ;;  %v1888_v33 = vand.u32 2147483647, %v1864_v36  ;;  %vm1884_vm9 = vweird.f32 %v1864_v36 }
0x1076   :  { %v1867_v61 = vsub.f32 1.0, %v1866_v53 }
0x1077   :  { %v1891_v44 = vor.u32 1.1754944e-38, %v1890_v35  ;;  %vm1889_vm11 = vcmp.eq.f32.partialorder %v1888_v33, 8.507059e+37 }
0x1078   :  { %v1868_v4 = vmul.f32 %v4001_v11, %v1867_v61 }
0x107a   :  { %v1869_v17 = vadd.f32 %v4001_v11, %v1868_v4  ;;  %v3681_v4 = vld [vmem:[%s5332_s8 + $0x40] sm:$0xff] }
0x107b   :  { %v4003_v19 = vpop.eup %4002 }
0x107c   :  { %v1873_v23 = vsel %vm1872_vm6, %v4001_v11, %v1869_v17  ;;  %v1880_v49 = vmul.f32 %v4003_v19, %v1864_v36  ;;  %vm1885_vm8 = vweird.f32 %v4003_v19 }
0x107d   :  { %v1878_v13 = vsel %vm1875_vm7, %v1877_v40, %v1873_v23  ;;  %vm1886_vm10 = vmor %vm1884_vm9, %vm1885_vm8 }
0x107e   :  { %v1893_v26 = vmul.f32 %v1878_v13, %v4850_v12  ;;  %v1881_v32 = vsub.f32 1.0, %v1880_v49 }
0x1080   :  { %v1896_v37 = vmul.f32 %v1895_v24, %v1893_v26  ;;  %v1882_v2 = vmul.f32 %v4003_v19, %v1881_v32 }
0x1082   :  { %v1899_v50 = vadd.f32 %v1898_v31, %v1896_v37  ;;  %v1883_v56 = vadd.f32 %v4003_v19, %v1882_v2 }
0x1084   :  { %3679 = vmatmul.msk.f32.vlgmr.msrb.gmra.mxu0 %vm130_vm0, %v1899_v50  ;;  %v1887_v54 = vsel %vm1886_vm10, %v4003_v19, %v1883_v56 }
0x1085   :  { %v1892_v41 = vsel %vm1889_vm11, %v1891_v44, %v1887_v54 }
0x1086   :  { %v1894_v12 = vmul.f32 %v1892_v41, %v4857_v38 }
0x1088   :  { %v1897_v0 = vmul.f32 %v1895_v24, %v1894_v12 }
0x108a   :  { %v1900_v34 = vadd.f32 %v1898_v31, %v1897_v0 }
0x108c   :  { %3680 = vmatmul.msk.f32.gmra.mxu0 %vm130_vm0, %v1900_v34 }
0x1101   :  { %v1930_v39 = vpop.f32.mrf.mxu0 }
0x1102   :  { %v1931_v43 = vadd.f32 %v1930_v39, %v1906_v20 }
0x1104   :  { %1943 = vrot.lane.b32.xlu0 %v1931_v43, %s4267_s29 }
0x1109   :  { %v1933_v45 = vpop.f32.mrf.mxu0 }
0x110a   :  { %v1934_v46 = vadd.f32 %v1933_v45, %v1906_v20 }
0x110c   :  { %1945 = vrot.lane.b32.xlu1 %v1934_v46, %s4267_s29  ;;  %v4905_v21 = vpack.i.bf16 %v1931_v43, %v1934_v46 }
0x1176   :  { %v1944_v38 = vpop.permute.xlu0 %1943 }
0x117e   :  { %v1946_v14 = vpop.permute.xlu1 %1945 }
0x117f   :  { %3685 = vmatpush.xpose.msk.msra.mxu1 %vm271_vm15, %v1946_v14 }
0x1183   :  { %3686 = vmatpush.xpose.msk.msra.mxu1 %vm271_vm15, %v1944_v38 }
0x1186   :  { %3687 = vmatmul.msk.f32.vlgmr.msra.gmra.mxu1 %vm271_vm15, %v1931_v43 }
0x118e   :  { %3688 = vmatmul.msk.f32.gmra.mxu1 %vm271_vm15, %v1934_v46 }
0x1203   :  { %v1972_v47 = vpop.f32.mrf.mxu1 }
0x1204   :  { %v1973_v48 = vadd.f32 %v4894_v8, %v1972_v47 }
0x1206   :  { %v1978_v51 = vsel %vm303_vm1, %v1973_v48, -inf }
0x1207   :  { %1979 = vmax.xlane.f32.xlu2 %v1978_v51 }
0x120b   :  { %v1975_v52 = vpop.f32.mrf.mxu1 }
0x120c   :  { %v1976_v15 = vadd.f32 %v4901_v1, %v1975_v52 }
0x120e   :  { %v1981_v57 = vsel %vm303_vm1, %v1976_v15, -inf }
0x120f   :  { %1982 = vmax.xlane.f32.xlu2 %v1981_v57 }
0x1227   :  { %3855 = vrot.lane.b32.xlu2 %v4905_v21, %s4268_s17 }
0x122f   :  { %2067 = vrot.lane.b32.xlu2 %v1934_v46, %s4269_s4 }
0x1237   :  { %2065 = vrot.lane.b32.xlu2 %v1931_v43, %s4269_s4 }
0x123f   :  { %2400 = vrot.lane.b32.xlu2 %v1934_v46, %s4274_s20 }
0x1247   :  { %2247 = vrot.lane.b32.xlu2 %v1934_v46, %s4271_s9 }
0x124f   :  { %2398 = vrot.lane.b32.xlu2 %v1931_v43, %s4274_s20 }
0x1257   :  { %2245 = vrot.lane.b32.xlu2 %v1931_v43, %s4271_s9 }
0x125f   :  { %2243 = vrot.lane.b32.xlu2 %v1934_v46, %s4272_s19 }
0x127a   :  { %v1980_v30 = vpop.xlane.xlu2 %1979 }
0x127b   :  { %v1984_v5 = vsub.f32 %v1973_v48, %v1980_v30 }
0x127d   :  { %v1986_v59 = vmul.f32 1.442695, %v1984_v5 }
0x127f   :  { %4004 = vpow2.f32 %v1986_v59 }
0x1282   :  { %v1983_v60 = vpop.xlane.xlu2 %1982 }
0x1283   :  { %v1985_v18 = vsub.f32 %v1976_v15, %v1983_v60 }
0x1285   :  { %v4005_v62 = vpop.eup %4004  ;;  %v1988_v63 = vmul.f32 1.442695, %v1985_v18 }
0x1286   :  { %v1990_v3 = vsel %vm303_vm1, %v4005_v62, 0.0 }
0x1287   :  { %4006 = vpow2.f32 %v1988_v63  ;;  %1991 = vadd.xlane.f32.xlu0 %v1990_v3 }
0x128a   :  { %v3856_v6 = vpop.permute.xlu2 %3855 }
0x128b   :  { %v3857_v58 = vunpack.i.l.bf16 %v3856_v6  ;;  %v3858_v22 = vunpack.i.h.bf16 %v3856_v6 }
0x128d   :  { %v4007_v7 = vpop.eup %4006  ;;  %2052 = vmatpush.msra.mxu3 %v3857_v58 }
0x128e   :  { %v1993_v29 = vsel %vm303_vm1, %v4007_v7, 0.0 }
0x128f   :  { %1994 = vadd.xlane.f32.xlu1 %v1993_v29  ;;  %2053 = vmatpush.msra.mxu3 %v3858_v22 }
0x1291   :  { %2233 = vmatpush.msrb.mxu3 %v3681_v4 }
0x1292   :  { %v2068_v9 = vpop.permute.xlu2 %2067 }
0x1293   :  { %3691 = vmatpush.xpose.msk.msra.mxu2 %vm271_vm15, %v2068_v9 }
0x129a   :  { %v2066_v11 = vpop.permute.xlu2 %2065 }
0x129b   :  { %2061 = vrot.lane.b32.xlu0 %v1931_v43, %s4270_s18  ;;  %3692 = vmatpush.xpose.msk.msra.mxu2 %vm271_vm15, %v2066_v11 }
0x12a2   :  { %v2401_v36 = vpop.permute.xlu2 %2400 }
0x12a3   :  { %2394 = vrot.lane.b32.xlu0 %v1931_v43, %s4273_s13 }
0x12a8   :  { %2063 = vrot.lane.b32.xlu1 %v1934_v46, %s4270_s18 }
0x12aa   :  { %v2248_v53 = vpop.permute.xlu2 %2247 }
0x12ab   :  { %2241 = vrot.lane.b32.xlu0 %v1931_v43, %s4272_s19  ;;  %3701 = vmatpush.xpose.msk.msrb.mxu2 %vm271_vm15, %v2248_v53 }
0x12b0   :  { %2396 = vrot.lane.b32.xlu1 %v1934_v46, %s4273_s13 }
0x12b2   :  { %v2399_v61 = vpop.permute.xlu2 %2398 }
0x12ba   :  { %v2246_v16 = vpop.permute.xlu2 %2245 }
0x12bb   :  { %3702 = vmatpush.xpose.msk.msrb.mxu2 %vm271_vm15, %v2246_v16 }
0x12c2   :  { %v2244_v14 = vpop.permute.xlu2 %2243 }
0x12fa   :  { %v1992_v42 = vpop.xlane.xlu0 %1991 }
0x12fb   :  { %4008 = vrcp.f32 %v1992_v42  ;;  %v2007_v24 = vand.u32 2147483648, %v1992_v42  ;;  %v2005_v13 = vand.u32 2147483647, %v1992_v42  ;;  %vm2001_vm14 = vweird.f32 %v1992_v42 }
0x12fd   :  { %v2008_v32 = vor.u32 1.1754944e-38, %v2007_v24  ;;  %vm2006_vm3 = vcmp.eq.f32.partialorder %v2005_v13, 8.507059e+37 }
0x1301   :  { %v4009_v17 = vpop.eup %4008 }
0x1302   :  { %v1997_v19 = vmul.f32 %v4009_v17, %v1992_v42  ;;  %v1995_v40 = vpop.xlane.xlu1 %1994  ;;  %vm2002_vm13 = vweird.f32 %v4009_v17 }
0x1303   :  { %4010 = vrcp.f32 %v1995_v40  ;;  %vm2003_vm2 = vmor %vm2001_vm14, %vm2002_vm13  ;;  %v2021_v56 = vand.u32 2147483648, %v1995_v40  ;;  %v2019_v41 = vand.u32 2147483647, %v1995_v40  ;;  %vm2015_vm5 = vweird.f32 %v1995_v40 }
0x1304   :  { %v1998_v23 = vsub.f32 1.0, %v1997_v19 }
0x1305   :  { %v2022_v0 = vor.u32 1.1754944e-38, %v2021_v56  ;;  %vm2020_vm7 = vcmp.eq.f32.partialorder %v2019_v41, 8.507059e+37 }
0x1306   :  { %v1999_v49 = vmul.f32 %v4009_v17, %v1998_v23 }
0x1308   :  { %v2000_v26 = vadd.f32 %v4009_v17, %v1999_v49 }
0x1309   :  { %v4011_v31 = vpop.eup %4010 }
0x130a   :  { %v2004_v35 = vsel %vm2003_vm2, %v4009_v17, %v2000_v26  ;;  %v2011_v37 = vmul.f32 %v4011_v31, %v1995_v40  ;;  %vm2016_vm4 = vweird.f32 %v4011_v31 }
0x130b   :  { %v2009_v2 = vsel %vm2006_vm3, %v2008_v32, %v2004_v35  ;;  %vm2017_vm6 = vmor %vm2015_vm5, %vm2016_vm4 }
0x130c   :  { %v2012_v33 = vsub.f32 1.0, %v2011_v37  ;;  %v2024_v50 = vmul.f32 %v4005_v62, %v2009_v2 }
0x130d   :  { %v2062_v44 = vpop.permute.xlu0 %2061 }
0x130e   :  { %v2013_v54 = vmul.f32 %v4011_v31, %v2012_v33  ;;  %3689 = vmatmul.msk.f32.vlgmr.msra.gmra.mxu3 %vm303_vm1, %v2024_v50  ;;  %3693 = vmatmul.msk.f32.vlgmr.msra.gmra.mxu2 %vm271_vm15, %v2062_v44 }
0x130f   :  { %3709 = vmatpush.xpose.msk.msra.mxu3 %vm271_vm15, %v2401_v36 }
0x1310   :  { %v2014_v12 = vadd.f32 %v4011_v31, %v2013_v54 }
0x1312   :  { %v2018_v34 = vsel %vm2017_vm6, %v4011_v31, %v2014_v12 }
0x1313   :  { %3710 = vmatpush.xpose.msk.msra.mxu3 %vm271_vm15, %v2399_v61  ;;  %v2023_v20 = vsel %vm2020_vm7, %v2022_v0, %v2018_v34 }
0x1314   :  { %v2025_v39 = vmul.f32 %v4007_v7, %v2023_v20 }
0x1315   :  { %v2395_v43 = vpop.permute.xlu0 %2394 }
0x1316   :  { %3690 = vmatmul.msk.f32.gmra.mxu3 %vm303_vm1, %v2025_v39 }
0x131a   :  { %v2064_v45 = vpop.permute.xlu1 %2063 }
0x131b   :  { %3694 = vmatmul.msk.f32.gmra.mxu2 %vm271_vm15, %v2064_v45 }
0x131d   :  { %v2242_v46 = vpop.permute.xlu0 %2241 }
0x1322   :  { %v2397_v60 = vpop.permute.xlu1 %2396 }
0x1323   :  { %3703 = vmatmul.msk.f32.vlgmr.msrb.gmra.mxu2 %vm271_vm15, %v2242_v46 }
0x132b   :  { %3704 = vmatmul.msk.f32.gmra.mxu2 %vm271_vm15, %v2244_v14 }
0x1391   :  { %v2055_v38 = vpop.f32.mrf.mxu3  ;;  %v2094_v47 = vpop.f32.mrf.mxu2 }
0x1392   :  { %v2095_v48 = vadd.f32 %v4894_v8, %v2094_v47  ;;  %3699 = vmatmul.msk.f32.vlgmr.msrb.gmra.mxu3 %vm271_vm15, %v2055_v38 }
0x1394   :  { %v2100_v51 = vsel %vm303_vm1, %v2095_v48, -inf }
0x1395   :  { %2101 = vmax.xlane.f32.xlu0 %v2100_v51 }
0x1399   :  { %v2058_v52 = vpop.f32.mrf.mxu3 }
0x139a   :  { %3700 = vmatmul.msk.f32.gmra.mxu3 %vm271_vm15, %v2058_v52 }
0x139e   :  { %v2097_v15 = vpop.f32.mrf.mxu2 }
0x139f   :  { %v2098_v57 = vadd.f32 %v4901_v1, %v2097_v15 }
0x13a1   :  { %v2103_v30 = vsel %vm303_vm1, %v2098_v57, -inf }
0x13a2   :  { %2104 = vmax.xlane.f32.xlu1 %v2103_v30  ;;  %3711 = vmatmul.msk.f32.vlgmr.msra.gmra.mxu3 %vm271_vm15, %v2395_v43 }
0x13a6   :  { %v2274_v5 = vpop.f32.mrf.mxu2 }
0x13a7   :  { %v2275_v59 = vadd.f32 %v4894_v8, %v2274_v5 }
0x13a9   :  { %v2280_v18 = vsel %vm303_vm1, %v2275_v59, -inf }
0x13aa   :  { %2281 = vmax.xlane.f32.xlu0 %v2280_v18  ;;  %3712 = vmatmul.msk.f32.gmra.mxu3 %vm271_vm15, %v2397_v60 }
0x13ae   :  { %v2277_v17 = vpop.f32.mrf.mxu2 }
0x13af   :  { %v2278_v23 = vadd.f32 %v4901_v1, %v2277_v17 }
0x13b1   :  { %v2283_v13 = vsel %vm303_vm1, %v2278_v23, -inf }
0x1408   :  { %v2102_v62 = vpop.xlane.xlu0 %2101 }
0x1409   :  { %v2106_v63 = vsub.f32 %v2095_v48, %v2102_v62 }
0x140b   :  { %v2108_v3 = vmul.f32 1.442695, %v2106_v63 }
0x140d   :  { %4012 = vpow2.f32 %v2108_v3 }
0x1413   :  { %v4948_v6 = vpop.eup %4012 }
0x1414   :  { %v2112_v58 = vsel %vm303_vm1, %v4948_v6, 0.0 }
0x1415   :  { %2113 = vadd.xlane.f32.xlu0 %v2112_v58  ;;  %v4952_v7 = vpop.f32.mrf.mxu3  ;;  %v2105_v36 = vpop.xlane.xlu1 %2104 }
0x1416   :  { %v2107_v16 = vsub.f32 %v2098_v57, %v2105_v36 }
0x1418   :  { %v2110_v40 = vmul.f32 1.442695, %v2107_v16 }
0x141d   :  { %v2282_v22 = vpop.xlane.xlu0 %2281  ;;  %v4954_v29 = vpop.f32.mrf.mxu3 }
0x141e   :  { %v2286_v9 = vsub.f32 %v2275_v59, %v2282_v22 }
0x1420   :  { %v2288_v11 = vmul.f32 1.442695, %v2286_v9 }
0x1422   :  { %4014 = vpow2.f32 %v2288_v11 }
0x1423   :  { %4016 = vpow2.f32 %v2110_v40 }
0x1425   :  { %v2427_v53 = vpop.f32.mrf.mxu3 }
0x1426   :  { %v2428_v61 = vadd.f32 %v4894_v8, %v2427_v53 }
0x1428   :  { %v4957_v4 = vpop.eup %4014  ;;  %v2433_v42 = vsel %vm303_vm1, %v2428_v61, -inf }
0x1429   :  { %2434 = vmax.xlane.f32.xlu2 %v2433_v42  ;;  %v2292_v19 = vsel %vm303_vm1, %v4957_v4, 0.0  ;;  %v4966_v26 = vpop.eup %4016 }
0x142a   :  { %2293 = vadd.xlane.f32.xlu0 %v2292_v19  ;;  %v2115_v31 = vsel %vm303_vm1, %v4966_v26, 0.0 }
0x142d   :  { %v2430_v24 = vpop.f32.mrf.mxu3 }
0x142e   :  { %v2431_v49 = vadd.f32 %v4901_v1, %v2430_v24 }
0x1430   :  { %v2436_v8 = vsel %vm303_vm1, %v2431_v49, -inf }
0x1431   :  { %2437 = vmax.xlane.f32.xlu1 %v2436_v8  ;;  %2284 = vmax.xlane.f32.xlu2 %v2283_v13  ;;  %v3682_v8 = vld [vmem:[%s5332_s8 + $0x48] sm:$0xff] }
0x1432   :  { %2204 = vmatpush.msrb.mxu1 %v3682_v8 }
0x1439   :  { %2116 = vadd.xlane.f32.xlu1 %v2115_v31 }
0x1452   :  { %3860 = vrot.lane.b32.xlu1 %v4905_v21, %s4275_s22 }
0x1488   :  { %v2114_v33 = vpop.xlane.xlu0 %2113 }
0x1489   :  { %v2129_v15 = vand.u32 2147483648, %v2114_v33  ;;  %vm2123_vm9 = vweird.f32 %v2114_v33  ;;  %v2127_v57 = vand.u32 2147483647, %v2114_v33 }
0x148b   :  { %v2130_v59 = vor.u32 1.1754944e-38, %v2129_v15  ;;  %vm2128_vm11 = vcmp.eq.f32.partialorder %v2127_v57, 8.507059e+37 }
0x149c   :  { %v2435_v32 = vpop.xlane.xlu2 %2434 }
0x149d   :  { %v2439_v35 = vsub.f32 %v2428_v61, %v2435_v32  ;;  %v2294_v16 = vpop.xlane.xlu0 %2293 }
0x149e   :  { %v2307_v15 = vand.u32 2147483647, %v2294_v16 }
0x149f   :  { %v2441_v37 = vmul.f32 1.442695, %v2439_v35 }
0x14a1   :  { %4018 = vpow2.f32 %v2441_v37 }
0x14a2   :  { %4020 = vrcp.f32 %v2114_v33 }
0x14a4   :  { %v2438_v1 = vpop.xlane.xlu1 %2437  ;;  %v2285_v2 = vpop.xlane.xlu2 %2284 }
0x14a5   :  { %v2440_v50 = vsub.f32 %v2431_v49, %v2438_v1  ;;  %v2287_v56 = vsub.f32 %v2278_v23, %v2285_v2 }
0x14a7   :  { %v4972_v44 = vpop.eup %4018  ;;  %v2443_v54 = vmul.f32 1.442695, %v2440_v50  ;;  %v2290_v41 = vmul.f32 1.442695, %v2287_v56 }
0x14a8   :  { %v2445_v12 = vsel %vm303_vm1, %v4972_v44, 0.0  ;;  %v4021_v0 = vpop.eup %4020 }
0x14a9   :  { %4022 = vpow2.f32 %v2443_v54  ;;  %2446 = vadd.xlane.f32.xlu2 %v2445_v12  ;;  %v2119_v46 = vmul.f32 %v4021_v0, %v2114_v33  ;;  %vm2124_vm8 = vweird.f32 %v4021_v0 }
0x14aa   :  { %4024 = vpow2.f32 %v2290_v41  ;;  %vm2125_vm10 = vmor %vm2123_vm9, %vm2124_vm8 }
0x14ab   :  { %v2120_v14 = vsub.f32 1.0, %v2119_v46 }
0x14ac   :  { %v2117_v34 = vpop.xlane.xlu1 %2116 }
0x14ad   :  { %4026 = vrcp.f32 %v2117_v34  ;;  %v2121_v47 = vmul.f32 %v4021_v0, %v2120_v14  ;;  %v2143_v3 = vand.u32 2147483648, %v2117_v34  ;;  %vm2137_vm14 = vweird.f32 %v2117_v34 }
0x14ae   :  { %v2141_v9 = vand.u32 2147483647, %v2117_v34  ;;  %4028 = vrcp.f32 %v2294_v16 }
0x14af   :  { %v4976_v20 = vpop.eup %4022  ;;  %v2122_v51 = vadd.f32 %v4021_v0, %v2121_v47  ;;  %v2144_v36 = vor.u32 1.1754944e-38, %v2143_v3 }
0x14b0   :  { %v4978_v39 = vpop.eup %4024  ;;  %v2448_v43 = vsel %vm303_vm1, %v4976_v20, 0.0  ;;  %vm2142_vm3 = vcmp.eq.f32.partialorder %v2141_v9, 8.507059e+37 }
0x14b1   :  { %2449 = vadd.xlane.f32.xlu2 %v2448_v43  ;;  %v2295_v45 = vsel %vm303_vm1, %v4978_v39, 0.0  ;;  %v2126_v30 = vsel %vm2125_vm10, %v4021_v0, %v2122_v51  ;;  %v2309_v51 = vand.u32 2147483648, %v2294_v16 }
0x14b2   :  { %2296 = vadd.xlane.f32.xlu0 %v2295_v45  ;;  %v2131_v18 = vsel %vm2128_vm11, %v2130_v59, %v2126_v30 }
0x14b3   :  { %v4027_v38 = vpop.eup %4026  ;;  %v2146_v22 = vmul.f32 %v4948_v6, %v2131_v18  ;;  %v2310_v59 = vor.u32 1.1754944e-38, %v2309_v51 }
0x14b4   :  { %v2133_v48 = vmul.f32 %v4027_v38, %v2117_v34  ;;  %vm2138_vm13 = vweird.f32 %v4027_v38  ;;  %v4029_v6 = vpop.eup %4028 }
0x14b5   :  { %vm2139_vm2 = vmor %vm2137_vm14, %vm2138_vm13  ;;  %v2299_v23 = vmul.f32 %v4029_v6, %v2294_v16  ;;  %vm2304_vm9 = vweird.f32 %v4029_v6  ;;  %vm2303_vm13 = vweird.f32 %v2294_v16 }
0x14b6   :  { %v2134_v52 = vsub.f32 1.0, %v2133_v48 }
0x14b7   :  { %v2300_v31 = vsub.f32 1.0, %v2299_v23 }
0x14b8   :  { %v2135_v5 = vmul.f32 %v4027_v38, %v2134_v52 }
0x14b9   :  { %v2301_v41 = vmul.f32 %v4029_v6, %v2300_v31 }
0x14ba   :  { %v2136_v63 = vadd.f32 %v4027_v38, %v2135_v5 }
0x14bc   :  { %v2140_v11 = vsel %vm2139_vm2, %v4027_v38, %v2136_v63  ;;  %v2302_v38 = vadd.f32 %v4029_v6, %v2301_v41  ;;  %vm2305_vm2 = vmor %vm2303_vm13, %vm2304_vm9 }
0x14bd   :  { %v2145_v53 = vsel %vm2142_vm3, %v2144_v36, %v2140_v11  ;;  %vm2308_vm3 = vcmp.eq.f32.partialorder %v2307_v15, 8.507059e+37 }
0x14be   :  { %v2147_v61 = vmul.f32 %v4966_v26, %v2145_v53 }
0x14c4   :  { %v3861_v60 = vpop.permute.xlu1 %3860 }
0x14c5   :  { %v3862_v62 = vunpack.i.l.bf16 %v3861_v60  ;;  %v3863_v58 = vunpack.i.h.bf16 %v3861_v60 }
0x14c6   :  { %3870 = vrot.lane.b32.xlu0 %v4905_v21, %s4276_s23 }
0x14c7   :  { %2174 = vmatpush.msra.mxu0 %v3862_v62 }
0x14c9   :  { %2175 = vmatpush.msra.mxu0 %v3863_v58  ;;  %3865 = vrot.lane.b32.xlu2 %v4905_v21, %s4277_s24 }
0x14ca   :  { %3695 = vmatmul.msk.f32.vlgmr.msra.gmra.mxu0 %vm303_vm1, %v2146_v22 }
0x14d2   :  { %3696 = vmatmul.msk.f32.gmra.mxu0 %vm303_vm1, %v2147_v61 }
0x151c   :  { %v2447_v42 = vpop.xlane.xlu2 %2446 }
0x151d   :  { %4030 = vrcp.f32 %v2447_v42  ;;  %v2462_v49 = vand.u32 2147483648, %v2447_v42  ;;  %v2460_v26 = vand.u32 2147483647, %v2447_v42  ;;  %vm2456_vm5 = vweird.f32 %v2447_v42 }
0x151f   :  { %v2463_v37 = vor.u32 1.1754944e-38, %v2462_v49  ;;  %vm2461_vm7 = vcmp.eq.f32.partialorder %v2460_v26, 8.507059e+37  ;;  %v5023_v26 = vld [vmem:[#allocation7] sm:$0xf] }
0x1520   :  { %v2547_v31 = vperm.slane %v5023_v26, 2 }
0x1523   :  { %v4031_v17 = vpop.eup %4030 }
0x1524   :  { %v2452_v19 = vmul.f32 %v4031_v17, %v2447_v42  ;;  %v2450_v40 = vpop.xlane.xlu2 %2449  ;;  %vm2457_vm4 = vweird.f32 %v4031_v17 }
0x1525   :  { %v4992_v21 = vpop.xlane.xlu0 %2296  ;;  %4032 = vrcp.f32 %v2450_v40  ;;  %vm2458_vm6 = vmor %vm2456_vm5, %vm2457_vm4  ;;  %v2476_v34 = vand.u32 2147483648, %v2450_v40  ;;  %v2474_v14 = vand.u32 2147483647, %v2450_v40  ;;  %vm2470_vm10 = vweird.f32 %v2450_v40 }
0x1526   :  { %v2453_v24 = vsub.f32 1.0, %v2452_v19  ;;  %4034 = vrcp.f32 %v4992_v21  ;;  %v2323_v58 = vand.u32 2147483648, %v4992_v21  ;;  %vm2317_vm5 = vweird.f32 %v4992_v21 }
0x1527   :  { %v2477_v52 = vor.u32 1.1754944e-38, %v2476_v34  ;;  %vm2475_vm14 = vcmp.eq.f32.partialorder %v2474_v14, 8.507059e+37  ;;  %v2321_v11 = vand.u32 2147483647, %v4992_v21 }
0x1528   :  { %v2454_v13 = vmul.f32 %v4031_v17, %v2453_v24  ;;  %v2324_v36 = vor.u32 1.1754944e-38, %v2323_v58 }
0x152a   :  { %v2455_v32 = vadd.f32 %v4031_v17, %v2454_v13 }
0x152b   :  { %v4033_v35 = vpop.eup %4032 }
0x152c   :  { %v4035_v1 = vpop.eup %4034  ;;  %v2459_v2 = vsel %vm2458_vm6, %v4031_v17, %v2455_v32  ;;  %v2466_v33 = vmul.f32 %v4033_v35, %v2450_v40  ;;  %v3866_v50 = vpop.permute.xlu2 %3865  ;;  %vm2471_vm8 = vweird.f32 %v4033_v35 }
0x152d   :  { %v2464_v56 = vsel %vm2461_vm7, %v2463_v37, %v2459_v2  ;;  %v3867_v54 = vunpack.i.l.bf16 %v3866_v50  ;;  %v2313_v12 = vmul.f32 %v4035_v1, %v4992_v21  ;;  %v3868_v43 = vunpack.i.h.bf16 %v3866_v50  ;;  %vm2472_vm11 = vmor %vm2470_vm10, %vm2471_vm8 }
0x152e   :  { %v2467_v0 = vsub.f32 1.0, %v2466_v33  ;;  %v2479_v46 = vmul.f32 %v4972_v44, %v2464_v56  ;;  %v2306_v44 = vsel %vm2305_vm2, %v4029_v6, %v2302_v38  ;;  %vm2318_vm4 = vweird.f32 %v4035_v1  ;;  %v3683_v6 = vld [vmem:[%s5332_s8 + $0x50] sm:$0xff]  ;;  %v3717_v38 = vld [vmem:[%s5330_s6 + $0x60] sm:$0xff] }
0x152f   :  { %2507 = vmatpush.msra.mxu2 %v3867_v54  ;;  %v2314_v47 = vsub.f32 1.0, %v2313_v12  ;;  %v2311_v62 = vsel %vm2308_vm3, %v2310_v59, %v2306_v44  ;;  %vm2319_vm6 = vmor %vm2317_vm5, %vm2318_vm4  ;;  %vm2322_vm7 = vcmp.eq.f32.partialorder %v2321_v11, 8.507059e+37  ;;  %2384 = vmatpush.msra.mxu1 %v3683_v6  ;;  %v5068_v6 = vperm.slane %v4882_v25, 3 }
0x1530   :  { %v2468_v45 = vmul.f32 %v4033_v35, %v2467_v0  ;;  %v2326_v9 = vmul.f32 %v4957_v4, %v2311_v62  ;;  %v3684_v4 = vld [vmem:[%s5332_s8 + $0x58] sm:$0xff] }
0x1531   :  { %2508 = vmatpush.msra.mxu2 %v3868_v43  ;;  %v2315_v5 = vmul.f32 %v4035_v1, %v2314_v47  ;;  %v3718_v47 = vld [vmem:[%s5330_s6 + $0x68] sm:$0xff] }
0x1532   :  { %3713 = vmatmul.msk.f32.vlgmr.msra.gmra.mxu2 %vm303_vm1, %v2479_v46  ;;  %v2469_v48 = vadd.f32 %v4033_v35, %v2468_v45 }
0x1533   :  { %v2316_v3 = vadd.f32 %v4035_v1, %v2315_v5 }
0x1534   :  { %v2473_v57 = vsel %vm2472_vm11, %v4033_v35, %v2469_v48  ;;  %v3879_v48 = vpack.i.bf16 %v3717_v38, %v3718_v47 }
0x1535   :  { %v2478_v30 = vsel %vm2475_vm14, %v2477_v52, %v2473_v57 }
0x1536   :  { %v2480_v18 = vmul.f32 %v4976_v20, %v2478_v30  ;;  %v2320_v20 = vsel %vm2319_vm6, %v4035_v1, %v2316_v3 }
0x1537   :  { %v2325_v53 = vsel %vm2322_vm7, %v2324_v36, %v2320_v20 }
0x1538   :  { %v3871_v60 = vpop.permute.xlu0 %3870  ;;  %v2327_v61 = vmul.f32 %v4978_v39, %v2325_v53 }
0x1539   :  { %v3872_v63 = vunpack.i.l.bf16 %v3871_v60  ;;  %v3873_v22 = vunpack.i.h.bf16 %v3871_v60 }
0x153a   :  { %3714 = vmatmul.msk.f32.gmra.mxu2 %vm303_vm1, %v2480_v18 }
0x153b   :  { %2354 = vmatpush.msrb.mxu0 %v3872_v63 }
0x153d   :  { %2355 = vmatpush.msrb.mxu0 %v3873_v22 }
0x153e   :  { %3705 = vmatmul.msk.f32.vlgmr.msrb.gmra.mxu0 %vm303_vm1, %v2326_v9 }
0x153f   :  { %2537 = vmatpush.msra.mxu0 %v3684_v4 }
0x1546   :  { %3706 = vmatmul.msk.f32.gmra.mxu0 %vm303_vm1, %v2327_v61 }
0x1547   :  { %v2177_v16 = vpop.f32.mrf.mxu0 }
0x1548   :  { %3697 = vmatmul.msk.f32.vlgmr.msrb.gmra.mxu1 %vm271_vm15, %v2177_v16 }
0x154f   :  { %v2180_v42 = vpop.f32.mrf.mxu0 }
0x1550   :  { %3698 = vmatmul.msk.f32.gmra.mxu1 %vm271_vm15, %v2180_v42 }
0x15b5   :  { %v2510_v17 = vpop.f32.mrf.mxu2 }
0x15b6   :  { %3715 = vmatmul.msk.f32.vlgmr.msra.gmra.mxu0 %vm271_vm15, %v2510_v17 }
0x15bb   :  { %v2357_v39 = vpop.f32.mrf.mxu0 }
0x15bc   :  { %3707 = vmatmul.msk.f32.vlgmr.msra.gmra.mxu1 %vm271_vm15, %v2357_v39 }
0x15bd   :  { %v2513_v19 = vpop.f32.mrf.mxu2 }
0x15be   :  { %3716 = vmatmul.msk.f32.gmra.mxu0 %vm271_vm15, %v2513_v19 }
0x15c3   :  { %v2360_v40 = vpop.f32.mrf.mxu0 }
0x15c4   :  { %3708 = vmatmul.msk.f32.gmra.mxu1 %vm271_vm15, %v2360_v40 }
0x15c5   :  { %v2206_v21 = vpop.f32.mrf.mxu1 }
0x15c6   :  { %v2236_v24 = vadd.f32 %v4952_v7, %v2206_v21 }
0x15cd   :  { %v2209_v23 = vpop.f32.mrf.mxu1 }
0x15ce   :  { %v2239_v37 = vadd.f32 %v4954_v29, %v2209_v23  ;;  %v3719_v29 = vld [vmem:[%s5330_s6 + $0x70] sm:$0xff] }
0x1633   :  { %v2539_v49 = vpop.f32.mrf.mxu0 }
0x1639   :  { %v2386_v8 = vpop.f32.mrf.mxu1 }
0x163a   :  { %v2392_v13 = vadd.f32 %v2386_v8, %v2236_v24 }
0x163b   :  { %v2542_v7 = vpop.f32.mrf.mxu0 }
0x163c   :  { %v2545_v32 = vadd.f32 %v2539_v49, %v2392_v13 }
0x163e   :  { %v2548_v35 = vadd.f32 %v2547_v31, %v2545_v32 }
0x1640   :  { %v5028_v1 = vadd.f32 %v2548_v35, %v4839_v28  ;;  %v3720_v28 = vld [vmem:[%s5330_s6 + $0x78] sm:$0xff] }
0x1641   :  { %v2389_v2 = vpop.f32.mrf.mxu1  ;;  %2658 = vmatpush.msrb.mxu1 %v3720_v28  ;;  %v3874_v57 = vpack.i.bf16 %v3719_v29, %v3720_v28  ;;  %v5072_v28 = vld [vmem:[#allocation2] sm:$0x7f] }
0x1642   :  { %v2393_v33 = vadd.f32 %v2389_v2, %v2239_v37  ;;  %v2552_v50 = vsel %vm130_vm0, %v5028_v1, 0.0 }
0x1643   :  { %2553 = vadd.xlane.f32.xlu1 %v2552_v50  ;;  %2659 = vmatpush.msrb.mxu1 %v3719_v29  ;;  %v2628_v29 = vperm.slane %v5072_v28, 4 }
0x1644   :  { %v2546_v56 = vadd.f32 %v2542_v7, %v2393_v33 }
0x1645   :  { %2660 = vmatpush.msrb.mxu1 %v3718_v47 }
0x1646   :  { %v2549_v54 = vadd.f32 %v2547_v31, %v2546_v56 }
0x1647   :  { %2661 = vmatpush.msrb.mxu1 %v3717_v38 }
0x1648   :  { %v5033_v41 = vadd.f32 %v2549_v54, %v4844_v55 }
0x164a   :  { %v2555_v12 = vsel %vm130_vm0, %v5033_v41, 0.0 }
0x164b   :  { %2556 = vadd.xlane.f32.xlu0 %v2555_v12 }
0x165f   :  { %3880 = vrot.lane.b32.xlu0 %v3879_v48, %s4267_s29 }
0x16b6   :  { %v2554_v0 = vpop.xlane.xlu1 %2553 }
0x16b7   :  { %v2558_v34 = vmul.f32 %v2554_v0, %v4385_v10 }
0x16b9   :  { %v5045_v55 = vsub.f32 %v5028_v1, %v2558_v34  ;;  %v4099_v34 = vld [vmem:[%s5325_s1] sm:$0xff] }
0x16bb   :  { %v2562_v43 = vmul.f32 %v5045_v55, %v5045_v55 }
0x16bd   :  { %v2564_v45 = vsel %vm130_vm0, %v2562_v43, 0.0 }
0x16be   :  { %2565 = vadd.xlane.f32.xlu2 %v2564_v45  ;;  %v2557_v46 = vpop.xlane.xlu0 %2556 }
0x16bf   :  { %v2559_v14 = vmul.f32 %v2557_v46, %v4385_v10  ;;  %v5083_v46 = vld [vmem:[%s5329_s5] sm:$0x7f] }
0x16c1   :  { %v5058_v51 = vsub.f32 %v5033_v41, %v2559_v14  ;;  %v2631_v14 = vperm.slane %v5083_v46, 4 }
0x16c3   :  { %v2563_v52 = vmul.f32 %v5058_v51, %v5058_v51 }
0x16c5   :  { %v2567_v15 = vsel %vm130_vm0, %v2563_v52, 0.0 }
0x16c6   :  { %2568 = vadd.xlane.f32.xlu1 %v2567_v15 }
0x16d1   :  { %v3881_v49 = vpop.permute.xlu0 %3880 }
0x16d2   :  { %v3882_v32 = vunpack.i.l.bf16 %v3881_v49  ;;  %v3883_v50 = vunpack.i.h.bf16 %v3881_v49 }
0x16d6   :  { %2686 = vrot.lane.b32.xlu2 %v5068_v6, %s4267_s29 }
0x16df   :  { %3875 = vrot.lane.b32.xlu1 %v3874_v57, %s4267_s29 }
0x1731   :  { %v2566_v30 = vpop.xlane.xlu2 %2565 }
0x1732   :  { %v2570_v44 = vmul.f32 %v2566_v30, %v4401_v27 }
0x1734   :  { %4036 = vrsqrt.f32 %v2570_v44  ;;  %vm2579_vm8 = vcmp.eq.f32.partialorder %v2570_v44, inf  ;;  %v2582_v36 = vand.u32 2147483648, %v2570_v44  ;;  %vm2581_vm9 = vcmp.eq.f32.partialorder %v2570_v44, 0.0 }
0x1739   :  { %v2569_v5 = vpop.xlane.xlu1 %2568 }
0x173a   :  { %v4037_v59 = vpop.eup %4036  ;;  %v2571_v60 = vmul.f32 %v2569_v5, %v4401_v27  ;;  %v4101_v5 = vld [vmem:[%s5325_s1 + $0x8] sm:$0xff] }
0x173b   :  { %v2573_v18 = vmul.f32 %v4037_v59, %v2570_v44 }
0x173c   :  { %4038 = vrsqrt.f32 %v2571_v60  ;;  %vm2591_vm10 = vcmp.eq.f32.partialorder %v2571_v60, inf  ;;  %v2594_v19 = vand.u32 2147483648, %v2571_v60  ;;  %vm2593_vm11 = vcmp.eq.f32.partialorder %v2571_v60, 0.0 }
0x173d   :  { %v2574_v62 = vmul.f32 %v4037_v59, %v2573_v18 }
0x173f   :  { %v2575_v63 = vmul.f32 0.5, %v2574_v62 }
0x1741   :  { %v2576_v3 = vsub.f32 1.5, %v2575_v63 }
0x1742   :  { %v4039_v58 = vpop.eup %4038 }
0x1743   :  { %v2577_v22 = vmul.f32 %v4037_v59, %v2576_v3  ;;  %v2585_v9 = vmul.f32 %v4039_v58, %v2571_v60  ;;  %v2687_v3 = vpop.permute.xlu2 %2686 }
0x1745   :  { %v2578_v11 = vmul.f32 %v2577_v22, %v2570_v44  ;;  %v2586_v20 = vmul.f32 %v4039_v58, %v2585_v9 }
0x1747   :  { %v2580_v53 = vsel %vm2579_vm8, %v2570_v44, %v2578_v11  ;;  %v2587_v61 = vmul.f32 0.5, %v2586_v20 }
0x1748   :  { %v2583_v16 = vsel %vm2581_vm9, %v2582_v36, %v2580_v53 }
0x1749   :  { %v2596_v42 = vadd.f32 1e-06, %v2583_v16  ;;  %v2588_v4 = vsub.f32 1.5, %v2587_v61  ;;  %v5102_v61 = vld [vmem:[%s5327_s3] sm:$0xff] }
0x174b   :  { %4040 = vrcp.f32 %v2596_v42  ;;  %v2589_v17 = vmul.f32 %v4039_v58, %v2588_v4  ;;  %v2609_v37 = vand.u32 2147483648, %v2596_v42  ;;  %v2607_v33 = vand.u32 2147483647, %v2596_v42 }
0x174c   :  { %vm2603_vm14 = vweird.f32 %v2596_v42 }
0x174d   :  { %v2590_v39 = vmul.f32 %v2589_v17, %v2571_v60  ;;  %v2610_v54 = vor.u32 1.1754944e-38, %v2609_v37  ;;  %vm2608_vm3 = vcmp.eq.f32.partialorder %v2607_v33, 8.507059e+37  ;;  %v5109_v17 = vld [vmem:[%s5327_s3 + $0x8] sm:$0xff] }
0x174f   :  { %v2592_v40 = vsel %vm2591_vm10, %v2571_v60, %v2590_v39 }
0x1750   :  { %v2595_v21 = vsel %vm2593_vm11, %v2594_v19, %v2592_v40 }
0x1751   :  { %v4041_v23 = vpop.eup %4040  ;;  %v3876_v24 = vpop.permute.xlu1 %3875  ;;  %v2597_v8 = vadd.f32 1e-06, %v2595_v21 }
0x1752   :  { %v3877_v13 = vunpack.i.l.bf16 %v3876_v24  ;;  %v2599_v31 = vmul.f32 %v4041_v23, %v2596_v42  ;;  %v3878_v25 = vunpack.i.h.bf16 %v3876_v24  ;;  %vm2604_vm13 = vweird.f32 %v4041_v23 }
0x1753   :  { %4042 = vrcp.f32 %v2597_v8  ;;  %vm2605_vm2 = vmor %vm2603_vm14, %vm2604_vm13  ;;  %v2623_v47 = vand.u32 2147483648, %v2597_v8  ;;  %v2621_v15 = vand.u32 2147483647, %v2597_v8  ;;  %vm2617_vm5 = vweird.f32 %v2597_v8 }
0x1754   :  { %2701 = vmatpush.msrb.mxu3 %v3877_v13  ;;  %v2600_v35 = vsub.f32 1.0, %v2599_v31 }
0x1755   :  { %v2624_v44 = vor.u32 1.1754944e-38, %v2623_v47  ;;  %vm2622_vm7 = vcmp.eq.f32.partialorder %v2621_v15, 8.507059e+37 }
0x1756   :  { %2702 = vmatpush.msrb.mxu3 %v3878_v25  ;;  %v2601_v2 = vmul.f32 %v4041_v23, %v2600_v35 }
0x1758   :  { %2703 = vmatpush.msrb.mxu3 %v3882_v32  ;;  %v2602_v7 = vadd.f32 %v4041_v23, %v2601_v2 }
0x1759   :  { %v4043_v56 = vpop.eup %4042 }
0x175a   :  { %2704 = vmatpush.msrb.mxu3 %v3883_v50  ;;  %v2606_v12 = vsel %vm2605_vm2, %v4041_v23, %v2602_v7  ;;  %v2613_v0 = vmul.f32 %v4043_v56, %v2597_v8  ;;  %vm2618_vm4 = vweird.f32 %v4043_v56 }
0x175b   :  { %3723 = vmatmul.msk.f32.vlgmr.msrb.gmra.mxu3 %vm130_vm0, %v4099_v34  ;;  %v2611_v43 = vsel %vm2608_vm3, %v2610_v54, %v2606_v12  ;;  %vm2619_vm6 = vmor %vm2617_vm5, %vm2618_vm4  ;;  %v3725_v12 = vld [vmem:[%s5332_s8 + $0x60] sm:$0xff] }
0x175c   :  { %v2626_v45 = vmul.f32 %v2611_v43, %v5045_v55  ;;  %v2614_v38 = vsub.f32 1.0, %v2613_v0 }
0x175e   :  { %v2629_v48 = vmul.f32 %v2628_v29, %v2626_v45  ;;  %v2615_v52 = vmul.f32 %v4043_v56, %v2614_v38 }
0x1760   :  { %v2632_v57 = vadd.f32 %v2631_v14, %v2629_v48  ;;  %v2616_v30 = vadd.f32 %v4043_v56, %v2615_v52 }
0x1762   :  { %3721 = vmatmul.msk.f32.vlgmr.msrb.gmra.mxu1 %vm130_vm0, %v2632_v57  ;;  %v2620_v55 = vsel %vm2619_vm6, %v4043_v56, %v2616_v30 }
0x1763   :  { %3724 = vmatmul.msk.f32.gmra.mxu3 %vm130_vm0, %v4101_v5  ;;  %v2625_v59 = vsel %vm2622_vm7, %v2624_v44, %v2620_v55 }
0x1764   :  { %v2627_v60 = vmul.f32 %v2625_v59, %v5058_v51 }
0x1766   :  { %v2630_v18 = vmul.f32 %v2628_v29, %v2627_v60 }
0x1768   :  { %v2633_v62 = vadd.f32 %v2631_v14, %v2630_v18 }
0x176a   :  { %3722 = vmatmul.msk.f32.gmra.mxu1 %vm130_vm0, %v2633_v62 }
0x17de   :  { %v2706_v63 = vpop.f32.mrf.mxu3 }
0x17df   :  { %v2663_v9 = vpop.f32.mrf.mxu1  ;;  %v2707_v11 = vadd.f32 %v2706_v63, %v2687_v3 }
0x17e0   :  { %v2664_v20 = vadd.f32 %v2663_v9, %v5068_v6 }
0x17e6   :  { %v2709_v58 = vpop.f32.mrf.mxu3 }
0x17e7   :  { %v2710_v22 = vadd.f32 %v2709_v58, %v2687_v3  ;;  %v2666_v36 = vpop.f32.mrf.mxu1 }
0x17e8   :  { %v2667_v51 = vadd.f32 %v2666_v36, %v5068_v6 }
0x17e9   :  { %3729 = vmatpush.xpose.msk.msrb.mxu2 %vm271_vm15, %v2710_v22  ;;  %v5113_v19 = vpack.i.bf16 %v2707_v11, %v2710_v22 }
0x17ed   :  { %3730 = vmatpush.xpose.msk.msrb.mxu2 %vm271_vm15, %v2707_v11 }
0x17f0   :  { %3731 = vmatmul.msk.f32.vlgmr.msrb.gmra.mxu2 %vm271_vm15, %v2664_v20 }
0x17f8   :  { %3732 = vmatmul.msk.f32.gmra.mxu2 %vm271_vm15, %v2667_v51 }
0x1873   :  { %v2746_v53 = vpop.f32.mrf.mxu2 }
0x1874   :  { %v2747_v16 = vadd.f32 %v5102_v61, %v2746_v53 }
0x1876   :  { %v2752_v42 = vsel %vm303_vm1, %v2747_v16, -inf }
0x1877   :  { %2753 = vmax.xlane.f32.xlu0 %v2752_v42 }
0x187b   :  { %v2749_v4 = vpop.f32.mrf.mxu2 }
0x187c   :  { %v2750_v6 = vadd.f32 %v5109_v17, %v2749_v4 }
0x187e   :  { %v2755_v39 = vsel %vm303_vm1, %v2750_v6, -inf }
0x187f   :  { %2756 = vmax.xlane.f32.xlu1 %v2755_v39 }
0x1898   :  { %3885 = vrot.lane.b32.xlu1 %v5113_v19, %s4267_s29 }
0x18a0   :  { %2835 = vrot.lane.b32.xlu1 %v2664_v20, %s4270_s18 }
0x18a8   :  { %3019 = vrot.lane.b32.xlu1 %v2707_v11, %s4272_s19 }
0x18b0   :  { %3172 = vrot.lane.b32.xlu1 %v2707_v11, %s4273_s13 }
0x18b8   :  { %3170 = vrot.lane.b32.xlu1 %v2667_v51, %s4273_s13 }
0x18ea   :  { %v2754_v40 = vpop.xlane.xlu0 %2753 }
0x18eb   :  { %v2758_v21 = vsub.f32 %v2747_v16, %v2754_v40 }
0x18ed   :  { %v2760_v23 = vmul.f32 1.442695, %v2758_v21 }
0x18ef   :  { %4044 = vpow2.f32 %v2760_v23 }
0x18f2   :  { %v2757_v24 = vpop.xlane.xlu1 %2756 }
0x18f3   :  { %v2759_v49 = vsub.f32 %v2750_v6, %v2757_v24 }
0x18f5   :  { %v4045_v8 = vpop.eup %4044  ;;  %v2762_v13 = vmul.f32 1.442695, %v2759_v49 }
0x18f6   :  { %v2764_v31 = vsel %vm303_vm1, %v4045_v8, 0.0 }
0x18f7   :  { %4046 = vpow2.f32 %v2762_v13  ;;  %2765 = vadd.xlane.f32.xlu2 %v2764_v31 }
0x18fd   :  { %v4047_v25 = vpop.eup %4046 }
0x18fe   :  { %v2767_v32 = vsel %vm303_vm1, %v4047_v25, 0.0 }
0x18ff   :  { %2768 = vadd.xlane.f32.xlu0 %v2767_v32 }
0x190a   :  { %v3886_v35 = vpop.permute.xlu1 %3885 }
0x190b   :  { %v3887_v37 = vunpack.i.l.bf16 %v3886_v35  ;;  %v3888_v2 = vunpack.i.h.bf16 %v3886_v35 }
0x190d   :  { %2826 = vmatpush.msrb.mxu0 %v3887_v37 }
0x190f   :  { %2827 = vmatpush.msrb.mxu0 %v3888_v2  ;;  %2841 = vrot.lane.b32.xlu2 %v2710_v22, %s4270_s18 }
0x1911   :  { %3007 = vmatpush.msra.mxu0 %v3725_v12 }
0x1912   :  { %v2836_v63 = vpop.permute.xlu1 %2835 }
0x1913   :  { %2839 = vrot.lane.b32.xlu0 %v2707_v11, %s4270_s18 }
0x1917   :  { %2837 = vrot.lane.b32.xlu2 %v2667_v51, %s4270_s18 }
0x191a   :  { %v3020_v9 = vpop.permute.xlu1 %3019 }
0x191b   :  { %3021 = vrot.lane.b32.xlu0 %v2710_v22, %s4272_s19 }
0x191f   :  { %3015 = vrot.lane.b32.xlu2 %v2664_v20, %s4272_s19 }
0x1922   :  { %v3173_v36 = vpop.permute.xlu1 %3172 }
0x1923   :  { %3174 = vrot.lane.b32.xlu0 %v2710_v22, %s4273_s13 }
0x1927   :  { %3017 = vrot.lane.b32.xlu2 %v2667_v51, %s4272_s19  ;;  %s4278_s19 = smov [#allocation11]  }
0x192a   :  { %v3171_v24 = vpop.permute.xlu1 %3170 }
0x192b   :  { %3168 = vrot.lane.b32.xlu0 %v2664_v20, %s4273_s13 }
0x196a   :  { %v2766_v33 = vpop.xlane.xlu2 %2765 }
0x196b   :  { %4048 = vrcp.f32 %v2766_v33  ;;  %v2781_v0 = vand.u32 2147483648, %v2766_v33  ;;  %v2779_v43 = vand.u32 2147483647, %v2766_v33  ;;  %vm2775_vm9 = vweird.f32 %v2766_v33 }
0x196d   :  { %v2782_v38 = vor.u32 1.1754944e-38, %v2781_v0  ;;  %vm2780_vm11 = vcmp.eq.f32.partialorder %v2779_v43, 8.507059e+37 }
0x1971   :  { %v4049_v50 = vpop.eup %4048 }
0x1972   :  { %v2771_v7 = vmul.f32 %v4049_v50, %v2766_v33  ;;  %v2842_v56 = vpop.permute.xlu2 %2841  ;;  %v2769_v54 = vpop.xlane.xlu0 %2768  ;;  %vm2776_vm8 = vweird.f32 %v4049_v50 }
0x1973   :  { %4050 = vrcp.f32 %v2769_v54  ;;  %3735 = vmatpush.xpose.msk.msra.mxu1 %vm271_vm15, %v2842_v56  ;;  %vm2777_vm10 = vmor %vm2775_vm9, %vm2776_vm8  ;;  %v2795_v30 = vand.u32 2147483648, %v2769_v54  ;;  %v2793_v55 = vand.u32 2147483647, %v2769_v54  ;;  %vm2789_vm14 = vweird.f32 %v2769_v54 }
0x1974   :  { %v2772_v29 = vsub.f32 1.0, %v2771_v7 }
0x1975   :  { %v2796_v59 = vor.u32 1.1754944e-38, %v2795_v30  ;;  %vm2794_vm3 = vcmp.eq.f32.partialorder %v2793_v55, 8.507059e+37 }
0x1976   :  { %v2773_v34 = vmul.f32 %v4049_v50, %v2772_v29 }
0x1978   :  { %v2774_v45 = vadd.f32 %v4049_v50, %v2773_v34 }
0x1979   :  { %v4051_v14 = vpop.eup %4050 }
0x197a   :  { %v2778_v47 = vsel %vm2777_vm10, %v4049_v50, %v2774_v45  ;;  %v2785_v48 = vmul.f32 %v4051_v14, %v2769_v54  ;;  %vm2790_vm13 = vweird.f32 %v4051_v14  ;;  %v2838_v58 = vpop.permute.xlu2 %2837 }
0x197b   :  { %v2783_v52 = vsel %vm2780_vm11, %v2782_v38, %v2778_v47  ;;  %vm2791_vm2 = vmor %vm2789_vm14, %vm2790_vm13 }
0x197c   :  { %v2786_v15 = vsub.f32 1.0, %v2785_v48  ;;  %v2798_v57 = vmul.f32 %v4045_v8, %v2783_v52 }
0x197e   :  { %v2787_v44 = vmul.f32 %v4051_v14, %v2786_v15  ;;  %3733 = vmatmul.msk.f32.vlgmr.msrb.gmra.mxu0 %vm303_vm1, %v2798_v57 }
0x1980   :  { %v2788_v5 = vadd.f32 %v4051_v14, %v2787_v44 }
0x1982   :  { %v2792_v60 = vsel %vm2791_vm2, %v4051_v14, %v2788_v5  ;;  %v3016_v20 = vpop.permute.xlu2 %3015 }
0x1983   :  { %v2797_v18 = vsel %vm2794_vm3, %v2796_v59, %v2792_v60 }
0x1984   :  { %v2799_v62 = vmul.f32 %v4047_v25, %v2797_v18 }
0x1985   :  { %v2840_v3 = vpop.permute.xlu0 %2839 }
0x1986   :  { %3734 = vmatmul.msk.f32.gmra.mxu0 %vm303_vm1, %v2799_v62  ;;  %3736 = vmatpush.xpose.msk.msra.mxu1 %vm271_vm15, %v2840_v3 }
0x1989   :  { %3737 = vmatmul.msk.f32.vlgmr.msra.gmra.mxu1 %vm271_vm15, %v2836_v63 }
0x198a   :  { %v3018_v51 = vpop.permute.xlu2 %3017 }
0x198d   :  { %v3022_v22 = vpop.permute.xlu0 %3021 }
0x198e   :  { %3745 = vmatpush.xpose.msk.msrb.mxu1 %vm271_vm15, %v3022_v22 }
0x1991   :  { %3738 = vmatmul.msk.f32.gmra.mxu1 %vm271_vm15, %v2838_v58 }
0x1992   :  { %3746 = vmatpush.xpose.msk.msrb.mxu1 %vm271_vm15, %v3020_v9 }
0x1995   :  { %v3175_v11 = vpop.permute.xlu0 %3174 }
0x1996   :  { %3753 = vmatpush.xpose.msk.msrb.mxu0 %vm271_vm15, %v3175_v11 }
0x1999   :  { %3747 = vmatmul.msk.f32.vlgmr.msrb.gmra.mxu1 %vm271_vm15, %v3016_v20 }
0x199a   :  { %3754 = vmatpush.xpose.msk.msrb.mxu0 %vm271_vm15, %v3173_v36 }
0x199d   :  { %v3169_v39 = vpop.permute.xlu0 %3168 }
0x19a1   :  { %3748 = vmatmul.msk.f32.gmra.mxu1 %vm271_vm15, %v3018_v51 }
0x19fb   :  { %v2829_v53 = vpop.f32.mrf.mxu0 }
0x19fc   :  { %3743 = vmatmul.msk.f32.vlgmr.msra.gmra.mxu0 %vm271_vm15, %v2829_v53 }
0x1a03   :  { %v2832_v16 = vpop.f32.mrf.mxu0 }
0x1a04   :  { %3744 = vmatmul.msk.f32.gmra.mxu0 %vm271_vm15, %v2832_v16 }
0x1a06   :  { %v2868_v42 = vpop.f32.mrf.mxu1 }
0x1a07   :  { %v2869_v4 = vadd.f32 %v5102_v61, %v2868_v42 }
0x1a09   :  { %v2874_v6 = vsel %vm303_vm1, %v2869_v4, -inf }
0x1a0a   :  { %2875 = vmax.xlane.f32.xlu2 %v2874_v6 }
0x1a0c   :  { %3755 = vmatmul.msk.f32.vlgmr.msrb.gmra.mxu0 %vm271_vm15, %v3169_v39 }
0x1a0e   :  { %v2871_v40 = vpop.f32.mrf.mxu1 }
0x1a0f   :  { %v2872_v21 = vadd.f32 %v5109_v17, %v2871_v40 }
0x1a11   :  { %v2877_v23 = vsel %vm303_vm1, %v2872_v21, -inf }
0x1a12   :  { %2878 = vmax.xlane.f32.xlu0 %v2877_v23 }
0x1a14   :  { %3756 = vmatmul.msk.f32.gmra.mxu0 %vm271_vm15, %v3171_v24 }
0x1a16   :  { %v3048_v49 = vpop.f32.mrf.mxu1 }
0x1a17   :  { %v3049_v8 = vadd.f32 %v5102_v61, %v3048_v49 }
0x1a19   :  { %v3054_v13 = vsel %vm303_vm1, %v3049_v8, -inf }
0x1a1a   :  { %3055 = vmax.xlane.f32.xlu1 %v3054_v13 }
0x1a1e   :  { %v3051_v31 = vpop.f32.mrf.mxu1 }
0x1a1f   :  { %v3052_v25 = vadd.f32 %v5109_v17, %v3051_v31 }
0x1a21   :  { %v3057_v32 = vsel %vm303_vm1, %v3052_v25, -inf }
0x1a22   :  { %3058 = vmax.xlane.f32.xlu2 %v3057_v32 }
0x1a79   :  { %v5158_v35 = vpop.f32.mrf.mxu0 }
0x1a7d   :  { %v2876_v37 = vpop.xlane.xlu2 %2875 }
0x1a7e   :  { %v2880_v2 = vsub.f32 %v2869_v4, %v2876_v37 }
0x1a80   :  { %v2882_v33 = vmul.f32 1.442695, %v2880_v2 }
0x1a81   :  { %v5160_v50 = vpop.f32.mrf.mxu0 }
0x1a82   :  { %4052 = vpow2.f32 %v2882_v33 }
0x1a85   :  { %v2879_v7 = vpop.xlane.xlu0 %2878 }
0x1a86   :  { %v2881_v56 = vsub.f32 %v2872_v21, %v2879_v7 }
0x1a88   :  { %v5162_v54 = vpop.eup %4052  ;;  %v2884_v12 = vmul.f32 1.442695, %v2881_v56 }
0x1a89   :  { %v3201_v29 = vpop.f32.mrf.mxu0  ;;  %v2886_v0 = vsel %vm303_vm1, %v5162_v54, 0.0 }
0x1a8a   :  { %v3202_v34 = vadd.f32 %v5102_v61, %v3201_v29  ;;  %2887 = vadd.xlane.f32.xlu1 %v2886_v0  ;;  %4054 = vpow2.f32 %v2884_v12 }
0x1a8c   :  { %v3207_v43 = vsel %vm303_vm1, %v3202_v34, -inf }
0x1a8d   :  { %v3056_v45 = vpop.xlane.xlu1 %3055  ;;  %3208 = vmax.xlane.f32.xlu0 %v3207_v43 }
0x1a8e   :  { %v3060_v14 = vsub.f32 %v3049_v8, %v3056_v45 }
0x1a90   :  { %v3062_v38 = vmul.f32 1.442695, %v3060_v14  ;;  %v5168_v47 = vpop.eup %4054 }
0x1a91   :  { %v3204_v48 = vpop.f32.mrf.mxu0  ;;  %v2889_v57 = vsel %vm303_vm1, %v5168_v47, 0.0 }
0x1a92   :  { %v3205_v52 = vadd.f32 %v5109_v17, %v3204_v48  ;;  %4056 = vpow2.f32 %v3062_v38 }
0x1a94   :  { %v3210_v15 = vsel %vm303_vm1, %v3205_v52, -inf }
0x1a95   :  { %v3059_v61 = vpop.xlane.xlu2 %3058  ;;  %3211 = vmax.xlane.f32.xlu2 %v3210_v15  ;;  %2890 = vadd.xlane.f32.xlu0 %v2889_v57 }
0x1a96   :  { %v3061_v30 = vsub.f32 %v3052_v25, %v3059_v61 }
0x1a98   :  { %v3064_v44 = vmul.f32 1.442695, %v3061_v30  ;;  %v5174_v55 = vpop.eup %4056 }
0x1a99   :  { %v3066_v5 = vsel %vm303_vm1, %v5174_v55, 0.0 }
0x1a9a   :  { %4058 = vpow2.f32 %v3064_v44 }
0x1a9d   :  { %3067 = vadd.xlane.f32.xlu2 %v3066_v5 }
0x1aa0   :  { %v5178_v59 = vpop.eup %4058 }
0x1aa1   :  { %v3069_v17 = vsel %vm303_vm1, %v5178_v59, 0.0 }
0x1aa2   :  { %3070 = vadd.xlane.f32.xlu0 %v3069_v17 }
0x1aa3   :  { %3890 = vrot.lane.b32.xlu1 %v5113_v19, %s4269_s4 }
0x1afd   :  { %v2888_v60 = vpop.xlane.xlu1 %2887 }
0x1afe   :  { %4060 = vrcp.f32 %v2888_v60  ;;  %v2903_v6 = vand.u32 2147483648, %v2888_v60  ;;  %vm2897_vm5 = vweird.f32 %v2888_v60  ;;  %v2901_v40 = vand.u32 2147483647, %v2888_v60 }
0x1b00   :  { %v3209_v18 = vpop.xlane.xlu0 %3208  ;;  %v2904_v49 = vor.u32 1.1754944e-38, %v2903_v6  ;;  %vm2902_vm7 = vcmp.eq.f32.partialorder %v2901_v40, 8.507059e+37 }
0x1b01   :  { %v3213_v62 = vsub.f32 %v3202_v34, %v3209_v18 }
0x1b03   :  { %v3215_v63 = vmul.f32 1.442695, %v3213_v62 }
0x1b04   :  { %v4061_v3 = vpop.eup %4060 }
0x1b05   :  { %v2893_v58 = vmul.f32 %v4061_v3, %v2888_v60  ;;  %4062 = vpow2.f32 %v3215_v63  ;;  %vm2898_vm4 = vweird.f32 %v4061_v3 }
0x1b06   :  { %vm2899_vm6 = vmor %vm2897_vm5, %vm2898_vm4 }
0x1b07   :  { %v2894_v22 = vsub.f32 1.0, %v2893_v58 }
0x1b08   :  { %v3212_v9 = vpop.xlane.xlu2 %3211  ;;  %v2891_v11 = vpop.xlane.xlu0 %2890 }
0x1b09   :  { %v3214_v20 = vsub.f32 %v3205_v52, %v3212_v9  ;;  %4064 = vrcp.f32 %v2891_v11  ;;  %v2895_v51 = vmul.f32 %v4061_v3, %v2894_v22  ;;  %v2917_v2 = vand.u32 2147483648, %v2891_v11 }
0x1b0a   :  { %vm2911_vm9 = vweird.f32 %v2891_v11  ;;  %v2915_v7 = vand.u32 2147483647, %v2891_v11 }
0x1b0b   :  { %v5184_v36 = vpop.eup %4062  ;;  %v3217_v53 = vmul.f32 1.442695, %v3214_v20  ;;  %v2896_v4 = vadd.f32 %v4061_v3, %v2895_v51  ;;  %v2918_v29 = vor.u32 1.1754944e-38, %v2917_v2 }
0x1b0c   :  { %v3219_v16 = vsel %vm303_vm1, %v5184_v36, 0.0  ;;  %vm2916_vm11 = vcmp.eq.f32.partialorder %v2915_v7, 8.507059e+37 }
0x1b0d   :  { %4066 = vpow2.f32 %v3217_v53  ;;  %3220 = vadd.xlane.f32.xlu2 %v3219_v16  ;;  %v2900_v24 = vsel %vm2899_vm6, %v4061_v3, %v2896_v4 }
0x1b0e   :  { %v2905_v25 = vsel %vm2902_vm7, %v2904_v49, %v2900_v24 }
0x1b0f   :  { %v4065_v42 = vpop.eup %4064  ;;  %v2920_v56 = vmul.f32 %v5162_v54, %v2905_v25 }
0x1b10   :  { %v2907_v39 = vmul.f32 %v4065_v42, %v2891_v11  ;;  %vm2912_vm8 = vweird.f32 %v4065_v42  ;;  %v3068_v43 = vpop.xlane.xlu2 %3067 }
0x1b11   :  { %vm2913_vm10 = vmor %vm2911_vm9, %vm2912_vm8  ;;  %4068 = vrcp.f32 %v3068_v43  ;;  %v3083_v30 = vand.u32 2147483648, %v3068_v43  ;;  %vm3077_vm14 = vweird.f32 %v3068_v43  ;;  %v3081_v44 = vand.u32 2147483647, %v3068_v43 }
0x1b12   :  { %v2908_v21 = vsub.f32 1.0, %v2907_v39 }
0x1b13   :  { %v5188_v23 = vpop.eup %4066  ;;  %v3084_v18 = vor.u32 1.1754944e-38, %v3083_v30  ;;  %vm3082_vm3 = vcmp.eq.f32.partialorder %v3081_v44, 8.507059e+37  ;;  %v3321_v44 = vperm.slane %v5023_v26, 3 }
0x1b14   :  { %v2909_v8 = vmul.f32 %v4065_v42, %v2908_v21  ;;  %v3222_v13 = vsel %vm303_vm1, %v5188_v23, 0.0 }
0x1b15   :  { %v3891_v31 = vpop.permute.xlu1 %3890  ;;  %3223 = vadd.xlane.f32.xlu0 %v3222_v13  ;;  %v3071_v54 = vpop.xlane.xlu0 %3070 }
0x1b16   :  { %v3892_v32 = vunpack.i.l.bf16 %v3891_v31  ;;  %v2910_v37 = vadd.f32 %v4065_v42, %v2909_v8  ;;  %v3893_v33 = vunpack.i.h.bf16 %v3891_v31  ;;  %4070 = vrcp.f32 %v3071_v54 }
0x1b17   :  { %v4069_v45 = vpop.eup %4068  ;;  %v3097_v11 = vand.u32 2147483648, %v3071_v54  ;;  %vm3091_vm5 = vweird.f32 %v3071_v54  ;;  %v3095_v53 = vand.u32 2147483647, %v3071_v54 }
0x1b18   :  { %2948 = vmatpush.msra.mxu3 %v3892_v32  ;;  %v2914_v12 = vsel %vm2913_vm10, %v4065_v42, %v2910_v37  ;;  %v3073_v14 = vmul.f32 %v4069_v45, %v3068_v43  ;;  %vm3078_vm13 = vweird.f32 %v4069_v45 }
0x1b19   :  { %v2919_v0 = vsel %vm2916_vm11, %v2918_v29, %v2914_v12  ;;  %vm3079_vm2 = vmor %vm3077_vm14, %vm3078_vm13  ;;  %v3098_v6 = vor.u32 1.1754944e-38, %v3097_v11  ;;  %vm3096_vm7 = vcmp.eq.f32.partialorder %v3095_v53, 8.507059e+37 }
0x1b1a   :  { %2949 = vmatpush.msra.mxu3 %v3893_v33  ;;  %v2921_v34 = vmul.f32 %v5168_v47, %v2919_v0  ;;  %v3074_v38 = vsub.f32 1.0, %v3073_v14  ;;  %v3726_v47 = vld [vmem:[%s5332_s8 + $0x68] sm:$0xff] }
0x1b1b   :  { %3739 = vmatmul.msk.f32.vlgmr.msra.gmra.mxu3 %vm303_vm1, %v2920_v56  ;;  %2978 = vmatpush.msra.mxu2 %v3726_v47 }
0x1b1c   :  { %v4071_v48 = vpop.eup %4070  ;;  %v3075_v52 = vmul.f32 %v4069_v45, %v3074_v38  ;;  %v3728_v38 = vld [vmem:[%s5332_s8 + $0x78] sm:$0xff] }
0x1b1d   :  { %v3087_v15 = vmul.f32 %v4071_v48, %v3071_v54  ;;  %vm3092_vm4 = vweird.f32 %v4071_v48 }
0x1b1e   :  { %v3076_v61 = vadd.f32 %v4069_v45, %v3075_v52  ;;  %vm3093_vm6 = vmor %vm3091_vm5, %vm3092_vm4 }
0x1b20   :  { %v3080_v5 = vsel %vm3079_vm2, %v4069_v45, %v3076_v61 }
0x1b21   :  { %v3085_v3 = vsel %vm3082_vm3, %v3084_v18, %v3080_v5 }
0x1b22   :  { %v3100_v51 = vmul.f32 %v5174_v55, %v3085_v3 }
0x1b23   :  { %3740 = vmatmul.msk.f32.gmra.mxu3 %vm303_vm1, %v2921_v34 }
0x1b25   :  { %3895 = vrot.lane.b32.xlu2 %v5113_v19, %s4271_s9 }
0x1b29   :  { %3900 = vrot.lane.b32.xlu0 %v5113_v19, %s4274_s20  ;;  %v3088_v19 = vsub.f32 1.0, %v3087_v15 }
0x1b2b   :  { %v3089_v17 = vmul.f32 %v4071_v48, %v3088_v19 }
0x1b2d   :  { %v3090_v9 = vadd.f32 %v4071_v48, %v3089_v17 }
0x1b2f   :  { %v3094_v42 = vsel %vm3093_vm6, %v4071_v48, %v3090_v9 }
0x1b30   :  { %v3099_v21 = vsel %vm3096_vm7, %v3098_v6, %v3094_v42 }
0x1b31   :  { %v3101_v24 = vmul.f32 %v5178_v59, %v3099_v21  ;;  %v3764_v21 = vld [vmem:[%s5334_s10 + $0x38] sm:$0xff] }
0x1b80   :  { %v3221_v57 = vpop.xlane.xlu2 %3220 }
0x1b81   :  { %4072 = vrcp.f32 %v3221_v57  ;;  %v3236_v55 = vand.u32 2147483648, %v3221_v57  ;;  %vm3230_vm9 = vweird.f32 %v3221_v57  ;;  %v3234_v13 = vand.u32 2147483647, %v3221_v57 }
0x1b83   :  { %v3237_v32 = vor.u32 1.1754944e-38, %v3236_v55  ;;  %vm3235_vm11 = vcmp.eq.f32.partialorder %v3234_v13, 8.507059e+37 }
0x1b87   :  { %v4073_v60 = vpop.eup %4072 }
0x1b88   :  { %v3896_v62 = vpop.permute.xlu2 %3895  ;;  %v3224_v63 = vpop.xlane.xlu0 %3223  ;;  %v3226_v58 = vmul.f32 %v4073_v60, %v3221_v57  ;;  %vm3231_vm8 = vweird.f32 %v4073_v60 }
0x1b89   :  { %v3897_v22 = vunpack.i.l.bf16 %v3896_v62  ;;  %4074 = vrcp.f32 %v3224_v63  ;;  %v3898_v20 = vunpack.i.h.bf16 %v3896_v62  ;;  %vm3232_vm10 = vmor %vm3230_vm9, %vm3231_vm8  ;;  %v3250_v56 = vand.u32 2147483648, %v3224_v63 }
0x1b8a   :  { %v3227_v16 = vsub.f32 1.0, %v3226_v58  ;;  %vm3244_vm14 = vweird.f32 %v3224_v63  ;;  %v3248_v0 = vand.u32 2147483647, %v3224_v63 }
0x1b8b   :  { %3128 = vmatpush.msrb.mxu3 %v3897_v22  ;;  %v3251_v43 = vor.u32 1.1754944e-38, %v3250_v56 }
0x1b8c   :  { %v3228_v39 = vmul.f32 %v4073_v60, %v3227_v16  ;;  %vm3249_vm3 = vcmp.eq.f32.partialorder %v3248_v0, 8.507059e+37 }
0x1b8d   :  { %3129 = vmatpush.msrb.mxu3 %v3898_v20 }
0x1b8e   :  { %3749 = vmatmul.msk.f32.vlgmr.msrb.gmra.mxu3 %vm303_vm1, %v3100_v51  ;;  %v3229_v49 = vadd.f32 %v4073_v60, %v3228_v39 }
0x1b8f   :  { %v4075_v4 = vpop.eup %4074  ;;  %3311 = vmatpush.msra.mxu3 %v3728_v38 }
0x1b90   :  { %v3240_v40 = vmul.f32 %v4075_v4, %v3224_v63  ;;  %v3233_v31 = vsel %vm3232_vm10, %v4073_v60, %v3229_v49  ;;  %vm3245_vm13 = vweird.f32 %v4075_v4  ;;  %v3762_v49 = vld [vmem:[%s5334_s10 + $0x28] sm:$0xff] }
0x1b91   :  { %v3238_v2 = vsel %vm3235_vm11, %v3237_v32, %v3233_v31  ;;  %vm3246_vm2 = vmor %vm3244_vm14, %vm3245_vm13 }
0x1b92   :  { %v3241_v8 = vsub.f32 1.0, %v3240_v40  ;;  %v3253_v29 = vmul.f32 %v5184_v36, %v3238_v2  ;;  %v3727_v36 = vld [vmem:[%s5332_s8 + $0x70] sm:$0xff]  ;;  %s3578_s8 = sshll.u32 %s5338_s14, 4  ;;  %s3579_s8 = int_to_ptr.hbm [resolvable:$true] %s3578_s8 }
0x1b93   :  { %3158 = vmatpush.msrb.mxu2 %v3727_v36  ;;  %v3773_v36 = vld [vmem:[%s5336_s12 + $0x70] sm:$0xff] }
0x1b94   :  { %v3242_v25 = vmul.f32 %v4075_v4, %v3241_v8  ;;  %v3761_v8 = vld [vmem:[%s5334_s10 + $0x20] sm:$0xff] }
0x1b96   :  { %3750 = vmatmul.msk.f32.gmra.mxu3 %vm303_vm1, %v3101_v24  ;;  %v3243_v7 = vadd.f32 %v4075_v4, %v3242_v25  ;;  %v3763_v24 = vld [vmem:[%s5334_s10 + $0x30] sm:$0xff] }
0x1b98   :  { %v3247_v34 = vsel %vm3246_vm2, %v4075_v4, %v3243_v7 }
0x1b99   :  { %v3252_v54 = vsel %vm3249_vm3, %v3251_v43, %v3247_v34 }
0x1b9a   :  { %v3254_v14 = vmul.f32 %v5188_v23, %v3252_v54 }
0x1b9b   :  { %v3901_v37 = vpop.permute.xlu0 %3900 }
0x1b9c   :  { %v3902_v33 = vunpack.i.l.bf16 %v3901_v37  ;;  %v3903_v59 = vunpack.i.h.bf16 %v3901_v37 }
0x1b9e   :  { %v2951_v12 = vpop.f32.mrf.mxu3  ;;  %3281 = vmatpush.msra.mxu1 %v3902_v33 }
0x1b9f   :  { %3741 = vmatmul.msk.f32.vlgmr.msra.gmra.mxu2 %vm271_vm15, %v2951_v12 }
0x1ba0   :  { %3282 = vmatpush.msra.mxu1 %v3903_v59  ;;  %3432 = vmatpush.msra.mxu2 %v3764_v21 }
0x1ba1   :  { %3757 = vmatmul.msk.f32.vlgmr.msra.gmra.mxu1 %vm303_vm1, %v3253_v29 }
0x1ba2   :  { %3433 = vmatpush.msra.mxu2 %v3763_v24 }
0x1ba4   :  { %3434 = vmatpush.msra.mxu2 %v3762_v49  ;;  %v3769_v49 = vld [vmem:[%s5336_s12 + $0x50] sm:$0xff] }
0x1ba6   :  { %v2954_v45 = vpop.f32.mrf.mxu3  ;;  %3435 = vmatpush.msra.mxu2 %v3761_v8  ;;  %v3768_v8 = vld [vmem:[%s5336_s12 + $0x48] sm:$0xff] }
0x1ba7   :  { %3742 = vmatmul.msk.f32.gmra.mxu2 %vm271_vm15, %v2954_v45 }
0x1ba9   :  { %3758 = vmatmul.msk.f32.gmra.mxu1 %vm303_vm1, %v3254_v14  ;;  %v3774_v14 = vld [vmem:[%s5336_s12 + $0x78] sm:$0xff] }
0x1baa   :  { %3468 = vmatpush.msra.mxu0 %v3774_v14 }
0x1bac   :  { %3469 = vmatpush.msra.mxu0 %v3773_v36 }
0x1c11   :  { %v3131_v48 = vpop.f32.mrf.mxu3 }
0x1c12   :  { %3751 = vmatmul.msk.f32.vlgmr.msrb.gmra.mxu2 %vm271_vm15, %v3131_v48  ;;  %v3772_v48 = vld [vmem:[%s5336_s12 + $0x68] sm:$0xff] }
0x1c13   :  { %3470 = vmatpush.msra.mxu0 %v3772_v48 }
0x1c19   :  { %v3134_v52 = vpop.f32.mrf.mxu3 }
0x1c1a   :  { %3752 = vmatmul.msk.f32.gmra.mxu2 %vm271_vm15, %v3134_v52 }
0x1c1e   :  { %v3284_v15 = vpop.f32.mrf.mxu1 }
0x1c1f   :  { %3759 = vmatmul.msk.f32.vlgmr.msra.gmra.mxu3 %vm271_vm15, %v3284_v15 }
0x1c22   :  { %v2980_v47 = vpop.f32.mrf.mxu2 }
0x1c23   :  { %v3010_v19 = vadd.f32 %v5158_v35, %v2980_v47 }
0x1c26   :  { %v3287_v23 = vpop.f32.mrf.mxu1 }
0x1c27   :  { %3760 = vmatmul.msk.f32.gmra.mxu3 %vm271_vm15, %v3287_v23  ;;  %v3771_v23 = vld [vmem:[%s5336_s12 + $0x60] sm:$0xff] }
0x1c28   :  { %3471 = vmatpush.msra.mxu0 %v3771_v23 }
0x1c2a   :  { %v2983_v57 = vpop.f32.mrf.mxu2 }
0x1c2b   :  { %v3013_v62 = vadd.f32 %v5160_v50, %v2983_v57 }
0x1c95   :  { %v3160_v61 = vpop.f32.mrf.mxu2 }
0x1c96   :  { %v3166_v30 = vadd.f32 %v3160_v61, %v3010_v19  ;;  %v3770_v61 = vld [vmem:[%s5336_s12 + $0x58] sm:$0xff] }
0x1c97   :  { %3472 = vmatpush.msra.mxu0 %v3770_v61 }
0x1c99   :  { %3473 = vmatpush.msra.mxu0 %v3769_v49 }
0x1c9b   :  { %3474 = vmatpush.msra.mxu0 %v3768_v8 }
0x1c9d   :  { %v3163_v18 = vpop.f32.mrf.mxu2 }
0x1c9e   :  { %v3167_v3 = vadd.f32 %v3163_v18, %v3013_v62 }
0x1ca2   :  { %v3313_v5 = vpop.f32.mrf.mxu3 }
0x1ca3   :  { %v3319_v17 = vadd.f32 %v3313_v5, %v3166_v30 }
0x1ca5   :  { %v3322_v60 = vadd.f32 %v3321_v44, %v3319_v17 }
0x1ca7   :  { %v5227_v63 = vadd.f32 %v3322_v60, %v5028_v1 }
0x1ca9   :  { %v3326_v58 = vsel %vm130_vm0, %v5227_v63, 0.0 }
0x1caa   :  { %3327 = vadd.xlane.f32.xlu1 %v3326_v58  ;;  %v3316_v22 = vpop.f32.mrf.mxu3 }
0x1cab   :  { %v3320_v9 = vadd.f32 %v3316_v22, %v3167_v3 }
0x1cad   :  { %v3323_v35 = vadd.f32 %v3321_v44, %v3320_v9  ;;  %v3402_v9 = vperm.slane %v5072_v28, 5 }
0x1caf   :  { %v5232_v11 = vadd.f32 %v3323_v35, %v5033_v41 }
0x1cb1   :  { %v3329_v26 = vsel %vm130_vm0, %v5232_v11, 0.0 }
0x1cb2   :  { %3330 = vadd.xlane.f32.xlu0 %v3329_v26 }
0x1d1d   :  { %v3328_v20 = vpop.xlane.xlu1 %3327 }
0x1d1e   :  { %v3332_v50 = vmul.f32 %v3328_v20, %v4385_v10 }
0x1d20   :  { %v5238_v1 = vsub.f32 %v5227_v63, %v3332_v50  ;;  %v3405_v50 = vperm.slane %v5083_v46, 5 }
0x1d22   :  { %v3336_v51 = vmul.f32 %v5238_v1, %v5238_v1 }
0x1d24   :  { %v3338_v53 = vsel %vm130_vm0, %v3336_v51, 0.0 }
0x1d25   :  { %3339 = vadd.xlane.f32.xlu2 %v3338_v53  ;;  %v3331_v16 = vpop.xlane.xlu0 %3330 }
0x1d26   :  { %v3333_v41 = vmul.f32 %v3331_v16, %v4385_v10 }
0x1d28   :  { %v5245_v42 = vsub.f32 %v5232_v11, %v3333_v41 }
0x1d2a   :  { %v3337_v4 = vmul.f32 %v5245_v42, %v5245_v42 }
0x1d2c   :  { %v3341_v6 = vsel %vm130_vm0, %v3337_v4, 0.0 }
0x1d2d   :  { %3342 = vadd.xlane.f32.xlu1 %v3341_v6 }
0x1d98   :  { %v3340_v39 = vpop.xlane.xlu2 %3339 }
0x1d99   :  { %v3344_v40 = vmul.f32 %v3340_v39, %v4401_v27 }
0x1d9b   :  { %4076 = vrsqrt.f32 %v3344_v40  ;;  %vm3353_vm15 = vcmp.eq.f32.partialorder %v3344_v40, inf  ;;  %v3356_v29 = vand.u32 2147483648, %v3344_v40  ;;  %vm3355_vm1 = vcmp.eq.f32.partialorder %v3344_v40, 0.0 }
0x1da0   :  { %v3343_v55 = vpop.xlane.xlu1 %3342 }
0x1da1   :  { %v4077_v13 = vpop.eup %4076  ;;  %v3345_v31 = vmul.f32 %v3343_v55, %v4401_v27  ;;  %v3767_v55 = vld [vmem:[%s5336_s12 + $0x40] sm:$0xff] }
0x1da2   :  { %v3347_v25 = vmul.f32 %v4077_v13, %v3344_v40  ;;  %3475 = vmatpush.msra.mxu0 %v3767_v55 }
0x1da3   :  { %4078 = vrsqrt.f32 %v3345_v31  ;;  %vm3365_vm4 = vcmp.eq.f32.partialorder %v3345_v31, inf  ;;  %v3368_v15 = vand.u32 2147483648, %v3345_v31  ;;  %vm3367_vm5 = vcmp.eq.f32.partialorder %v3345_v31, 0.0 }
0x1da4   :  { %v3348_v32 = vmul.f32 %v4077_v13, %v3347_v25 }
0x1da6   :  { %v3349_v37 = vmul.f32 0.5, %v3348_v32 }
0x1da8   :  { %v3350_v2 = vsub.f32 1.5, %v3349_v37 }
0x1da9   :  { %v4079_v33 = vpop.eup %4078 }
0x1daa   :  { %v3351_v7 = vmul.f32 %v4077_v13, %v3350_v2  ;;  %v3359_v56 = vmul.f32 %v4079_v33, %v3345_v31 }
0x1dac   :  { %v3352_v59 = vmul.f32 %v3351_v7, %v3344_v40  ;;  %v3360_v12 = vmul.f32 %v4079_v33, %v3359_v56  ;;  %v4105_v7 = vld [vmem:[#allocation10] sm:$0x3] }
0x1dad   :  { %v3485_v56 = vperm.slane %v4105_v7, 1 }
0x1dae   :  { %v3354_v0 = vsel %vm3353_vm15, %v3344_v40, %v3352_v59  ;;  %v3361_v34 = vmul.f32 0.5, %v3360_v12 }
0x1daf   :  { %v3357_v43 = vsel %vm3355_vm1, %v3356_v29, %v3354_v0 }
0x1db0   :  { %v3370_v54 = vadd.f32 1e-06, %v3357_v43  ;;  %v3362_v45 = vsub.f32 1.5, %v3361_v34 }
0x1db2   :  { %4080 = vrcp.f32 %v3370_v54  ;;  %v3363_v38 = vmul.f32 %v4079_v33, %v3362_v45  ;;  %v3383_v17 = vand.u32 2147483648, %v3370_v54  ;;  %v3381_v18 = vand.u32 2147483647, %v3370_v54 }
0x1db3   :  { %vm3377_vm7 = vweird.f32 %v3370_v54 }
0x1db4   :  { %v3364_v52 = vmul.f32 %v3363_v38, %v3345_v31  ;;  %v3384_v58 = vor.u32 1.1754944e-38, %v3383_v17  ;;  %vm3382_vm9 = vcmp.eq.f32.partialorder %v3381_v18, 8.507059e+37 }
0x1db6   :  { %v3366_v47 = vsel %vm3365_vm4, %v3345_v31, %v3364_v52 }
0x1db7   :  { %v3369_v57 = vsel %vm3367_vm5, %v3368_v15, %v3366_v47 }
0x1db8   :  { %v4081_v19 = vpop.eup %4080  ;;  %v3371_v30 = vadd.f32 1e-06, %v3369_v57 }
0x1db9   :  { %v3373_v44 = vmul.f32 %v4081_v19, %v3370_v54  ;;  %vm3378_vm6 = vweird.f32 %v4081_v19 }
0x1dba   :  { %4082 = vrcp.f32 %v3371_v30  ;;  %vm3379_vm8 = vmor %vm3377_vm7, %vm3378_vm6  ;;  %v3397_v53 = vand.u32 2147483648, %v3371_v30  ;;  %v3395_v4 = vand.u32 2147483647, %v3371_v30  ;;  %vm3391_vm11 = vweird.f32 %v3371_v30 }
0x1dbb   :  { %v3374_v5 = vsub.f32 1.0, %v3373_v44 }
0x1dbc   :  { %v3398_v40 = vor.u32 1.1754944e-38, %v3397_v53  ;;  %vm3396_vm14 = vcmp.eq.f32.partialorder %v3395_v4, 8.507059e+37 }
0x1dbd   :  { %v3375_v60 = vmul.f32 %v4081_v19, %v3374_v5 }
0x1dbf   :  { %v3376_v62 = vadd.f32 %v4081_v19, %v3375_v60 }
0x1dc0   :  { %v4083_v3 = vpop.eup %4082 }
0x1dc1   :  { %v3380_v22 = vsel %vm3379_vm8, %v4081_v19, %v3376_v62  ;;  %v3387_v35 = vmul.f32 %v4083_v3, %v3371_v30  ;;  %vm3392_vm10 = vweird.f32 %v4083_v3 }
0x1dc2   :  { %v3385_v26 = vsel %vm3382_vm9, %v3384_v58, %v3380_v22  ;;  %vm3393_vm13 = vmor %vm3391_vm11, %vm3392_vm10 }
0x1dc3   :  { %v3400_v20 = vmul.f32 %v3385_v26, %v5238_v1  ;;  %v3388_v51 = vsub.f32 1.0, %v3387_v35 }
0x1dc5   :  { %v3403_v16 = vmul.f32 %v3402_v9, %v3400_v20  ;;  %v3389_v41 = vmul.f32 %v4083_v3, %v3388_v51 }
0x1dc7   :  { %v3406_v6 = vadd.f32 %v3405_v50, %v3403_v16  ;;  %v3390_v39 = vadd.f32 %v4083_v3, %v3389_v41 }
0x1dc9   :  { %3765 = vmatmul.msk.f32.vlgmr.msra.gmra.mxu2 %vm130_vm0, %v3406_v6  ;;  %v3394_v28 = vsel %vm3393_vm13, %v4083_v3, %v3390_v39 }
0x1dca   :  { %v3399_v21 = vsel %vm3396_vm14, %v3398_v40, %v3394_v28 }
0x1dcb   :  { %v3401_v1 = vmul.f32 %v3399_v21, %v5245_v42  ;;  %v4104_v42 = vld [vmem:[#allocation8] sm:$0x3] }
0x1dcc   :  { %v3413_v13 = vperm.slane %v4104_v42, 1 }
0x1dcd   :  { %v3404_v24 = vmul.f32 %v3402_v9, %v3401_v1 }
0x1dcf   :  { %v3407_v46 = vadd.f32 %v3405_v50, %v3404_v24 }
0x1dd1   :  { %3766 = vmatmul.msk.f32.gmra.mxu2 %vm130_vm0, %v3407_v46 }
0x1e4c   :  { %v3437_v31 = vpop.f32.mrf.mxu2 }
0x1e4d   :  { %v3438_v25 = vadd.f32 %v3437_v31, %v3413_v13 }
0x1e4f   :  { %v3443_v32 = vmax.f32 %v3438_v25, 0.0 }
0x1e51   :  { %3775 = vmatmul.msk.f32.vlgmr.msra.gmra.mxu0 %vm1784_vm12, %v3443_v32 }
0x1e54   :  { %v3440_v37 = vpop.f32.mrf.mxu2 }
0x1e55   :  { %v3441_v2 = vadd.f32 %v3440_v37, %v3413_v13  ;;  %v4106_v13 = vld [vmem:[#allocation2] sm:$0x7f] }
0x1e56   :  { %v3564_v31 = vperm.slane %v4106_v13, 6 }
0x1e57   :  { %v3444_v33 = vmax.f32 %v3441_v2, 0.0  ;;  %v4107_v2 = vld [vmem:[%s5329_s5] sm:$0x7f]  ;;  %s3576_s5 = sshll.u32 %s4278_s19, 4  ;;  %s3577_s5 = int_to_ptr.vmem [resolvable:$true] %s3576_s5 }
0x1e59   :  { %3776 = vmatmul.msk.f32.gmra.mxu0 %vm1784_vm12, %v3444_v33  ;;  %v3567_v33 = vperm.slane %v4107_v2, 6 }
0x1ece   :  { %v3477_v59 = vpop.f32.mrf.mxu0 }
0x1ecf   :  { %v3483_v12 = vadd.f32 %v3477_v59, %v5227_v63 }
0x1ed1   :  { %v3486_v29 = vadd.f32 %v3485_v56, %v3483_v12 }
0x1ed3   :  { %v3488_v0 = vsel %vm130_vm0, %v3486_v29, 0.0 }
0x1ed4   :  { %3489 = vadd.xlane.f32.xlu1 %v3488_v0 }
0x1ed6   :  { %v3480_v34 = vpop.f32.mrf.mxu0 }
0x1ed7   :  { %v3484_v43 = vadd.f32 %v3480_v34, %v5232_v11 }
0x1ed9   :  { %v3487_v54 = vadd.f32 %v3485_v56, %v3484_v43 }
0x1edb   :  { %v3491_v45 = vsel %vm130_vm0, %v3487_v54, 0.0 }
0x1edc   :  { %3492 = vadd.xlane.f32.xlu0 %v3491_v45 }
0x1f47   :  { %v3490_v14 = vpop.xlane.xlu1 %3489 }
0x1f48   :  { %v3494_v36 = vmul.f32 %v3490_v14, %v4385_v10 }
0x1f4a   :  { %v5301_v38 = vsub.f32 %v3486_v29, %v3494_v36 }
0x1f4c   :  { %v3498_v48 = vmul.f32 %v5301_v38, %v5301_v38 }
0x1f4e   :  { %v3500_v63 = vsel %vm130_vm0, %v3498_v48, 0.0 }
0x1f4f   :  { %v3493_v52 = vpop.xlane.xlu0 %3492  ;;  %3501 = vadd.xlane.f32.xlu2 %v3500_v63 }
0x1f50   :  { %v3495_v15 = vmul.f32 %v3493_v52, %v4385_v10 }
0x1f52   :  { %v5307_v23 = vsub.f32 %v3487_v54, %v3495_v15 }
0x1f54   :  { %v3499_v11 = vmul.f32 %v5307_v23, %v5307_v23 }
0x1f56   :  { %v3503_v47 = vsel %vm130_vm0, %v3499_v11, 0.0 }
0x1f57   :  { %3504 = vadd.xlane.f32.xlu1 %v3503_v47 }
0x1fc2   :  { %v3502_v57 = vpop.xlane.xlu2 %3501 }
0x1fc3   :  { %v3506_v61 = vmul.f32 %v3502_v57, %v4401_v27 }
0x1fc5   :  { %4084 = vrsqrt.f32 %v3506_v61  ;;  %vm3515_vm12 = vcmp.eq.f32.partialorder %v3506_v61, inf  ;;  %v3518_v9 = vand.u32 2147483648, %v3506_v61  ;;  %vm3517_vm2 = vcmp.eq.f32.partialorder %v3506_v61, 0.0 }
0x1fca   :  { %v3505_v19 = vpop.xlane.xlu1 %3504 }
0x1fcb   :  { %v4085_v30 = vpop.eup %4084  ;;  %v3507_v44 = vmul.f32 %v3505_v19, %v4401_v27 }
0x1fcc   :  { %v3509_v5 = vmul.f32 %v4085_v30, %v3506_v61 }
0x1fcd   :  { %4086 = vrsqrt.f32 %v3507_v44  ;;  %vm3527_vm3 = vcmp.eq.f32.partialorder %v3507_v44, inf  ;;  %v3530_v16 = vand.u32 2147483648, %v3507_v44  ;;  %vm3529_vm15 = vcmp.eq.f32.partialorder %v3507_v44, 0.0 }
0x1fce   :  { %v3510_v17 = vmul.f32 %v4085_v30, %v3509_v5 }
0x1fd0   :  { %v3511_v10 = vmul.f32 0.5, %v3510_v17 }
0x1fd2   :  { %v3512_v60 = vsub.f32 1.5, %v3511_v10 }
0x1fd3   :  { %v4087_v18 = vpop.eup %4086 }
0x1fd4   :  { %v3513_v62 = vmul.f32 %v4085_v30, %v3512_v60  ;;  %v3521_v3 = vmul.f32 %v4087_v18, %v3507_v44 }
0x1fd6   :  { %v3514_v58 = vmul.f32 %v3513_v62, %v3506_v61  ;;  %v3522_v22 = vmul.f32 %v4087_v18, %v3521_v3 }
0x1fd8   :  { %v3516_v35 = vsel %vm3515_vm12, %v3506_v61, %v3514_v58  ;;  %v3523_v26 = vmul.f32 0.5, %v3522_v22 }
0x1fd9   :  { %v3519_v20 = vsel %vm3517_vm2, %v3518_v9, %v3516_v35 }
0x1fda   :  { %v3532_v50 = vadd.f32 1e-06, %v3519_v20  ;;  %v3524_v51 = vsub.f32 1.5, %v3523_v26 }
0x1fdc   :  { %4088 = vrcp.f32 %v3532_v50  ;;  %v3525_v27 = vmul.f32 %v4087_v18, %v3524_v51  ;;  %v3545_v21 = vand.u32 2147483648, %v3532_v50  ;;  %v3543_v24 = vand.u32 2147483647, %v3532_v50 }
0x1fdd   :  { %vm3539_vm4 = vweird.f32 %v3532_v50 }
0x1fde   :  { %v3526_v53 = vmul.f32 %v3525_v27, %v3507_v44  ;;  %v3546_v8 = vor.u32 1.1754944e-38, %v3545_v21  ;;  %vm3544_vm6 = vcmp.eq.f32.partialorder %v3543_v24, 8.507059e+37 }
0x1fe0   :  { %v3528_v41 = vsel %vm3527_vm3, %v3507_v44, %v3526_v53 }
0x1fe1   :  { %v3531_v4 = vsel %vm3529_vm15, %v3530_v16, %v3528_v41 }
0x1fe2   :  { %v4089_v6 = vpop.eup %4088  ;;  %v3533_v39 = vadd.f32 1e-06, %v3531_v4 }
0x1fe3   :  { %v3535_v40 = vmul.f32 %v4089_v6, %v3532_v50  ;;  %vm3540_vm1 = vweird.f32 %v4089_v6 }
0x1fe4   :  { %4090 = vrcp.f32 %v3533_v39  ;;  %vm3541_vm5 = vmor %vm3539_vm4, %vm3540_vm1  ;;  %v3559_v7 = vand.u32 2147483648, %v3533_v39  ;;  %v3557_v59 = vand.u32 2147483647, %v3533_v39  ;;  %vm3553_vm8 = vweird.f32 %v3533_v39 }
0x1fe5   :  { %v3536_v28 = vsub.f32 1.0, %v3535_v40 }
0x1fe6   :  { %v3560_v34 = vor.u32 1.1754944e-38, %v3559_v7  ;;  %vm3558_vm10 = vcmp.eq.f32.partialorder %v3557_v59, 8.507059e+37 }
0x1fe7   :  { %v3537_v1 = vmul.f32 %v4089_v6, %v3536_v28 }
0x1fe9   :  { %v3538_v46 = vadd.f32 %v4089_v6, %v3537_v1 }
0x1fea   :  { %v4091_v49 = vpop.eup %4090 }
0x1feb   :  { %v3542_v55 = vsel %vm3541_vm5, %v4089_v6, %v3538_v46  ;;  %v3549_v42 = vmul.f32 %v4091_v49, %v3533_v39  ;;  %vm3554_vm7 = vweird.f32 %v4091_v49 }
0x1fec   :  { %v3547_v25 = vsel %vm3544_vm6, %v3546_v8, %v3542_v55  ;;  %vm3555_vm9 = vmor %vm3553_vm8, %vm3554_vm7 }
0x1fed   :  { %v3550_v32 = vsub.f32 1.0, %v3549_v42  ;;  %v3562_v37 = vmul.f32 %v3547_v25, %v5301_v38 }
0x1fef   :  { %v3551_v56 = vmul.f32 %v4091_v49, %v3550_v32  ;;  %v3565_v12 = vmul.f32 %v3564_v31, %v3562_v37 }
0x1ff1   :  { %v3552_v29 = vadd.f32 %v4091_v49, %v3551_v56  ;;  %v3568_v0 = vadd.f32 %v3567_v33, %v3565_v12 }
0x1ff3   :  { %v3556_v43 = vsel %vm3555_vm9, %v4091_v49, %v3552_v29  ;;  %3570 = vst.msk [vmem:[#allocation11] sm:$0xff] %vm130_vm0, %v3568_v0 }
0x1ff4   :  { %v3561_v54 = vsel %vm3558_vm10, %v3560_v34, %v3556_v43 }
0x1ff5   :  { %v3563_v45 = vmul.f32 %v3561_v54, %v5307_v23 }
0x1ff7   :  { %v3566_v14 = vmul.f32 %v3564_v31, %v3563_v45 }
0x1ff9   :  { %v3569_v36 = vadd.f32 %v3567_v33, %v3566_v14 }
0x1ffb   :  { %3571 = vst.msk [vmem:[#allocation11 + $0x8] sm:$0xff] %vm130_vm0, %v3569_v36 }
0x1ffc   :  { %3584 = dma.vmem_to_hbm [thread:$0]  %s3577_s5, 256, %s3579_s8, [#allocation4], %s4279_s11, %s4279_s11, %s4280_s30  }
0x1ffd   :  { %4258 = dma.done.wait [#allocation4], 256  }
0x1ffe   :  { %4259 = vsyncadd [#allocation4], 4294967040 }
0x1fff   :  { %3589 = vsyncpa [#allocation3], 1 }
0x2000   :  { %3590 = vsyncpa [#allocation6], 1 }
0x2001   :  { %3591 = vsyncpa [#allocation9], 1 }
0x2002   :  { %3592 = vsyncpa [#allocation4], 1 }

</bundles_post_ra>
